<compile_context>
chip_gen: v7x
topology: tpu7x:2x2x1
jax: 0.10.0
libtpu: 0.0.40
codegen_flags: <defaults>
</compile_context>

<pallas_src>
import jax
import jax.numpy as jnp
import numpy as np
from jax.experimental import pallas as pl
from jax.experimental.pallas import tpu as pltpu

K = 5  # conv kernel size (both conv layers)


# ---------------------------- fused Pallas kernel ----------------------------

def _lenet5_kernel(x_ref, m1_ref, b1_ref, m2_ref, b2_ref,
                   s1_ref, p1_ref, s2_ref, p2_ref,
                   fw1_ref, fb1_ref, fw2_ref, fb2_ref, fw3_ref, fb3_ref,
                   o_ref, feat_ref):
    f32 = jnp.float32
    TB = x_ref.shape[0]          # images per grid step (static)

    # --- per-image feature extractor, statically unrolled over the TB images.
    # (Static Python unroll: every ref index below is a compile-time constant;
    #  each image's intermediates die after the feat_ref store.)
    for i in range(TB):
        x = x_ref[i]                                  # (32, W*Cin); rows=H, lanes pack (w, c)

        # conv1 (5x5, Cin->6) + tanh: 5 shifted-row-slab band matmuls.
        ho1 = x.shape[0] - K + 1                      # 28
        acc = jnp.dot(x[0:ho1, :], m1_ref[0], preferred_element_type=f32)
        for dy in range(1, K):
            acc = acc + jnp.dot(x[dy:dy + ho1, :], m1_ref[dy],
                                preferred_element_type=f32)
        c1 = jnp.tanh(acc + b1_ref[...])              # (28, 168); lanes pack (w, cout)

        # pool1: 2x2/stride-2 max pool via exact 0/1 selection matmuls.
        r1 = jnp.maximum(jnp.dot(s1_ref[0], c1, preferred_element_type=f32),
                         jnp.dot(s1_ref[1], c1, preferred_element_type=f32))   # (14, 168)
        p1 = jnp.maximum(jnp.dot(r1, p1_ref[0], preferred_element_type=f32),
                         jnp.dot(r1, p1_ref[1], preferred_element_type=f32))   # (14, 84)

        # conv2 (5x5, 6->16) + tanh.
        ho2 = p1.shape[0] - K + 1                     # 10
        acc = jnp.dot(p1[0:ho2, :], m2_ref[0], preferred_element_type=f32)
        for dy in range(1, K):
            acc = acc + jnp.dot(p1[dy:dy + ho2, :], m2_ref[dy],
                                preferred_element_type=f32)
        c2 = jnp.tanh(acc + b2_ref[...])              # (10, 160)

        # pool2
        r2 = jnp.maximum(jnp.dot(s2_ref[0], c2, preferred_element_type=f32),
                         jnp.dot(s2_ref[1], c2, preferred_element_type=f32))   # (5, 160)
        p2 = jnp.maximum(jnp.dot(r2, p2_ref[0], preferred_element_type=f32),
                         jnp.dot(r2, p2_ref[1], preferred_element_type=f32))   # (5, 80)

        # Stage the pooled features into the (5, TB, 80) scratch so the
        # classifier can run batched over the TB images.
        for y in range(K):
            feat_ref[y, i:i + 1, :] = p2[y:y + 1, :]

    # --- batched classifier over the TB images (M = TB matmuls).
    # fc1 weight is pre-permuted to (5, 80, 120) so torch's NCHW flatten
    # becomes an accumulation over the 5 pooled rows (no in-kernel reshape).
    h = jnp.dot(feat_ref[0], fw1_ref[0], preferred_element_type=f32)
    for y in range(1, K):
        h = h + jnp.dot(feat_ref[y], fw1_ref[y], preferred_element_type=f32)
    h = jnp.tanh(h + fb1_ref[...])                                              # (TB, 120)
    h = jnp.tanh(jnp.dot(h, fw2_ref[...], preferred_element_type=f32)
                 + fb2_ref[...])                                                # (TB, 84)
    # Lane-dense (TB, 128) store; padded logit columns are exactly zero.
    o_ref[...] = jnp.dot(h, fw3_ref[...], preferred_element_type=f32) + fb3_ref[...]


# ---------------------------- wrapper ----------------------------

def _full_spec(arr):
    zeros = (0,) * arr.ndim
    return pl.BlockSpec(arr.shape, lambda i, z=zeros: z)


def lenet5_forward(x_nchw, prep, *, num_classes, tb=8):
    (m1, b1p, m2, b2p, s1, p1s, s2, p2s,
     fw1p, fb1r, fw2t, fb2r, fw3p, fb3p) = prep
    B, cin, H, W = x_nchw.shape
    nc_pad = fw3p.shape[1]

    # Images per grid step: whole batch in one step when it fits, else `tb`
    # (multiple of 8 so the (TB, nc_pad) output block stays sublane-legal).
    if B <= tb:
        TB = B
    else:
        assert tb % 8 == 0, "tb must be a multiple of 8 for multi-step grids"
        TB = tb
    B_pad = ((B + TB - 1) // TB) * TB

    # NCHW -> per-image (H, W*Cin) with lanes packing (w, c).  For Cin == 1
    # this is a trivial reshape.
    x = jnp.transpose(x_nchw, (0, 2, 3, 1)).reshape(B, H, W * cin)
    if B_pad != B:
        x = jnp.pad(x, ((0, B_pad - B), (0, 0), (0, 0)))

    weights = (m1, b1p, m2, b2p, s1, p1s, s2, p2s,
               fw1p, fb1r, fw2t, fb2r, fw3p, fb3p)
    out = pl.pallas_call(
        _lenet5_kernel,
        out_shape=jax.ShapeDtypeStruct((B_pad, nc_pad), jnp.float32),
        grid=(B_pad // TB,),
        in_specs=[pl.BlockSpec((TB, H, W * cin), lambda i: (i, 0, 0))]
                 + [_full_spec(w) for w in weights],
        out_specs=pl.BlockSpec((TB, nc_pad), lambda i: (i, 0)),
        scratch_shapes=[pltpu.VMEM((K, TB, 5 * 16), jnp.float32)],
        compiler_params=pltpu.CompilerParams(
            dimension_semantics=("parallel",)),
    )(x, *weights)
    return out[:B, :num_classes]


# ------------------ one-time parameter repack (host side, numpy) ------------------

def prepare_params(params, lane_pad=128):
    """Repack PyTorch-shaped params into the matrices the fused kernel consumes."""
    (w1, b1, w2, b2, fw1, fb1, fw2, fb2, fw3, fb3) = [
        np.asarray(p, np.float32) for p in params]

    def conv_band(w_oihw, w_in):
        # out[dy, (x+dx)*Cin + c, x*O + o] = w[o, c, dy, dx]
        O, cin, kh, kw = w_oihw.shape
        w_out = w_in - kw + 1
        m = np.zeros((kh, w_in * cin, w_out * O), np.float32)
        for dy in range(kh):
            for dx in range(kw):
                wt = w_oihw[:, :, dy, dx].T                      # (Cin, O)
                for x in range(w_out):
                    m[dy, (x + dx) * cin:(x + dx + 1) * cin, x * O:(x + 1) * O] = wt
        return m

    def row_pool_sel(h_in):
        h_out = h_in // 2
        s = np.zeros((2, h_out, h_in), np.float32)
        r = np.arange(h_out)
        s[0, r, 2 * r] = 1.0
        s[1, r, 2 * r + 1] = 1.0
        return s

    def lane_pool_sel(w_in, c):
        w_out = w_in // 2
        p = np.zeros((2, w_in * c, w_out * c), np.float32)
        for x in range(w_out):
            for cc in range(c):
                p[0, (2 * x) * c + cc, x * c + cc] = 1.0
                p[1, (2 * x + 1) * c + cc, x * c + cc] = 1.0
        return p

    cin = w1.shape[1]
    m1 = conv_band(w1, 32)                 # (5, 32*Cin, 28*6)
    b1p = np.tile(b1, 28)[None, :]         # (1, 168)
    m2 = conv_band(w2, 14)                 # (5, 84, 160)
    b2p = np.tile(b2, 10)[None, :]         # (1, 160)

    s1 = row_pool_sel(28)                  # (2, 14, 28)
    p1s = lane_pool_sel(28, 6)             # (2, 168, 84)
    s2 = row_pool_sel(10)                  # (2, 5, 10)
    p2s = lane_pool_sel(10, 16)            # (2, 160, 80)

    # fc1: permute 400 input features from torch's NCHW flatten order
    # (o*25 + y*5 + x) to the kernel's (y, x*16 + o) layout.
    idx = np.zeros((5, 80), np.int64)
    for y in range(5):
        for x in range(5):
            for o in range(16):
                idx[y, x * 16 + o] = o * 25 + y * 5 + x
    fw1p = np.transpose(fw1[:, idx], (1, 2, 0)).astype(np.float32)   # (5, 80, 120)

    # fc3: zero-pad output columns to a lane-dense multiple of 128.
    nc = fw3.shape[0]
    nc_pad = max(lane_pad, ((nc + lane_pad - 1) // lane_pad) * lane_pad)
    fw3p = np.zeros((fw3.shape[1], nc_pad), np.float32)
    fw3p[:, :nc] = fw3.T
    fb3p = np.zeros((1, nc_pad), np.float32)
    fb3p[0, :nc] = fb3

    prep = (m1, b1p, m2, b2p, s1, p1s, s2, p2s,
            fw1p, fb1[None, :], fw2.T.copy(), fb2[None, :], fw3p, fb3p)
    return tuple(jnp.asarray(a, dtype=jnp.float32) for a in prep)


# ---------------------------- params & pure-JAX reference ----------------------------

def init_params(key, num_classes=10, in_channels=1):
    """Deterministic synthetic init with PyTorch parameter shapes."""
    ks = jax.random.split(key, 10)

    def w(k, shape, fan_in):
        return (jax.random.normal(k, shape, jnp.float32) / np.sqrt(fan_in)
                ).astype(jnp.float32)

    w1 = w(ks[0], (6, in_channels, 5, 5), in_channels * 25)
    b1 = w(ks[1], (6,), in_channels * 25)
    w2 = w(ks[2], (16, 6, 5, 5), 6 * 25)
    b2 = w(ks[3], (16,), 6 * 25)
    fw1 = w(ks[4], (120, 16 * 5 * 5), 400)
    fb1 = w(ks[5], (120,), 400)
    fw2 = w(ks[6], (84, 120), 120)
    fb2 = w(ks[7], (84,), 120)
    fw3 = w(ks[8], (num_classes, 84), 84)
    fb3 = w(ks[9], (num_classes,), 84)
    return (w1, b1, w2, b2, fw1, fb1, fw2, fb2, fw3, fb3)


def lenet5_ref(x, params):
    """Pure-JAX reference matching torch semantics (exact-f32 path)."""
    hp = jax.lax.Precision.HIGHEST
    w1, b1, w2, b2, fw1, fb1, fw2, fb2, fw3, fb3 = params
    dn = ('NCHW', 'OIHW', 'NCHW')
    y = jax.lax.conv_general_dilated(x, w1, (1, 1), 'VALID',
                                     dimension_numbers=dn, precision=hp)
    y = jnp.tanh(y + b1[None, :, None, None])
    y = jax.lax.reduce_window(y, -jnp.inf, jax.lax.max, (1, 1, 2, 2), (1, 1, 2, 2), 'VALID')
    y = jax.lax.conv_general_dilated(y, w2, (1, 1), 'VALID',
                                     dimension_numbers=dn, precision=hp)
    y = jnp.tanh(y + b2[None, :, None, None])
    y = jax.lax.reduce_window(y, -jnp.inf, jax.lax.max, (1, 1, 2, 2), (1, 1, 2, 2), 'VALID')
    y = y.reshape(y.shape[0], -1)
    y = jnp.tanh(jnp.dot(y, fw1.T, precision=hp) + fb1)
    y = jnp.tanh(jnp.dot(y, fw2.T, precision=hp) + fb2)
    return jnp.dot(y, fw3.T, precision=hp) + fb3


if __name__ == "__main__":
    key = jax.random.PRNGKey(0)
    kx, _ = jax.random.split(key)

    # LeNet-5 / MNIST: grayscale=True -> 1 input channel, 32x32 spatial, batch=2
    B, C_in, H, W = 2, 1, 32, 32
    num_classes = 10
    x = jax.random.normal(kx, (B, C_in, H, W), dtype=jnp.float32)
    params = init_params(jax.random.PRNGKey(42), num_classes=num_classes,
                         in_channels=C_in)

    prep = prepare_params(params)              # one-time host-side repack
    fwd = jax.jit(lenet5_forward, static_argnames=("num_classes", "tb"))
    logits = jax.block_until_ready(fwd(x, prep, num_classes=num_classes))
    assert logits.shape == (B, num_classes)
    assert logits.dtype == jnp.float32

    ref = jax.block_until_ready(lenet5_ref(x, params))
    # Tightened from 5e-2: the all-f32 band-matmul path tracks the HIGHEST-
    # precision reference to ~1e-5; 1e-3 leaves margin while catching any
    # layout/permutation bug (those produce O(1) errors).
    np.testing.assert_allclose(np.asarray(logits), np.asarray(ref),
                               atol=1e-3, rtol=1e-3)

    print("KERNEL_OK")
</pallas_src>

<mosaic_0001>
module attributes {stable_mosaic.version = 11 : i64} {
  func.func @_lenet5_kernel(%arg0: i32, %arg1: memref<2x32x32xf32, #tpu.memory_space<vmem>>, %arg2: memref<5x32x168xf32, #tpu.memory_space<vmem>>, %arg3: memref<1x168xf32, #tpu.memory_space<vmem>>, %arg4: memref<5x84x160xf32, #tpu.memory_space<vmem>>, %arg5: memref<1x160xf32, #tpu.memory_space<vmem>>, %arg6: memref<2x14x28xf32, #tpu.memory_space<vmem>>, %arg7: memref<2x168x84xf32, #tpu.memory_space<vmem>>, %arg8: memref<2x5x10xf32, #tpu.memory_space<vmem>>, %arg9: memref<2x160x80xf32, #tpu.memory_space<vmem>>, %arg10: memref<5x80x120xf32, #tpu.memory_space<vmem>>, %arg11: memref<1x120xf32, #tpu.memory_space<vmem>>, %arg12: memref<120x84xf32, #tpu.memory_space<vmem>>, %arg13: memref<1x84xf32, #tpu.memory_space<vmem>>, %arg14: memref<84x128xf32, #tpu.memory_space<vmem>>, %arg15: memref<1x128xf32, #tpu.memory_space<vmem>>, %arg16: memref<2x128xf32, #tpu.memory_space<vmem>>, %arg17: memref<5x2x80xf32, #tpu.memory_space<vmem>>) attributes {dimension_semantics = [#tpu.dimension_semantics<parallel>], iteration_bounds = array<i64: 1>, scalar_prefetch = 0 : i64, scratch_operands = 1 : i64, tpu.core_type = #tpu.core_type<tc>, window_params = [{transform_indices = @transform_0, window_bounds = array<i64: 2, 32, 32>}, {pipeline_mode = #tpu.pipeline_mode<synchronous>, transform_indices = @transform_1, window_bounds = array<i64: 5, 32, 168>}, {pipeline_mode = #tpu.pipeline_mode<synchronous>, transform_indices = @transform_2, window_bounds = array<i64: 1, 168>}, {pipeline_mode = #tpu.pipeline_mode<synchronous>, transform_indices = @transform_3, window_bounds = array<i64: 5, 84, 160>}, {pipeline_mode = #tpu.pipeline_mode<synchronous>, transform_indices = @transform_4, window_bounds = array<i64: 1, 160>}, {pipeline_mode = #tpu.pipeline_mode<synchronous>, transform_indices = @transform_5, window_bounds = array<i64: 2, 14, 28>}, {pipeline_mode = #tpu.pipeline_mode<synchronous>, transform_indices = @transform_6, window_bounds = array<i64: 2, 168, 84>}, {pipeline_mode = #tpu.pipeline_mode<synchronous>, transform_indices = @transform_7, window_bounds = array<i64: 2, 5, 10>}, {pipeline_mode = #tpu.pipeline_mode<synchronous>, transform_indices = @transform_8, window_bounds = array<i64: 2, 160, 80>}, {pipeline_mode = #tpu.pipeline_mode<synchronous>, transform_indices = @transform_9, window_bounds = array<i64: 5, 80, 120>}, {pipeline_mode = #tpu.pipeline_mode<synchronous>, transform_indices = @transform_10, window_bounds = array<i64: 1, 120>}, {pipeline_mode = #tpu.pipeline_mode<synchronous>, transform_indices = @transform_11, window_bounds = array<i64: 120, 84>}, {pipeline_mode = #tpu.pipeline_mode<synchronous>, transform_indices = @transform_12, window_bounds = array<i64: 1, 84>}, {pipeline_mode = #tpu.pipeline_mode<synchronous>, transform_indices = @transform_13, window_bounds = array<i64: 84, 128>}, {pipeline_mode = #tpu.pipeline_mode<synchronous>, transform_indices = @transform_14, window_bounds = array<i64: 1, 128>}, {transform_indices = @transform_15, window_bounds = array<i64: 2, 128>}]} {
    %c0 = arith.constant 0 : index
    %c0_0 = arith.constant 0 : index
    %c0_1 = arith.constant 0 : index
    %0 = vector.load %arg1[%c0, %c0_0, %c0_1] : memref<2x32x32xf32, #tpu.memory_space<vmem>>, vector<1x32x32xf32>
    %1 = vector.shape_cast %0 : vector<1x32x32xf32> to vector<32x32xf32>
    %2 = vector.extract_strided_slice %1 {offsets = [0, 0], sizes = [28, 32], strides = [1, 1]} : vector<32x32xf32> to vector<28x32xf32>
    %c0_2 = arith.constant 0 : index
    %c0_3 = arith.constant 0 : index
    %c0_4 = arith.constant 0 : index
    %3 = vector.load %arg2[%c0_2, %c0_3, %c0_4] : memref<5x32x168xf32, #tpu.memory_space<vmem>>, vector<1x32x168xf32>
    %4 = vector.shape_cast %3 : vector<1x32x168xf32> to vector<32x168xf32>
    %cst = arith.constant dense<0.000000e+00> : vector<28x168xf32>
    %5 = tpu.matmul %2, %4, %cst {dimension_numbers = #tpu.dot_dimension_numbers<[1], [0], [0], [1], [0, 0, 1, 1], [], []>} : vector<28x32xf32>, vector<32x168xf32>, vector<28x168xf32> -> vector<28x168xf32>
    %6 = vector.extract_strided_slice %1 {offsets = [1, 0], sizes = [28, 32], strides = [1, 1]} : vector<32x32xf32> to vector<28x32xf32>
    %c1 = arith.constant 1 : index
    %c0_5 = arith.constant 0 : index
    %c0_6 = arith.constant 0 : index
    %7 = vector.load %arg2[%c1, %c0_5, %c0_6] : memref<5x32x168xf32, #tpu.memory_space<vmem>>, vector<1x32x168xf32>
    %8 = vector.shape_cast %7 : vector<1x32x168xf32> to vector<32x168xf32>
    %cst_7 = arith.constant dense<0.000000e+00> : vector<28x168xf32>
    %9 = tpu.matmul %6, %8, %cst_7 {dimension_numbers = #tpu.dot_dimension_numbers<[1], [0], [0], [1], [0, 0, 1, 1], [], []>} : vector<28x32xf32>, vector<32x168xf32>, vector<28x168xf32> -> vector<28x168xf32>
    %10 = arith.addf %5, %9 : vector<28x168xf32>
    %11 = vector.extract_strided_slice %1 {offsets = [2, 0], sizes = [28, 32], strides = [1, 1]} : vector<32x32xf32> to vector<28x32xf32>
    %c2 = arith.constant 2 : index
    %c0_8 = arith.constant 0 : index
    %c0_9 = arith.constant 0 : index
    %12 = vector.load %arg2[%c2, %c0_8, %c0_9] : memref<5x32x168xf32, #tpu.memory_space<vmem>>, vector<1x32x168xf32>
    %13 = vector.shape_cast %12 : vector<1x32x168xf32> to vector<32x168xf32>
    %cst_10 = arith.constant dense<0.000000e+00> : vector<28x168xf32>
    %14 = tpu.matmul %11, %13, %cst_10 {dimension_numbers = #tpu.dot_dimension_numbers<[1], [0], [0], [1], [0, 0, 1, 1], [], []>} : vector<28x32xf32>, vector<32x168xf32>, vector<28x168xf32> -> vector<28x168xf32>
    %15 = arith.addf %10, %14 : vector<28x168xf32>
    %16 = vector.extract_strided_slice %1 {offsets = [3, 0], sizes = [28, 32], strides = [1, 1]} : vector<32x32xf32> to vector<28x32xf32>
    %c3 = arith.constant 3 : index
    %c0_11 = arith.constant 0 : index
    %c0_12 = arith.constant 0 : index
    %17 = vector.load %arg2[%c3, %c0_11, %c0_12] : memref<5x32x168xf32, #tpu.memory_space<vmem>>, vector<1x32x168xf32>
    %18 = vector.shape_cast %17 : vector<1x32x168xf32> to vector<32x168xf32>
    %cst_13 = arith.constant dense<0.000000e+00> : vector<28x168xf32>
    %19 = tpu.matmul %16, %18, %cst_13 {dimension_numbers = #tpu.dot_dimension_numbers<[1], [0], [0], [1], [0, 0, 1, 1], [], []>} : vector<28x32xf32>, vector<32x168xf32>, vector<28x168xf32> -> vector<28x168xf32>
    %20 = arith.addf %15, %19 : vector<28x168xf32>
    %21 = vector.extract_strided_slice %1 {offsets = [4, 0], sizes = [28, 32], strides = [1, 1]} : vector<32x32xf32> to vector<28x32xf32>
    %c4 = arith.constant 4 : index
    %c0_14 = arith.constant 0 : index
    %c0_15 = arith.constant 0 : index
    %22 = vector.load %arg2[%c4, %c0_14, %c0_15] : memref<5x32x168xf32, #tpu.memory_space<vmem>>, vector<1x32x168xf32>
    %23 = vector.shape_cast %22 : vector<1x32x168xf32> to vector<32x168xf32>
    %cst_16 = arith.constant dense<0.000000e+00> : vector<28x168xf32>
    %24 = tpu.matmul %21, %23, %cst_16 {dimension_numbers = #tpu.dot_dimension_numbers<[1], [0], [0], [1], [0, 0, 1, 1], [], []>} : vector<28x32xf32>, vector<32x168xf32>, vector<28x168xf32> -> vector<28x168xf32>
    %25 = arith.addf %20, %24 : vector<28x168xf32>
    %c0_17 = arith.constant 0 : index
    %c0_18 = arith.constant 0 : index
    %26 = vector.load %arg3[%c0_17, %c0_18] : memref<1x168xf32, #tpu.memory_space<vmem>>, vector<1x168xf32>
    %27 = vector.broadcast %26 : vector<1x168xf32> to vector<28x168xf32>
    %28 = arith.addf %25, %27 : vector<28x168xf32>
    %29 = math.tanh %28 : vector<28x168xf32>
    %c0_19 = arith.constant 0 : index
    %c0_20 = arith.constant 0 : index
    %c0_21 = arith.constant 0 : index
    %30 = vector.load %arg6[%c0_19, %c0_20, %c0_21] : memref<2x14x28xf32, #tpu.memory_space<vmem>>, vector<1x14x28xf32>
    %31 = vector.shape_cast %30 : vector<1x14x28xf32> to vector<14x28xf32>
    %cst_22 = arith.constant dense<0.000000e+00> : vector<14x168xf32>
    %32 = tpu.matmul %31, %29, %cst_22 {dimension_numbers = #tpu.dot_dimension_numbers<[1], [0], [0], [1], [0, 0, 1, 1], [], []>} : vector<14x28xf32>, vector<28x168xf32>, vector<14x168xf32> -> vector<14x168xf32>
    %c1_23 = arith.constant 1 : index
    %c0_24 = arith.constant 0 : index
    %c0_25 = arith.constant 0 : index
    %33 = vector.load %arg6[%c1_23, %c0_24, %c0_25] : memref<2x14x28xf32, #tpu.memory_space<vmem>>, vector<1x14x28xf32>
    %34 = vector.shape_cast %33 : vector<1x14x28xf32> to vector<14x28xf32>
    %cst_26 = arith.constant dense<0.000000e+00> : vector<14x168xf32>
    %35 = tpu.matmul %34, %29, %cst_26 {dimension_numbers = #tpu.dot_dimension_numbers<[1], [0], [0], [1], [0, 0, 1, 1], [], []>} : vector<14x28xf32>, vector<28x168xf32>, vector<14x168xf32> -> vector<14x168xf32>
    %36 = arith.maximumf %32, %35 : vector<14x168xf32>
    %c0_27 = arith.constant 0 : index
    %c0_28 = arith.constant 0 : index
    %c0_29 = arith.constant 0 : index
    %37 = vector.load %arg7[%c0_27, %c0_28, %c0_29] : memref<2x168x84xf32, #tpu.memory_space<vmem>>, vector<1x168x84xf32>
    %38 = vector.shape_cast %37 : vector<1x168x84xf32> to vector<168x84xf32>
    %cst_30 = arith.constant dense<0.000000e+00> : vector<14x84xf32>
    %39 = tpu.matmul %36, %38, %cst_30 {dimension_numbers = #tpu.dot_dimension_numbers<[1], [0], [0], [1], [0, 0, 1, 1], [], []>} : vector<14x168xf32>, vector<168x84xf32>, vector<14x84xf32> -> vector<14x84xf32>
    %c1_31 = arith.constant 1 : index
    %c0_32 = arith.constant 0 : index
    %c0_33 = arith.constant 0 : index
    %40 = vector.load %arg7[%c1_31, %c0_32, %c0_33] : memref<2x168x84xf32, #tpu.memory_space<vmem>>, vector<1x168x84xf32>
    %41 = vector.shape_cast %40 : vector<1x168x84xf32> to vector<168x84xf32>
    %cst_34 = arith.constant dense<0.000000e+00> : vector<14x84xf32>
    %42 = tpu.matmul %36, %41, %cst_34 {dimension_numbers = #tpu.dot_dimension_numbers<[1], [0], [0], [1], [0, 0, 1, 1], [], []>} : vector<14x168xf32>, vector<168x84xf32>, vector<14x84xf32> -> vector<14x84xf32>
    %43 = arith.maximumf %39, %42 : vector<14x84xf32>
    %44 = vector.extract_strided_slice %43 {offsets = [0, 0], sizes = [10, 84], strides = [1, 1]} : vector<14x84xf32> to vector<10x84xf32>
    %c0_35 = arith.constant 0 : index
    %c0_36 = arith.constant 0 : index
    %c0_37 = arith.constant 0 : index
    %45 = vector.load %arg4[%c0_35, %c0_36, %c0_37] : memref<5x84x160xf32, #tpu.memory_space<vmem>>, vector<1x84x160xf32>
    %46 = vector.shape_cast %45 : vector<1x84x160xf32> to vector<84x160xf32>
    %cst_38 = arith.constant dense<0.000000e+00> : vector<10x160xf32>
    %47 = tpu.matmul %44, %46, %cst_38 {dimension_numbers = #tpu.dot_dimension_numbers<[1], [0], [0], [1], [0, 0, 1, 1], [], []>} : vector<10x84xf32>, vector<84x160xf32>, vector<10x160xf32> -> vector<10x160xf32>
    %48 = vector.extract_strided_slice %43 {offsets = [1, 0], sizes = [10, 84], strides = [1, 1]} : vector<14x84xf32> to vector<10x84xf32>
    %c1_39 = arith.constant 1 : index
    %c0_40 = arith.constant 0 : index
    %c0_41 = arith.constant 0 : index
    %49 = vector.load %arg4[%c1_39, %c0_40, %c0_41] : memref<5x84x160xf32, #tpu.memory_space<vmem>>, vector<1x84x160xf32>
    %50 = vector.shape_cast %49 : vector<1x84x160xf32> to vector<84x160xf32>
    %cst_42 = arith.constant dense<0.000000e+00> : vector<10x160xf32>
    %51 = tpu.matmul %48, %50, %cst_42 {dimension_numbers = #tpu.dot_dimension_numbers<[1], [0], [0], [1], [0, 0, 1, 1], [], []>} : vector<10x84xf32>, vector<84x160xf32>, vector<10x160xf32> -> vector<10x160xf32>
    %52 = arith.addf %47, %51 : vector<10x160xf32>
    %53 = vector.extract_strided_slice %43 {offsets = [2, 0], sizes = [10, 84], strides = [1, 1]} : vector<14x84xf32> to vector<10x84xf32>
    %c2_43 = arith.constant 2 : index
    %c0_44 = arith.constant 0 : index
    %c0_45 = arith.constant 0 : index
    %54 = vector.load %arg4[%c2_43, %c0_44, %c0_45] : memref<5x84x160xf32, #tpu.memory_space<vmem>>, vector<1x84x160xf32>
    %55 = vector.shape_cast %54 : vector<1x84x160xf32> to vector<84x160xf32>
    %cst_46 = arith.constant dense<0.000000e+00> : vector<10x160xf32>
    %56 = tpu.matmul %53, %55, %cst_46 {dimension_numbers = #tpu.dot_dimension_numbers<[1], [0], [0], [1], [0, 0, 1, 1], [], []>} : vector<10x84xf32>, vector<84x160xf32>, vector<10x160xf32> -> vector<10x160xf32>
    %57 = arith.addf %52, %56 : vector<10x160xf32>
    %58 = vector.extract_strided_slice %43 {offsets = [3, 0], sizes = [10, 84], strides = [1, 1]} : vector<14x84xf32> to vector<10x84xf32>
    %c3_47 = arith.constant 3 : index
    %c0_48 = arith.constant 0 : index
    %c0_49 = arith.constant 0 : index
    %59 = vector.load %arg4[%c3_47, %c0_48, %c0_49] : memref<5x84x160xf32, #tpu.memory_space<vmem>>, vector<1x84x160xf32>
    %60 = vector.shape_cast %59 : vector<1x84x160xf32> to vector<84x160xf32>
    %cst_50 = arith.constant dense<0.000000e+00> : vector<10x160xf32>
    %61 = tpu.matmul %58, %60, %cst_50 {dimension_numbers = #tpu.dot_dimension_numbers<[1], [0], [0], [1], [0, 0, 1, 1], [], []>} : vector<10x84xf32>, vector<84x160xf32>, vector<10x160xf32> -> vector<10x160xf32>
    %62 = arith.addf %57, %61 : vector<10x160xf32>
    %63 = vector.extract_strided_slice %43 {offsets = [4, 0], sizes = [10, 84], strides = [1, 1]} : vector<14x84xf32> to vector<10x84xf32>
    %c4_51 = arith.constant 4 : index
    %c0_52 = arith.constant 0 : index
    %c0_53 = arith.constant 0 : index
    %64 = vector.load %arg4[%c4_51, %c0_52, %c0_53] : memref<5x84x160xf32, #tpu.memory_space<vmem>>, vector<1x84x160xf32>
    %65 = vector.shape_cast %64 : vector<1x84x160xf32> to vector<84x160xf32>
    %cst_54 = arith.constant dense<0.000000e+00> : vector<10x160xf32>
    %66 = tpu.matmul %63, %65, %cst_54 {dimension_numbers = #tpu.dot_dimension_numbers<[1], [0], [0], [1], [0, 0, 1, 1], [], []>} : vector<10x84xf32>, vector<84x160xf32>, vector<10x160xf32> -> vector<10x160xf32>
    %67 = arith.addf %62, %66 : vector<10x160xf32>
    %c0_55 = arith.constant 0 : index
    %c0_56 = arith.constant 0 : index
    %68 = vector.load %arg5[%c0_55, %c0_56] : memref<1x160xf32, #tpu.memory_space<vmem>>, vector<1x160xf32>
    %69 = vector.broadcast %68 : vector<1x160xf32> to vector<10x160xf32>
    %70 = arith.addf %67, %69 : vector<10x160xf32>
    %71 = math.tanh %70 : vector<10x160xf32>
    %c0_57 = arith.constant 0 : index
    %c0_58 = arith.constant 0 : index
    %c0_59 = arith.constant 0 : index
    %72 = vector.load %arg8[%c0_57, %c0_58, %c0_59] : memref<2x5x10xf32, #tpu.memory_space<vmem>>, vector<1x5x10xf32>
    %73 = vector.shape_cast %72 : vector<1x5x10xf32> to vector<5x10xf32>
    %cst_60 = arith.constant dense<0.000000e+00> : vector<5x160xf32>
    %74 = tpu.matmul %73, %71, %cst_60 {dimension_numbers = #tpu.dot_dimension_numbers<[1], [0], [0], [1], [0, 0, 1, 1], [], []>} : vector<5x10xf32>, vector<10x160xf32>, vector<5x160xf32> -> vector<5x160xf32>
    %c1_61 = arith.constant 1 : index
    %c0_62 = arith.constant 0 : index
    %c0_63 = arith.constant 0 : index
    %75 = vector.load %arg8[%c1_61, %c0_62, %c0_63] : memref<2x5x10xf32, #tpu.memory_space<vmem>>, vector<1x5x10xf32>
    %76 = vector.shape_cast %75 : vector<1x5x10xf32> to vector<5x10xf32>
    %cst_64 = arith.constant dense<0.000000e+00> : vector<5x160xf32>
    %77 = tpu.matmul %76, %71, %cst_64 {dimension_numbers = #tpu.dot_dimension_numbers<[1], [0], [0], [1], [0, 0, 1, 1], [], []>} : vector<5x10xf32>, vector<10x160xf32>, vector<5x160xf32> -> vector<5x160xf32>
    %78 = arith.maximumf %74, %77 : vector<5x160xf32>
    %c0_65 = arith.constant 0 : index
    %c0_66 = arith.constant 0 : index
    %c0_67 = arith.constant 0 : index
    %79 = vector.load %arg9[%c0_65, %c0_66, %c0_67] : memref<2x160x80xf32, #tpu.memory_space<vmem>>, vector<1x160x80xf32>
    %80 = vector.shape_cast %79 : vector<1x160x80xf32> to vector<160x80xf32>
    %cst_68 = arith.constant dense<0.000000e+00> : vector<5x80xf32>
    %81 = tpu.matmul %78, %80, %cst_68 {dimension_numbers = #tpu.dot_dimension_numbers<[1], [0], [0], [1], [0, 0, 1, 1], [], []>} : vector<5x160xf32>, vector<160x80xf32>, vector<5x80xf32> -> vector<5x80xf32>
    %c1_69 = arith.constant 1 : index
    %c0_70 = arith.constant 0 : index
    %c0_71 = arith.constant 0 : index
    %82 = vector.load %arg9[%c1_69, %c0_70, %c0_71] : memref<2x160x80xf32, #tpu.memory_space<vmem>>, vector<1x160x80xf32>
    %83 = vector.shape_cast %82 : vector<1x160x80xf32> to vector<160x80xf32>
    %cst_72 = arith.constant dense<0.000000e+00> : vector<5x80xf32>
    %84 = tpu.matmul %78, %83, %cst_72 {dimension_numbers = #tpu.dot_dimension_numbers<[1], [0], [0], [1], [0, 0, 1, 1], [], []>} : vector<5x160xf32>, vector<160x80xf32>, vector<5x80xf32> -> vector<5x80xf32>
    %85 = arith.maximumf %81, %84 : vector<5x80xf32>
    %86 = vector.extract_strided_slice %85 {offsets = [0, 0], sizes = [1, 80], strides = [1, 1]} : vector<5x80xf32> to vector<1x80xf32>
    %c0_73 = arith.constant 0 : index
    %c0_74 = arith.constant 0 : index
    %c0_75 = arith.constant 0 : index
    %87 = vector.load %arg17[%c0_73, %c0_74, %c0_75] : memref<5x2x80xf32, #tpu.memory_space<vmem>>, vector<1x1x80xf32>
    %88 = vector.shape_cast %87 : vector<1x1x80xf32> to vector<1x80xf32>
    %89 = vector.shape_cast %86 : vector<1x80xf32> to vector<1x1x80xf32>
    tpu.vector_store %arg17[%c0_73, %c0_74, %c0_75], %89 {strides = array<i32>} : memref<5x2x80xf32, #tpu.memory_space<vmem>>, vector<1x1x80xf32>,
    %90 = vector.extract_strided_slice %85 {offsets = [1, 0], sizes = [1, 80], strides = [1, 1]} : vector<5x80xf32> to vector<1x80xf32>
    %c1_76 = arith.constant 1 : index
    %c0_77 = arith.constant 0 : index
    %c0_78 = arith.constant 0 : index
    %91 = vector.load %arg17[%c1_76, %c0_77, %c0_78] : memref<5x2x80xf32, #tpu.memory_space<vmem>>, vector<1x1x80xf32>
    %92 = vector.shape_cast %91 : vector<1x1x80xf32> to vector<1x80xf32>
    %93 = vector.shape_cast %90 : vector<1x80xf32> to vector<1x1x80xf32>
    tpu.vector_store %arg17[%c1_76, %c0_77, %c0_78], %93 {strides = array<i32>} : memref<5x2x80xf32, #tpu.memory_space<vmem>>, vector<1x1x80xf32>,
    %94 = vector.extract_strided_slice %85 {offsets = [2, 0], sizes = [1, 80], strides = [1, 1]} : vector<5x80xf32> to vector<1x80xf32>
    %c2_79 = arith.constant 2 : index
    %c0_80 = arith.constant 0 : index
    %c0_81 = arith.constant 0 : index
    %95 = vector.load %arg17[%c2_79, %c0_80, %c0_81] : memref<5x2x80xf32, #tpu.memory_space<vmem>>, vector<1x1x80xf32>
    %96 = vector.shape_cast %95 : vector<1x1x80xf32> to vector<1x80xf32>
    %97 = vector.shape_cast %94 : vector<1x80xf32> to vector<1x1x80xf32>
    tpu.vector_store %arg17[%c2_79, %c0_80, %c0_81], %97 {strides = array<i32>} : memref<5x2x80xf32, #tpu.memory_space<vmem>>, vector<1x1x80xf32>,
    %98 = vector.extract_strided_slice %85 {offsets = [3, 0], sizes = [1, 80], strides = [1, 1]} : vector<5x80xf32> to vector<1x80xf32>
    %c3_82 = arith.constant 3 : index
    %c0_83 = arith.constant 0 : index
    %c0_84 = arith.constant 0 : index
    %99 = vector.load %arg17[%c3_82, %c0_83, %c0_84] : memref<5x2x80xf32, #tpu.memory_space<vmem>>, vector<1x1x80xf32>
    %100 = vector.shape_cast %99 : vector<1x1x80xf32> to vector<1x80xf32>
    %101 = vector.shape_cast %98 : vector<1x80xf32> to vector<1x1x80xf32>
    tpu.vector_store %arg17[%c3_82, %c0_83, %c0_84], %101 {strides = array<i32>} : memref<5x2x80xf32, #tpu.memory_space<vmem>>, vector<1x1x80xf32>,
    %102 = vector.extract_strided_slice %85 {offsets = [4, 0], sizes = [1, 80], strides = [1, 1]} : vector<5x80xf32> to vector<1x80xf32>
    %c4_85 = arith.constant 4 : index
    %c0_86 = arith.constant 0 : index
    %c0_87 = arith.constant 0 : index
    %103 = vector.load %arg17[%c4_85, %c0_86, %c0_87] : memref<5x2x80xf32, #tpu.memory_space<vmem>>, vector<1x1x80xf32>
    %104 = vector.shape_cast %103 : vector<1x1x80xf32> to vector<1x80xf32>
    %105 = vector.shape_cast %102 : vector<1x80xf32> to vector<1x1x80xf32>
    tpu.vector_store %arg17[%c4_85, %c0_86, %c0_87], %105 {strides = array<i32>} : memref<5x2x80xf32, #tpu.memory_space<vmem>>, vector<1x1x80xf32>,
    %c1_88 = arith.constant 1 : index
    %c0_89 = arith.constant 0 : index
    %c0_90 = arith.constant 0 : index
    %106 = vector.load %arg1[%c1_88, %c0_89, %c0_90] : memref<2x32x32xf32, #tpu.memory_space<vmem>>, vector<1x32x32xf32>
    %107 = vector.shape_cast %106 : vector<1x32x32xf32> to vector<32x32xf32>
    %108 = vector.extract_strided_slice %107 {offsets = [0, 0], sizes = [28, 32], strides = [1, 1]} : vector<32x32xf32> to vector<28x32xf32>
    %c0_91 = arith.constant 0 : index
    %c0_92 = arith.constant 0 : index
    %c0_93 = arith.constant 0 : index
    %109 = vector.load %arg2[%c0_91, %c0_92, %c0_93] : memref<5x32x168xf32, #tpu.memory_space<vmem>>, vector<1x32x168xf32>
    %110 = vector.shape_cast %109 : vector<1x32x168xf32> to vector<32x168xf32>
    %cst_94 = arith.constant dense<0.000000e+00> : vector<28x168xf32>
    %111 = tpu.matmul %108, %110, %cst_94 {dimension_numbers = #tpu.dot_dimension_numbers<[1], [0], [0], [1], [0, 0, 1, 1], [], []>} : vector<28x32xf32>, vector<32x168xf32>, vector<28x168xf32> -> vector<28x168xf32>
    %112 = vector.extract_strided_slice %107 {offsets = [1, 0], sizes = [28, 32], strides = [1, 1]} : vector<32x32xf32> to vector<28x32xf32>
    %c1_95 = arith.constant 1 : index
    %c0_96 = arith.constant 0 : index
    %c0_97 = arith.constant 0 : index
    %113 = vector.load %arg2[%c1_95, %c0_96, %c0_97] : memref<5x32x168xf32, #tpu.memory_space<vmem>>, vector<1x32x168xf32>
    %114 = vector.shape_cast %113 : vector<1x32x168xf32> to vector<32x168xf32>
    %cst_98 = arith.constant dense<0.000000e+00> : vector<28x168xf32>
    %115 = tpu.matmul %112, %114, %cst_98 {dimension_numbers = #tpu.dot_dimension_numbers<[1], [0], [0], [1], [0, 0, 1, 1], [], []>} : vector<28x32xf32>, vector<32x168xf32>, vector<28x168xf32> -> vector<28x168xf32>
    %116 = arith.addf %111, %115 : vector<28x168xf32>
    %117 = vector.extract_strided_slice %107 {offsets = [2, 0], sizes = [28, 32], strides = [1, 1]} : vector<32x32xf32> to vector<28x32xf32>
    %c2_99 = arith.constant 2 : index
    %c0_100 = arith.constant 0 : index
    %c0_101 = arith.constant 0 : index
    %118 = vector.load %arg2[%c2_99, %c0_100, %c0_101] : memref<5x32x168xf32, #tpu.memory_space<vmem>>, vector<1x32x168xf32>
    %119 = vector.shape_cast %118 : vector<1x32x168xf32> to vector<32x168xf32>
    %cst_102 = arith.constant dense<0.000000e+00> : vector<28x168xf32>
    %120 = tpu.matmul %117, %119, %cst_102 {dimension_numbers = #tpu.dot_dimension_numbers<[1], [0], [0], [1], [0, 0, 1, 1], [], []>} : vector<28x32xf32>, vector<32x168xf32>, vector<28x168xf32> -> vector<28x168xf32>
    %121 = arith.addf %116, %120 : vector<28x168xf32>
    %122 = vector.extract_strided_slice %107 {offsets = [3, 0], sizes = [28, 32], strides = [1, 1]} : vector<32x32xf32> to vector<28x32xf32>
    %c3_103 = arith.constant 3 : index
    %c0_104 = arith.constant 0 : index
    %c0_105 = arith.constant 0 : index
    %123 = vector.load %arg2[%c3_103, %c0_104, %c0_105] : memref<5x32x168xf32, #tpu.memory_space<vmem>>, vector<1x32x168xf32>
    %124 = vector.shape_cast %123 : vector<1x32x168xf32> to vector<32x168xf32>
    %cst_106 = arith.constant dense<0.000000e+00> : vector<28x168xf32>
    %125 = tpu.matmul %122, %124, %cst_106 {dimension_numbers = #tpu.dot_dimension_numbers<[1], [0], [0], [1], [0, 0, 1, 1], [], []>} : vector<28x32xf32>, vector<32x168xf32>, vector<28x168xf32> -> vector<28x168xf32>
    %126 = arith.addf %121, %125 : vector<28x168xf32>
    %127 = vector.extract_strided_slice %107 {offsets = [4, 0], sizes = [28, 32], strides = [1, 1]} : vector<32x32xf32> to vector<28x32xf32>
    %c4_107 = arith.constant 4 : index
    %c0_108 = arith.constant 0 : index
    %c0_109 = arith.constant 0 : index
    %128 = vector.load %arg2[%c4_107, %c0_108, %c0_109] : memref<5x32x168xf32, #tpu.memory_space<vmem>>, vector<1x32x168xf32>
    %129 = vector.shape_cast %128 : vector<1x32x168xf32> to vector<32x168xf32>
    %cst_110 = arith.constant dense<0.000000e+00> : vector<28x168xf32>
    %130 = tpu.matmul %127, %129, %cst_110 {dimension_numbers = #tpu.dot_dimension_numbers<[1], [0], [0], [1], [0, 0, 1, 1], [], []>} : vector<28x32xf32>, vector<32x168xf32>, vector<28x168xf32> -> vector<28x168xf32>
    %131 = arith.addf %126, %130 : vector<28x168xf32>
    %c0_111 = arith.constant 0 : index
    %c0_112 = arith.constant 0 : index
    %132 = vector.load %arg3[%c0_111, %c0_112] : memref<1x168xf32, #tpu.memory_space<vmem>>, vector<1x168xf32>
    %133 = vector.broadcast %132 : vector<1x168xf32> to vector<28x168xf32>
    %134 = arith.addf %131, %133 : vector<28x168xf32>
    %135 = math.tanh %134 : vector<28x168xf32>
    %c0_113 = arith.constant 0 : index
    %c0_114 = arith.constant 0 : index
    %c0_115 = arith.constant 0 : index
    %136 = vector.load %arg6[%c0_113, %c0_114, %c0_115] : memref<2x14x28xf32, #tpu.memory_space<vmem>>, vector<1x14x28xf32>
    %137 = vector.shape_cast %136 : vector<1x14x28xf32> to vector<14x28xf32>
    %cst_116 = arith.constant dense<0.000000e+00> : vector<14x168xf32>
    %138 = tpu.matmul %137, %135, %cst_116 {dimension_numbers = #tpu.dot_dimension_numbers<[1], [0], [0], [1], [0, 0, 1, 1], [], []>} : vector<14x28xf32>, vector<28x168xf32>, vector<14x168xf32> -> vector<14x168xf32>
    %c1_117 = arith.constant 1 : index
    %c0_118 = arith.constant 0 : index
    %c0_119 = arith.constant 0 : index
    %139 = vector.load %arg6[%c1_117, %c0_118, %c0_119] : memref<2x14x28xf32, #tpu.memory_space<vmem>>, vector<1x14x28xf32>
    %140 = vector.shape_cast %139 : vector<1x14x28xf32> to vector<14x28xf32>
    %cst_120 = arith.constant dense<0.000000e+00> : vector<14x168xf32>
    %141 = tpu.matmul %140, %135, %cst_120 {dimension_numbers = #tpu.dot_dimension_numbers<[1], [0], [0], [1], [0, 0, 1, 1], [], []>} : vector<14x28xf32>, vector<28x168xf32>, vector<14x168xf32> -> vector<14x168xf32>
    %142 = arith.maximumf %138, %141 : vector<14x168xf32>
    %c0_121 = arith.constant 0 : index
    %c0_122 = arith.constant 0 : index
    %c0_123 = arith.constant 0 : index
    %143 = vector.load %arg7[%c0_121, %c0_122, %c0_123] : memref<2x168x84xf32, #tpu.memory_space<vmem>>, vector<1x168x84xf32>
    %144 = vector.shape_cast %143 : vector<1x168x84xf32> to vector<168x84xf32>
    %cst_124 = arith.constant dense<0.000000e+00> : vector<14x84xf32>
    %145 = tpu.matmul %142, %144, %cst_124 {dimension_numbers = #tpu.dot_dimension_numbers<[1], [0], [0], [1], [0, 0, 1, 1], [], []>} : vector<14x168xf32>, vector<168x84xf32>, vector<14x84xf32> -> vector<14x84xf32>
    %c1_125 = arith.constant 1 : index
    %c0_126 = arith.constant 0 : index
    %c0_127 = arith.constant 0 : index
    %146 = vector.load %arg7[%c1_125, %c0_126, %c0_127] : memref<2x168x84xf32, #tpu.memory_space<vmem>>, vector<1x168x84xf32>
    %147 = vector.shape_cast %146 : vector<1x168x84xf32> to vector<168x84xf32>
    %cst_128 = arith.constant dense<0.000000e+00> : vector<14x84xf32>
    %148 = tpu.matmul %142, %147, %cst_128 {dimension_numbers = #tpu.dot_dimension_numbers<[1], [0], [0], [1], [0, 0, 1, 1], [], []>} : vector<14x168xf32>, vector<168x84xf32>, vector<14x84xf32> -> vector<14x84xf32>
    %149 = arith.maximumf %145, %148 : vector<14x84xf32>
    %150 = vector.extract_strided_slice %149 {offsets = [0, 0], sizes = [10, 84], strides = [1, 1]} : vector<14x84xf32> to vector<10x84xf32>
    %c0_129 = arith.constant 0 : index
    %c0_130 = arith.constant 0 : index
    %c0_131 = arith.constant 0 : index
    %151 = vector.load %arg4[%c0_129, %c0_130, %c0_131] : memref<5x84x160xf32, #tpu.memory_space<vmem>>, vector<1x84x160xf32>
    %152 = vector.shape_cast %151 : vector<1x84x160xf32> to vector<84x160xf32>
    %cst_132 = arith.constant dense<0.000000e+00> : vector<10x160xf32>
    %153 = tpu.matmul %150, %152, %cst_132 {dimension_numbers = #tpu.dot_dimension_numbers<[1], [0], [0], [1], [0, 0, 1, 1], [], []>} : vector<10x84xf32>, vector<84x160xf32>, vector<10x160xf32> -> vector<10x160xf32>
    %154 = vector.extract_strided_slice %149 {offsets = [1, 0], sizes = [10, 84], strides = [1, 1]} : vector<14x84xf32> to vector<10x84xf32>
    %c1_133 = arith.constant 1 : index
    %c0_134 = arith.constant 0 : index
    %c0_135 = arith.constant 0 : index
    %155 = vector.load %arg4[%c1_133, %c0_134, %c0_135] : memref<5x84x160xf32, #tpu.memory_space<vmem>>, vector<1x84x160xf32>
    %156 = vector.shape_cast %155 : vector<1x84x160xf32> to vector<84x160xf32>
    %cst_136 = arith.constant dense<0.000000e+00> : vector<10x160xf32>
    %157 = tpu.matmul %154, %156, %cst_136 {dimension_numbers = #tpu.dot_dimension_numbers<[1], [0], [0], [1], [0, 0, 1, 1], [], []>} : vector<10x84xf32>, vector<84x160xf32>, vector<10x160xf32> -> vector<10x160xf32>
    %158 = arith.addf %153, %157 : vector<10x160xf32>
    %159 = vector.extract_strided_slice %149 {offsets = [2, 0], sizes = [10, 84], strides = [1, 1]} : vector<14x84xf32> to vector<10x84xf32>
    %c2_137 = arith.constant 2 : index
    %c0_138 = arith.constant 0 : index
    %c0_139 = arith.constant 0 : index
    %160 = vector.load %arg4[%c2_137, %c0_138, %c0_139] : memref<5x84x160xf32, #tpu.memory_space<vmem>>, vector<1x84x160xf32>
    %161 = vector.shape_cast %160 : vector<1x84x160xf32> to vector<84x160xf32>
    %cst_140 = arith.constant dense<0.000000e+00> : vector<10x160xf32>
    %162 = tpu.matmul %159, %161, %cst_140 {dimension_numbers = #tpu.dot_dimension_numbers<[1], [0], [0], [1], [0, 0, 1, 1], [], []>} : vector<10x84xf32>, vector<84x160xf32>, vector<10x160xf32> -> vector<10x160xf32>
    %163 = arith.addf %158, %162 : vector<10x160xf32>
    %164 = vector.extract_strided_slice %149 {offsets = [3, 0], sizes = [10, 84], strides = [1, 1]} : vector<14x84xf32> to vector<10x84xf32>
    %c3_141 = arith.constant 3 : index
    %c0_142 = arith.constant 0 : index
    %c0_143 = arith.constant 0 : index
    %165 = vector.load %arg4[%c3_141, %c0_142, %c0_143] : memref<5x84x160xf32, #tpu.memory_space<vmem>>, vector<1x84x160xf32>
    %166 = vector.shape_cast %165 : vector<1x84x160xf32> to vector<84x160xf32>
    %cst_144 = arith.constant dense<0.000000e+00> : vector<10x160xf32>
    %167 = tpu.matmul %164, %166, %cst_144 {dimension_numbers = #tpu.dot_dimension_numbers<[1], [0], [0], [1], [0, 0, 1, 1], [], []>} : vector<10x84xf32>, vector<84x160xf32>, vector<10x160xf32> -> vector<10x160xf32>
    %168 = arith.addf %163, %167 : vector<10x160xf32>
    %169 = vector.extract_strided_slice %149 {offsets = [4, 0], sizes = [10, 84], strides = [1, 1]} : vector<14x84xf32> to vector<10x84xf32>
    %c4_145 = arith.constant 4 : index
    %c0_146 = arith.constant 0 : index
    %c0_147 = arith.constant 0 : index
    %170 = vector.load %arg4[%c4_145, %c0_146, %c0_147] : memref<5x84x160xf32, #tpu.memory_space<vmem>>, vector<1x84x160xf32>
    %171 = vector.shape_cast %170 : vector<1x84x160xf32> to vector<84x160xf32>
    %cst_148 = arith.constant dense<0.000000e+00> : vector<10x160xf32>
    %172 = tpu.matmul %169, %171, %cst_148 {dimension_numbers = #tpu.dot_dimension_numbers<[1], [0], [0], [1], [0, 0, 1, 1], [], []>} : vector<10x84xf32>, vector<84x160xf32>, vector<10x160xf32> -> vector<10x160xf32>
    %173 = arith.addf %168, %172 : vector<10x160xf32>
    %c0_149 = arith.constant 0 : index
    %c0_150 = arith.constant 0 : index
    %174 = vector.load %arg5[%c0_149, %c0_150] : memref<1x160xf32, #tpu.memory_space<vmem>>, vector<1x160xf32>
    %175 = vector.broadcast %174 : vector<1x160xf32> to vector<10x160xf32>
    %176 = arith.addf %173, %175 : vector<10x160xf32>
    %177 = math.tanh %176 : vector<10x160xf32>
    %c0_151 = arith.constant 0 : index
    %c0_152 = arith.constant 0 : index
    %c0_153 = arith.constant 0 : index
    %178 = vector.load %arg8[%c0_151, %c0_152, %c0_153] : memref<2x5x10xf32, #tpu.memory_space<vmem>>, vector<1x5x10xf32>
    %179 = vector.shape_cast %178 : vector<1x5x10xf32> to vector<5x10xf32>
    %cst_154 = arith.constant dense<0.000000e+00> : vector<5x160xf32>
    %180 = tpu.matmul %179, %177, %cst_154 {dimension_numbers = #tpu.dot_dimension_numbers<[1], [0], [0], [1], [0, 0, 1, 1], [], []>} : vector<5x10xf32>, vector<10x160xf32>, vector<5x160xf32> -> vector<5x160xf32>
    %c1_155 = arith.constant 1 : index
    %c0_156 = arith.constant 0 : index
    %c0_157 = arith.constant 0 : index
    %181 = vector.load %arg8[%c1_155, %c0_156, %c0_157] : memref<2x5x10xf32, #tpu.memory_space<vmem>>, vector<1x5x10xf32>
    %182 = vector.shape_cast %181 : vector<1x5x10xf32> to vector<5x10xf32>
    %cst_158 = arith.constant dense<0.000000e+00> : vector<5x160xf32>
    %183 = tpu.matmul %182, %177, %cst_158 {dimension_numbers = #tpu.dot_dimension_numbers<[1], [0], [0], [1], [0, 0, 1, 1], [], []>} : vector<5x10xf32>, vector<10x160xf32>, vector<5x160xf32> -> vector<5x160xf32>
    %184 = arith.maximumf %180, %183 : vector<5x160xf32>
    %c0_159 = arith.constant 0 : index
    %c0_160 = arith.constant 0 : index
    %c0_161 = arith.constant 0 : index
    %185 = vector.load %arg9[%c0_159, %c0_160, %c0_161] : memref<2x160x80xf32, #tpu.memory_space<vmem>>, vector<1x160x80xf32>
    %186 = vector.shape_cast %185 : vector<1x160x80xf32> to vector<160x80xf32>
    %cst_162 = arith.constant dense<0.000000e+00> : vector<5x80xf32>
    %187 = tpu.matmul %184, %186, %cst_162 {dimension_numbers = #tpu.dot_dimension_numbers<[1], [0], [0], [1], [0, 0, 1, 1], [], []>} : vector<5x160xf32>, vector<160x80xf32>, vector<5x80xf32> -> vector<5x80xf32>
    %c1_163 = arith.constant 1 : index
    %c0_164 = arith.constant 0 : index
    %c0_165 = arith.constant 0 : index
    %188 = vector.load %arg9[%c1_163, %c0_164, %c0_165] : memref<2x160x80xf32, #tpu.memory_space<vmem>>, vector<1x160x80xf32>
    %189 = vector.shape_cast %188 : vector<1x160x80xf32> to vector<160x80xf32>
    %cst_166 = arith.constant dense<0.000000e+00> : vector<5x80xf32>
    %190 = tpu.matmul %184, %189, %cst_166 {dimension_numbers = #tpu.dot_dimension_numbers<[1], [0], [0], [1], [0, 0, 1, 1], [], []>} : vector<5x160xf32>, vector<160x80xf32>, vector<5x80xf32> -> vector<5x80xf32>
    %191 = arith.maximumf %187, %190 : vector<5x80xf32>
    %192 = vector.extract_strided_slice %191 {offsets = [0, 0], sizes = [1, 80], strides = [1, 1]} : vector<5x80xf32> to vector<1x80xf32>
    %c0_167 = arith.constant 0 : index
    %c1_168 = arith.constant 1 : index
    %c0_169 = arith.constant 0 : index
    %193 = vector.load %arg17[%c0_167, %c1_168, %c0_169] : memref<5x2x80xf32, #tpu.memory_space<vmem>>, vector<1x1x80xf32>
    %194 = vector.shape_cast %193 : vector<1x1x80xf32> to vector<1x80xf32>
    %195 = vector.shape_cast %192 : vector<1x80xf32> to vector<1x1x80xf32>
    tpu.vector_store %arg17[%c0_167, %c1_168, %c0_169], %195 {strides = array<i32>} : memref<5x2x80xf32, #tpu.memory_space<vmem>>, vector<1x1x80xf32>,
    %196 = vector.extract_strided_slice %191 {offsets = [1, 0], sizes = [1, 80], strides = [1, 1]} : vector<5x80xf32> to vector<1x80xf32>
    %c1_170 = arith.constant 1 : index
    %c1_171 = arith.constant 1 : index
    %c0_172 = arith.constant 0 : index
    %197 = vector.load %arg17[%c1_170, %c1_171, %c0_172] : memref<5x2x80xf32, #tpu.memory_space<vmem>>, vector<1x1x80xf32>
    %198 = vector.shape_cast %197 : vector<1x1x80xf32> to vector<1x80xf32>
    %199 = vector.shape_cast %196 : vector<1x80xf32> to vector<1x1x80xf32>
    tpu.vector_store %arg17[%c1_170, %c1_171, %c0_172], %199 {strides = array<i32>} : memref<5x2x80xf32, #tpu.memory_space<vmem>>, vector<1x1x80xf32>,
    %200 = vector.extract_strided_slice %191 {offsets = [2, 0], sizes = [1, 80], strides = [1, 1]} : vector<5x80xf32> to vector<1x80xf32>
    %c2_173 = arith.constant 2 : index
    %c1_174 = arith.constant 1 : index
    %c0_175 = arith.constant 0 : index
    %201 = vector.load %arg17[%c2_173, %c1_174, %c0_175] : memref<5x2x80xf32, #tpu.memory_space<vmem>>, vector<1x1x80xf32>
    %202 = vector.shape_cast %201 : vector<1x1x80xf32> to vector<1x80xf32>
    %203 = vector.shape_cast %200 : vector<1x80xf32> to vector<1x1x80xf32>
    tpu.vector_store %arg17[%c2_173, %c1_174, %c0_175], %203 {strides = array<i32>} : memref<5x2x80xf32, #tpu.memory_space<vmem>>, vector<1x1x80xf32>,
    %204 = vector.extract_strided_slice %191 {offsets = [3, 0], sizes = [1, 80], strides = [1, 1]} : vector<5x80xf32> to vector<1x80xf32>
    %c3_176 = arith.constant 3 : index
    %c1_177 = arith.constant 1 : index
    %c0_178 = arith.constant 0 : index
    %205 = vector.load %arg17[%c3_176, %c1_177, %c0_178] : memref<5x2x80xf32, #tpu.memory_space<vmem>>, vector<1x1x80xf32>
    %206 = vector.shape_cast %205 : vector<1x1x80xf32> to vector<1x80xf32>
    %207 = vector.shape_cast %204 : vector<1x80xf32> to vector<1x1x80xf32>
    tpu.vector_store %arg17[%c3_176, %c1_177, %c0_178], %207 {strides = array<i32>} : memref<5x2x80xf32, #tpu.memory_space<vmem>>, vector<1x1x80xf32>,
    %208 = vector.extract_strided_slice %191 {offsets = [4, 0], sizes = [1, 80], strides = [1, 1]} : vector<5x80xf32> to vector<1x80xf32>
    %c4_179 = arith.constant 4 : index
    %c1_180 = arith.constant 1 : index
    %c0_181 = arith.constant 0 : index
    %209 = vector.load %arg17[%c4_179, %c1_180, %c0_181] : memref<5x2x80xf32, #tpu.memory_space<vmem>>, vector<1x1x80xf32>
    %210 = vector.shape_cast %209 : vector<1x1x80xf32> to vector<1x80xf32>
    %211 = vector.shape_cast %208 : vector<1x80xf32> to vector<1x1x80xf32>
    tpu.vector_store %arg17[%c4_179, %c1_180, %c0_181], %211 {strides = array<i32>} : memref<5x2x80xf32, #tpu.memory_space<vmem>>, vector<1x1x80xf32>,
    %c0_182 = arith.constant 0 : index
    %c0_183 = arith.constant 0 : index
    %c0_184 = arith.constant 0 : index
    %212 = vector.load %arg17[%c0_182, %c0_183, %c0_184] : memref<5x2x80xf32, #tpu.memory_space<vmem>>, vector<1x2x80xf32>
    %213 = vector.shape_cast %212 : vector<1x2x80xf32> to vector<2x80xf32>
    %c0_185 = arith.constant 0 : index
    %c0_186 = arith.constant 0 : index
    %c0_187 = arith.constant 0 : index
    %214 = vector.load %arg10[%c0_185, %c0_186, %c0_187] : memref<5x80x120xf32, #tpu.memory_space<vmem>>, vector<1x80x120xf32>
    %215 = vector.shape_cast %214 : vector<1x80x120xf32> to vector<80x120xf32>
    %cst_188 = arith.constant dense<0.000000e+00> : vector<2x120xf32>
    %216 = tpu.matmul %213, %215, %cst_188 {dimension_numbers = #tpu.dot_dimension_numbers<[1], [0], [0], [1], [0, 0, 1, 1], [], []>} : vector<2x80xf32>, vector<80x120xf32>, vector<2x120xf32> -> vector<2x120xf32>
    %c1_189 = arith.constant 1 : index
    %c0_190 = arith.constant 0 : index
    %c0_191 = arith.constant 0 : index
    %217 = vector.load %arg17[%c1_189, %c0_190, %c0_191] : memref<5x2x80xf32, #tpu.memory_space<vmem>>, vector<1x2x80xf32>
    %218 = vector.shape_cast %217 : vector<1x2x80xf32> to vector<2x80xf32>
    %c1_192 = arith.constant 1 : index
    %c0_193 = arith.constant 0 : index
    %c0_194 = arith.constant 0 : index
    %219 = vector.load %arg10[%c1_192, %c0_193, %c0_194] : memref<5x80x120xf32, #tpu.memory_space<vmem>>, vector<1x80x120xf32>
    %220 = vector.shape_cast %219 : vector<1x80x120xf32> to vector<80x120xf32>
    %cst_195 = arith.constant dense<0.000000e+00> : vector<2x120xf32>
    %221 = tpu.matmul %218, %220, %cst_195 {dimension_numbers = #tpu.dot_dimension_numbers<[1], [0], [0], [1], [0, 0, 1, 1], [], []>} : vector<2x80xf32>, vector<80x120xf32>, vector<2x120xf32> -> vector<2x120xf32>
    %222 = arith.addf %216, %221 : vector<2x120xf32>
    %c2_196 = arith.constant 2 : index
    %c0_197 = arith.constant 0 : index
    %c0_198 = arith.constant 0 : index
    %223 = vector.load %arg17[%c2_196, %c0_197, %c0_198] : memref<5x2x80xf32, #tpu.memory_space<vmem>>, vector<1x2x80xf32>
    %224 = vector.shape_cast %223 : vector<1x2x80xf32> to vector<2x80xf32>
    %c2_199 = arith.constant 2 : index
    %c0_200 = arith.constant 0 : index
    %c0_201 = arith.constant 0 : index
    %225 = vector.load %arg10[%c2_199, %c0_200, %c0_201] : memref<5x80x120xf32, #tpu.memory_space<vmem>>, vector<1x80x120xf32>
    %226 = vector.shape_cast %225 : vector<1x80x120xf32> to vector<80x120xf32>
    %cst_202 = arith.constant dense<0.000000e+00> : vector<2x120xf32>
    %227 = tpu.matmul %224, %226, %cst_202 {dimension_numbers = #tpu.dot_dimension_numbers<[1], [0], [0], [1], [0, 0, 1, 1], [], []>} : vector<2x80xf32>, vector<80x120xf32>, vector<2x120xf32> -> vector<2x120xf32>
    %228 = arith.addf %222, %227 : vector<2x120xf32>
    %c3_203 = arith.constant 3 : index
    %c0_204 = arith.constant 0 : index
    %c0_205 = arith.constant 0 : index
    %229 = vector.load %arg17[%c3_203, %c0_204, %c0_205] : memref<5x2x80xf32, #tpu.memory_space<vmem>>, vector<1x2x80xf32>
    %230 = vector.shape_cast %229 : vector<1x2x80xf32> to vector<2x80xf32>
    %c3_206 = arith.constant 3 : index
    %c0_207 = arith.constant 0 : index
    %c0_208 = arith.constant 0 : index
    %231 = vector.load %arg10[%c3_206, %c0_207, %c0_208] : memref<5x80x120xf32, #tpu.memory_space<vmem>>, vector<1x80x120xf32>
    %232 = vector.shape_cast %231 : vector<1x80x120xf32> to vector<80x120xf32>
    %cst_209 = arith.constant dense<0.000000e+00> : vector<2x120xf32>
    %233 = tpu.matmul %230, %232, %cst_209 {dimension_numbers = #tpu.dot_dimension_numbers<[1], [0], [0], [1], [0, 0, 1, 1], [], []>} : vector<2x80xf32>, vector<80x120xf32>, vector<2x120xf32> -> vector<2x120xf32>
    %234 = arith.addf %228, %233 : vector<2x120xf32>
    %c4_210 = arith.constant 4 : index
    %c0_211 = arith.constant 0 : index
    %c0_212 = arith.constant 0 : index
    %235 = vector.load %arg17[%c4_210, %c0_211, %c0_212] : memref<5x2x80xf32, #tpu.memory_space<vmem>>, vector<1x2x80xf32>
    %236 = vector.shape_cast %235 : vector<1x2x80xf32> to vector<2x80xf32>
    %c4_213 = arith.constant 4 : index
    %c0_214 = arith.constant 0 : index
    %c0_215 = arith.constant 0 : index
    %237 = vector.load %arg10[%c4_213, %c0_214, %c0_215] : memref<5x80x120xf32, #tpu.memory_space<vmem>>, vector<1x80x120xf32>
    %238 = vector.shape_cast %237 : vector<1x80x120xf32> to vector<80x120xf32>
    %cst_216 = arith.constant dense<0.000000e+00> : vector<2x120xf32>
    %239 = tpu.matmul %236, %238, %cst_216 {dimension_numbers = #tpu.dot_dimension_numbers<[1], [0], [0], [1], [0, 0, 1, 1], [], []>} : vector<2x80xf32>, vector<80x120xf32>, vector<2x120xf32> -> vector<2x120xf32>
    %240 = arith.addf %234, %239 : vector<2x120xf32>
    %c0_217 = arith.constant 0 : index
    %c0_218 = arith.constant 0 : index
    %241 = vector.load %arg11[%c0_217, %c0_218] : memref<1x120xf32, #tpu.memory_space<vmem>>, vector<1x120xf32>
    %242 = vector.broadcast %241 : vector<1x120xf32> to vector<2x120xf32>
    %243 = arith.addf %240, %242 : vector<2x120xf32>
    %244 = math.tanh %243 : vector<2x120xf32>
    %c0_219 = arith.constant 0 : index
    %c0_220 = arith.constant 0 : index
    %245 = vector.load %arg12[%c0_219, %c0_220] : memref<120x84xf32, #tpu.memory_space<vmem>>, vector<120x84xf32>
    %cst_221 = arith.constant dense<0.000000e+00> : vector<2x84xf32>
    %246 = tpu.matmul %244, %245, %cst_221 {dimension_numbers = #tpu.dot_dimension_numbers<[1], [0], [0], [1], [0, 0, 1, 1], [], []>} : vector<2x120xf32>, vector<120x84xf32>, vector<2x84xf32> -> vector<2x84xf32>
    %c0_222 = arith.constant 0 : index
    %c0_223 = arith.constant 0 : index
    %247 = vector.load %arg13[%c0_222, %c0_223] : memref<1x84xf32, #tpu.memory_space<vmem>>, vector<1x84xf32>
    %248 = vector.broadcast %247 : vector<1x84xf32> to vector<2x84xf32>
    %249 = arith.addf %246, %248 : vector<2x84xf32>
    %250 = math.tanh %249 : vector<2x84xf32>
    %c0_224 = arith.constant 0 : index
    %c0_225 = arith.constant 0 : index
    %251 = vector.load %arg14[%c0_224, %c0_225] : memref<84x128xf32, #tpu.memory_space<vmem>>, vector<84x128xf32>
    %cst_226 = arith.constant dense<0.000000e+00> : vector<2x128xf32>
    %252 = tpu.matmul %250, %251, %cst_226 {dimension_numbers = #tpu.dot_dimension_numbers<[1], [0], [0], [1], [0, 0, 1, 1], [], []>} : vector<2x84xf32>, vector<84x128xf32>, vector<2x128xf32> -> vector<2x128xf32>
    %c0_227 = arith.constant 0 : index
    %c0_228 = arith.constant 0 : index
    %253 = vector.load %arg15[%c0_227, %c0_228] : memref<1x128xf32, #tpu.memory_space<vmem>>, vector<1x128xf32>
    %254 = vector.broadcast %253 : vector<1x128xf32> to vector<2x128xf32>
    %255 = arith.addf %252, %254 : vector<2x128xf32>
    %c0_229 = arith.constant 0 : index
    %c0_230 = arith.constant 0 : index
    %256 = vector.load %arg16[%c0_229, %c0_230] : memref<2x128xf32, #tpu.memory_space<vmem>>, vector<2x128xf32>
    tpu.vector_store %arg16[%c0_229, %c0_230], %255 {strides = array<i32>} : memref<2x128xf32, #tpu.memory_space<vmem>>, vector<2x128xf32>,
    return
  }
  func.func @transform_0(%arg0: i32) -> (i32, i32, i32) {
    %c0_i32 = arith.constant 0 : i32
    %c0_i32_0 = arith.constant 0 : i32
    %c0_i32_1 = arith.constant 0 : i32
    return %arg0, %c0_i32, %c0_i32_0 : i32, i32, i32
  }
  func.func @transform_1(%arg0: i32) -> (i32, i32, i32) {
    %c0_i32 = arith.constant 0 : i32
    %c0_i32_0 = arith.constant 0 : i32
    %c0_i32_1 = arith.constant 0 : i32
    %c0_i32_2 = arith.constant 0 : i32
    return %c0_i32, %c0_i32_0, %c0_i32_1 : i32, i32, i32
  }
  func.func @transform_2(%arg0: i32) -> (i32, i32) {
    %c0_i32 = arith.constant 0 : i32
    %c0_i32_0 = arith.constant 0 : i32
    %c0_i32_1 = arith.constant 0 : i32
    return %c0_i32, %c0_i32_0 : i32, i32
  }
  func.func @transform_3(%arg0: i32) -> (i32, i32, i32) {
    %c0_i32 = arith.constant 0 : i32
    %c0_i32_0 = arith.constant 0 : i32
    %c0_i32_1 = arith.constant 0 : i32
    %c0_i32_2 = arith.constant 0 : i32
    return %c0_i32, %c0_i32_0, %c0_i32_1 : i32, i32, i32
  }
  func.func @transform_4(%arg0: i32) -> (i32, i32) {
    %c0_i32 = arith.constant 0 : i32
    %c0_i32_0 = arith.constant 0 : i32
    %c0_i32_1 = arith.constant 0 : i32
    return %c0_i32, %c0_i32_0 : i32, i32
  }
  func.func @transform_5(%arg0: i32) -> (i32, i32, i32) {
    %c0_i32 = arith.constant 0 : i32
    %c0_i32_0 = arith.constant 0 : i32
    %c0_i32_1 = arith.constant 0 : i32
    %c0_i32_2 = arith.constant 0 : i32
    return %c0_i32, %c0_i32_0, %c0_i32_1 : i32, i32, i32
  }
  func.func @transform_6(%arg0: i32) -> (i32, i32, i32) {
    %c0_i32 = arith.constant 0 : i32
    %c0_i32_0 = arith.constant 0 : i32
    %c0_i32_1 = arith.constant 0 : i32
    %c0_i32_2 = arith.constant 0 : i32
    return %c0_i32, %c0_i32_0, %c0_i32_1 : i32, i32, i32
  }
  func.func @transform_7(%arg0: i32) -> (i32, i32, i32) {
    %c0_i32 = arith.constant 0 : i32
    %c0_i32_0 = arith.constant 0 : i32
    %c0_i32_1 = arith.constant 0 : i32
    %c0_i32_2 = arith.constant 0 : i32
    return %c0_i32, %c0_i32_0, %c0_i32_1 : i32, i32, i32
  }
  func.func @transform_8(%arg0: i32) -> (i32, i32, i32) {
    %c0_i32 = arith.constant 0 : i32
    %c0_i32_0 = arith.constant 0 : i32
    %c0_i32_1 = arith.constant 0 : i32
    %c0_i32_2 = arith.constant 0 : i32
    return %c0_i32, %c0_i32_0, %c0_i32_1 : i32, i32, i32
  }
  func.func @transform_9(%arg0: i32) -> (i32, i32, i32) {
    %c0_i32 = arith.constant 0 : i32
    %c0_i32_0 = arith.constant 0 : i32
    %c0_i32_1 = arith.constant 0 : i32
    %c0_i32_2 = arith.constant 0 : i32
    return %c0_i32, %c0_i32_0, %c0_i32_1 : i32, i32, i32
  }
  func.func @transform_10(%arg0: i32) -> (i32, i32) {
    %c0_i32 = arith.constant 0 : i32
    %c0_i32_0 = arith.constant 0 : i32
    %c0_i32_1 = arith.constant 0 : i32
    return %c0_i32, %c0_i32_0 : i32, i32
  }
  func.func @transform_11(%arg0: i32) -> (i32, i32) {
    %c0_i32 = arith.constant 0 : i32
    %c0_i32_0 = arith.constant 0 : i32
    %c0_i32_1 = arith.constant 0 : i32
    return %c0_i32, %c0_i32_0 : i32, i32
  }
  func.func @transform_12(%arg0: i32) -> (i32, i32) {
    %c0_i32 = arith.constant 0 : i32
    %c0_i32_0 = arith.constant 0 : i32
    %c0_i32_1 = arith.constant 0 : i32
    return %c0_i32, %c0_i32_0 : i32, i32
  }
  func.func @transform_13(%arg0: i32) -> (i32, i32) {
    %c0_i32 = arith.constant 0 : i32
    %c0_i32_0 = arith.constant 0 : i32
    %c0_i32_1 = arith.constant 0 : i32
    return %c0_i32, %c0_i32_0 : i32, i32
  }
  func.func @transform_14(%arg0: i32) -> (i32, i32) {
    %c0_i32 = arith.constant 0 : i32
    %c0_i32_0 = arith.constant 0 : i32
    %c0_i32_1 = arith.constant 0 : i32
    return %c0_i32, %c0_i32_0 : i32, i32
  }
  func.func @transform_15(%arg0: i32) -> (i32, i32) {
    %c0_i32 = arith.constant 0 : i32
    %c0_i32_0 = arith.constant 0 : i32
    return %arg0, %c0_i32 : i32, i32
  }
}

</mosaic_0001>

<bundles_post_ra>
// kernel: lenet5_forward.1
= control target key start
LH: loop header
LB: loop body
LE: loop exit
PB: predicated region body
PF: predicated region fallthrough
CT: control target
= control target key end

     0   :  { %v6219_v7 = vmov 0.0   ;;  %vm76_vm0 = vcmask 1046528   ;;  %vm84_vm1 = vcmask 261120   ;;  %vm532_vm2 = vcmask 1043456   ;;  %s8602_s0 = inlined_call_operand.vmem [shape: f32[2,32,32], index: 0, kind: input, shape index: {}]   ;;  %s8603_s1 = inlined_call_operand.vmem [shape: f32[5,32,168], index: 1, kind: input, shape index: {}]   ;;  %s8604_s2 = inlined_call_operand.vmem [shape: f32[1,168], index: 2, kind: input, shape index: {}]   ;;  %s8605_s3 = inlined_call_operand.vmem [shape: f32[5,84,160], index: 3, kind: input, shape index: {}]   ;;  %s8606_s4 = inlined_call_operand.vmem [shape: f32[1,160], index: 4, kind: input, shape index: {}]   ;;  %s8607_s5 = inlined_call_operand.vmem [shape: f32[2,14,28], index: 5, kind: input, shape index: {}]   ;;  %s8608_s6 = inlined_call_operand.vmem [shape: f32[2,168,84], index: 6, kind: input, shape index: {}]   ;;  %s8609_s7 = inlined_call_operand.vmem [shape: f32[2,5,10], index: 7, kind: input, shape index: {}]   ;;  %s8610_s8 = inlined_call_operand.vmem [shape: f32[2,160,80], index: 8, kind: input, shape index: {}]   ;;  %s8611_s9 = inlined_call_operand.vmem [shape: f32[5,80,120], index: 9, kind: input, shape index: {}]   ;;  %s8612_s10 = inlined_call_operand.vmem [shape: f32[1,120], index: 10, kind: input, shape index: {}]   ;;  %s8613_s11 = inlined_call_operand.vmem [shape: f32[120,84], index: 11, kind: input, shape index: {}]   ;;  %s8614_s12 = inlined_call_operand.vmem [shape: f32[1,84], index: 12, kind: input, shape index: {}]   ;;  %s8615_s13 = inlined_call_operand.vmem [shape: f32[84,128], index: 13, kind: input, shape index: {}]   ;;  %s8616_s14 = inlined_call_operand.vmem [shape: f32[1,128], index: 14, kind: input, shape index: {}]   ;;  %s8617_s15 = inlined_call_operand.hbm [shape: f32[2,128], index: 15, kind: output, shape index: {}]  }
   0x1   :  { %v4589_v0 = vld [vmem:[%s8603_s1 + $0x48] sm:$0xff]  ;;  %v4591_v1 = vld [vmem:[%s8603_s1 + $0x58] sm:$0xff]  ;;  %v4588_v2 = vld [vmem:[%s8603_s1 + $0x40] sm:$0xff]  ;;  %157 = vmatprep.mubr.f32.mxu0 %v6219_v7  ;;  %752 = vmatprep.mubr.f32.mxu1 %v6219_v7 }
   0x2   :  { %v5347_v3 = vpack.c.bf16 %v4591_v1, %v4589_v0  ;;  %v4590_v4 = vld [vmem:[%s8603_s1 + $0x50] sm:$0xff]  ;;  %v4593_v5 = vld [vmem:[%s8603_s1 + $0x68] sm:$0xff]  ;;  %v4595_v6 = vld [vmem:[%s8603_s1 + $0x78] sm:$0xff] }
   0x3   :  { %v5349_v8 = vpack.c.bf16 %v4590_v4, %v4588_v2  ;;  %v5351_v9 = vpack.c.bf16 %v4595_v6, %v4593_v5  ;;  %v4592_v10 = vld [vmem:[%s8603_s1 + $0x60] sm:$0xff]  ;;  %v4594_v11 = vld [vmem:[%s8603_s1 + $0x70] sm:$0xff]  ;;  %v6338_v13 = vld [vmem:[%s8602_s0 + $0x8] sm:$0xff] }
   0x4   :  { %v6333_v12 = vld [vmem:[%s8602_s0] sm:$0xff]  ;;  %5348 = vmatprep.subr.bf16.mxu0 %v5347_v3  ;;  %v56_v14 = vld [vmem:[%s8603_s1 + $0x8] sm:$0xff]  ;;  %v5353_v15 = vpack.c.bf16 %v4594_v11, %v4592_v10  ;;  %v78_v17 = vrot.slane %v6338_v13, 1  ;;  %v6348_v18 = vld [vmem:[%s8602_s0 + $0x10] sm:$0xff]  ;;  %v534_v35 = vrot.slane %v6338_v13, 4 }
   0x5   :  { %5350 = vmatpush1.bf16.msra.mxu0 %v5349_v8  ;;  %v77_v16 = vrot.slane %v6333_v12, 1  ;;  %v58_v19 = vld [vmem:[%s8603_s1 + $0x18] sm:$0xff]  ;;  %v55_v21 = vld [vmem:[%s8603_s1] sm:$0xff]  ;;  %v57_v22 = vld [vmem:[%s8603_s1 + $0x10] sm:$0xff]  ;;  %v80_v25 = vrot.slane %v6348_v18, 1  ;;  %v533_v34 = vrot.slane %v6333_v12, 4 }
   0x6   :  { %5352 = vmatprep.subr.bf16.mxu0 %v5351_v9  ;;  %v5355_v20 = vpack.c.bf16 %v58_v19, %v56_v14  ;;  %v60_v23 = vld [vmem:[%s8603_s1 + $0x28] sm:$0xff]  ;;  %v62_v24 = vld [vmem:[%s8603_s1 + $0x38] sm:$0xff]  ;;  %v5357_v27 = vpack.c.bf16 %v57_v22, %v55_v21  ;;  %v59_v30 = vld [vmem:[%s8603_s1 + $0x20] sm:$0xff]  ;;  %v536_v37 = vrot.slane %v6348_v18, 4 }
   0x7   :  { %v79_v26 = vsel %vm76_vm0, %v77_v16, %v78_v17  ;;  %v6370_v28 = vld [vmem:[%s8602_s0 + $0x18] sm:$0xff]  ;;  %v5359_v29 = vpack.c.bf16 %v62_v24, %v60_v23  ;;  %v61_v31 = vld [vmem:[%s8603_s1 + $0x30] sm:$0xff]  ;;  %v4605_v32 = vld [vmem:[%s8603_s1 + $0x88] sm:$0xff]  ;;  %v81_v36 = vsel %vm76_vm0, %v78_v17, %v80_v25  ;;  %v6392_v40 = vsel %vm532_vm2, %v533_v34, %v534_v35 }
   0x8   :  { %v4607_v33 = vld [vmem:[%s8603_s1 + $0x98] sm:$0xff]  ;;  %v82_v38 = vrot.slane %v6370_v28, 1  ;;  %v5361_v39 = vpack.c.bf16 %v61_v31, %v59_v30  ;;  %v538_v41 = vrot.slane %v6370_v28, 4  ;;  %v6396_v43 = vsel %vm532_vm2, %v534_v35, %v536_v37 }
   0x9   :  { %5354 = vmatpush1.bf16.msra.mxu0 %v5353_v15  ;;  %v5363_v42 = vpack.c.bf16 %v4607_v33, %v4605_v32 }
   0xa   :  { %5356 = vmatprep.subr.bf16.mxu0 %v5355_v20  ;;  %v6401_v44 = vsel %vm532_vm2, %v536_v37, %v538_v41 }
   0xc   :  { %4596 = vmatmul.mubr.msk.f32.vlgmr.msra.gmra.mrb[0].mxu0 %vm84_vm1, %v79_v26 }
   0xd   :  { %163 = vmatprep.mubr.f32.mxu0 %v6219_v7  ;;  %5358 = vmatpush1.bf16.msra.mxu0 %v5357_v27 }
   0xe   :  { %5360 = vmatprep.subr.bf16.mxu0 %v5359_v29 }
   0xf   :  { %20 = vsyncpa [#allocation4], 0  ;;  %v83_v45 = vsel %vm76_vm0, %v80_v25, %v82_v38  ;;  %v4604_v46 = vld [vmem:[%s8603_s1 + $0x80] sm:$0xff]  ;;  %v4606_v47 = vld [vmem:[%s8603_s1 + $0x90] sm:$0xff]  ;;  %v289_v58 = vrot.slane %v6333_v12, 2  ;;  %v290_v59 = vrot.slane %v6338_v13, 2  ;;  %v647_v31 = vlaneseq }
  0x10   :  { %4597 = vmatmul.mubr.msk.f32.gmra.mrb[2].mxu0 %vm84_vm1, %v81_v36  ;;  %v4609_v48 = vld [vmem:[%s8603_s1 + $0xa8] sm:$0xff]  ;;  %v4611_v49 = vld [vmem:[%s8603_s1 + $0xb8] sm:$0xff]  ;;  %v5365_v50 = vpack.c.bf16 %v4606_v47, %v4604_v46  ;;  %v4608_v52 = vld [vmem:[%s8603_s1 + $0xa0] sm:$0xff]  ;;  %vm288_vm3 = vcmask 1045504   ;;  %v292_v1 = vrot.slane %v6348_v18, 2  ;;  %v294_v10 = vrot.slane %v6370_v28, 2 }
  0x11   :  { %169 = vmatprep.mubr.f32.mxu0 %v6219_v7  ;;  %5362 = vmatpush1.bf16.msra.mxu0 %v5361_v39  ;;  %v5367_v51 = vpack.c.bf16 %v4611_v49, %v4609_v48  ;;  %v4610_v53 = vld [vmem:[%s8603_s1 + $0xb0] sm:$0xff]  ;;  %v4617_v54 = vld [vmem:[%s8603_s1 + $0xc8] sm:$0xff]  ;;  %v4619_v55 = vld [vmem:[%s8603_s1 + $0xd8] sm:$0xff]  ;;  %v291_v0 = vsel %vm288_vm3, %v289_v58, %v290_v59  ;;  %v411_v16 = vrot.slane %v6333_v12, 3  ;;  %v412_v17 = vrot.slane %v6338_v13, 3 }
  0x12   :  { %5364 = vmatprep.subr.bf16.mxu0 %v5363_v42  ;;  %v5369_v56 = vpack.c.bf16 %v4610_v53, %v4608_v52  ;;  %v5371_v57 = vpack.c.bf16 %v4619_v55, %v4617_v54  ;;  %v4616_v60 = vld [vmem:[%s8603_s1 + $0xc0] sm:$0xff]  ;;  %v4618_v61 = vld [vmem:[%s8603_s1 + $0xd0] sm:$0xff]  ;;  %v4621_v62 = vld [vmem:[%s8603_s1 + $0xe8] sm:$0xff]  ;;  %v293_v9 = vsel %vm288_vm3, %v290_v59, %v292_v1  ;;  %v295_v15 = vsel %vm288_vm3, %v292_v1, %v294_v10 }
  0x13   :  { %v4623_v63 = vld [vmem:[%s8603_s1 + $0xf8] sm:$0xff]  ;;  %v5373_v2 = vpack.c.bf16 %v4618_v61, %v4616_v60  ;;  %v4620_v4 = vld [vmem:[%s8603_s1 + $0xe0] sm:$0xff]  ;;  %v4622_v5 = vld [vmem:[%s8603_s1 + $0xf0] sm:$0xff]  ;;  %vm410_vm4 = vcmask 1044480   ;;  %v416_v29 = vrot.slane %v6370_v28, 3  ;;  %v648_v32 = vshrl.u32 %v647_v31, 7 }
  0x14   :  { %4598 = vmatmul.mubr.msk.f32.gmra.mrb[4].mxu0 %vm84_vm1, %v83_v45  ;;  %v5375_v3 = vpack.c.bf16 %v4623_v63, %v4621_v62  ;;  %v4629_v6 = vld [vmem:[%s8603_s1 + $0x108] sm:$0xff]  ;;  %v4631_v8 = vld [vmem:[%s8603_s1 + $0x118] sm:$0xff]  ;;  %v5377_v11 = vpack.c.bf16 %v4622_v5, %v4620_v4  ;;  %v4628_v19 = vld [vmem:[%s8603_s1 + $0x100] sm:$0xff]  ;;  %vm6220_vm5 = vmmov 1   ;;  %vm675_vm7 = vcmask 228352  }
  0x15   :  { %175 = vmatprep.mubr.f32.mxu0 %v6219_v7  ;;  %v5379_v14 = vpack.c.bf16 %v4631_v8, %v4629_v6  ;;  %v4630_v20 = vld [vmem:[%s8603_s1 + $0x110] sm:$0xff]  ;;  %v4633_v21 = vld [vmem:[%s8603_s1 + $0x128] sm:$0xff]  ;;  %v4635_v22 = vld [vmem:[%s8603_s1 + $0x138] sm:$0xff]  ;;  %v6531_v33 = vsub.s32 0, %v648_v32  ;;  %v6536_v35 = vsub.s32 1, %v648_v32  ;;  %vm876_vm8 = vcmask 326656  }
  0x16   :  { %v5381_v23 = vpack.c.bf16 %v4630_v20, %v4628_v19  ;;  %v5383_v24 = vpack.c.bf16 %v4635_v22, %v4633_v21  ;;  %v4632_v25 = vld [vmem:[%s8603_s1 + $0x120] sm:$0xff]  ;;  %v4634_v26 = vld [vmem:[%s8603_s1 + $0x130] sm:$0xff]  ;;  %vm6542_vm6 = vmpackc.low %vm532_vm2, %vm6220_vm5  ;;  %vm1107_vm9 = vcmask 687104   ;;  %vm1658_vm10 = vcmask 1041408  }
  0x17   :  { %v645_v34 = vld [vmem:[%s8604_s2] sm:$0x3]  ;;  %v856_v5 = vld [vmem:[%s8608_s6 + $0x8] sm:$0xff]  ;;  %v4644_v6 = vld [vmem:[%s8607_s5 + $0x10] sm:$0xff]  ;;  %vm1654_vm12 = vcmask 80896   ;;  %vm1999_vm13 = vcmask 647168  }
  0x18   :  { %4599 = vmatmul.mubr.msk.f32.gmra.mrb[6].mxu0 %vm84_vm1, %v82_v38  ;;  %v650_v36 = vrot.slane %v645_v34, %v6531_v33  ;;  %v654_v37 = vrot.slane %v645_v34, %v6536_v35  ;;  %v855_v4 = vld [vmem:[%s8608_s6] sm:$0xff]  ;;  %v861_v20 = vld [vmem:[%s8608_s6 + $0x30] sm:$0xff]  ;;  %v862_v21 = vld [vmem:[%s8608_s6 + $0x38] sm:$0xff]  ;;  %vm2002_vm14 = vcmask 648193   ;;  %vm2005_vm15 = vcmask 649218  }
  0x19   :  { %254 = vmatprep.mubr.f32.mxu0 %v6219_v7  ;;  %v5408_v8 = vpack.c.bf16 %v856_v5, %v855_v4  ;;  %v5417_v22 = vpack.c.bf16 %v862_v21, %v861_v20  ;;  %v870_v31 = vld [vmem:[%s8608_s6 + $0x78] sm:$0xff]  ;;  %v871_v34 = vld [vmem:[%s8608_s6 + $0x80] sm:$0xff]  ;;  %v4669_v20 = vld [vmem:[%s8608_s6 + $0x130] sm:$0xff] }
  0x1a   :  { %v4662_v5 = vld [vmem:[%s8608_s6 + $0xf8] sm:$0xff]  ;;  %vm7356_vm11 = vmpackc.low %vm1658_vm10, %vm6220_vm5  ;;  %v2807_v63 = vld [vmem:[%s8608_s6] sm:$0xff]  ;;  %vm2008_vm5 = vcmask 650243  }
  0x1c   :  { %4600 = vmatmul.mubr.msk.f32.vlgmr.msra.gmra.mrb[0].mxu0 %vm84_vm1, %v6333_v12  ;;  %v413_v12 = vsel %vm410_vm4, %v411_v16, %v412_v17  ;;  %v859_v16 = vld [vmem:[%s8608_s6 + $0x20] sm:$0xff] }
  0x1d   :  { %260 = vmatprep.mubr.f32.mxu0 %v6219_v7  ;;  %5366 = vmatpush1.bf16.msra.mxu0 %v5365_v50 }
  0x1e   :  { %5368 = vmatprep.subr.bf16.mxu0 %v5367_v51 }
  0x20   :  { %4601 = vmatmul.mubr.msk.f32.gmra.mrb[2].mxu0 %vm84_vm1, %v6338_v13  ;;  %v414_v13 = vrot.slane %v6348_v18, 3 }
  0x21   :  { %266 = vmatprep.mubr.f32.mxu0 %v6219_v7  ;;  %5370 = vmatpush1.bf16.msra.mxu0 %v5369_v56 }
  0x22   :  { %5372 = vmatprep.subr.bf16.mxu0 %v5371_v57  ;;  %v415_v27 = vsel %vm410_vm4, %v412_v17, %v414_v13  ;;  %v417_v30 = vsel %vm410_vm4, %v414_v13, %v416_v29  ;;  %v860_v17 = vld [vmem:[%s8608_s6 + $0x28] sm:$0xff] }
  0x23   :  { %v5414_v19 = vpack.c.bf16 %v860_v17, %v859_v16  ;;  %v864_v13 = vld [vmem:[%s8608_s6 + $0x48] sm:$0xff]  ;;  %v4667_v16 = vld [vmem:[%s8608_s6 + $0x120] sm:$0xff] }
  0x24   :  { %4602 = vmatmul.mubr.msk.f32.gmra.mrb[4].mxu0 %vm84_vm1, %v6348_v18  ;;  %v5385_v18 = vpack.c.bf16 %v4634_v26, %v4632_v25  ;;  %v866_v25 = vld [vmem:[%s8608_s6 + $0x58] sm:$0xff] }
  0x25   :  { %272 = vmatprep.mubr.f32.mxu0 %v6219_v7 }
  0x28   :  { %4603 = vmatmul.mubr.msk.f32.gmra.mrb[6].mxu0 %vm84_vm1, %v6370_v28 }
  0x29   :  { %368 = vmatprep.mubr.f32.mxu0 %v6219_v7 }
  0x2c   :  { %4612 = vmatmul.mubr.msk.f32.vlgmr.msra.gmra.mrb[0].mxu0 %vm84_vm1, %v291_v0 }
  0x2d   :  { %374 = vmatprep.mubr.f32.mxu0 %v6219_v7  ;;  %5374 = vmatpush1.bf16.msra.mxu0 %v5373_v2  ;;  %v673_v2 = vld [vmem:[%s8607_s5] sm:$0xff] }
  0x2e   :  { %5376 = vmatprep.subr.bf16.mxu0 %v5375_v3  ;;  %v674_v3 = vld [vmem:[%s8607_s5 + $0x8] sm:$0x3f] }
  0x30   :  { %4613 = vmatmul.mubr.msk.f32.gmra.mrb[2].mxu0 %vm84_vm1, %v293_v9  ;;  %v6221_v9 = vmov 0.0|0.0  }
  0x31   :  { %380 = vmatprep.mubr.f32.mxu0 %v6219_v7  ;;  %5378 = vmatpush1.bf16.msra.mxu0 %v5377_v11  ;;  %v858_v11 = vld [vmem:[%s8608_s6 + $0x18] sm:$0xff] }
  0x32   :  { %5380 = vmatprep.subr.bf16.mxu0 %v5379_v14  ;;  %v4645_v14 = vld [vmem:[%s8607_s5 + $0x18] sm:$0x3f] }
  0x34   :  { %4614 = vmatmul.mubr.msk.f32.gmra.mrb[4].mxu0 %vm84_vm1, %v295_v15 }
  0x35   :  { %386 = vmatprep.mubr.f32.mxu0 %v6219_v7 }
  0x38   :  { %4615 = vmatmul.mubr.msk.f32.gmra.mrb[6].mxu0 %vm84_vm1, %v294_v10  ;;  %v857_v10 = vld [vmem:[%s8608_s6 + $0x10] sm:$0xff] }
  0x39   :  { %490 = vmatprep.mubr.f32.mxu0 %v6219_v7  ;;  %v5411_v15 = vpack.c.bf16 %v858_v11, %v857_v10  ;;  %v4664_v10 = vld [vmem:[%s8608_s6 + $0x108] sm:$0xff]  ;;  %v4665_v11 = vld [vmem:[%s8608_s6 + $0x110] sm:$0xff] }
  0x3c   :  { %4624 = vmatmul.mubr.msk.f32.vlgmr.msra.gmra.mrb[0].mxu0 %vm84_vm1, %v413_v12  ;;  %v863_v12 = vld [vmem:[%s8608_s6 + $0x40] sm:$0xff] }
  0x3d   :  { %496 = vmatprep.mubr.f32.mxu0 %v6219_v7  ;;  %5382 = vmatpush1.bf16.msra.mxu0 %v5381_v23  ;;  %v5420_v23 = vpack.c.bf16 %v864_v13, %v863_v12  ;;  %v4671_v12 = vld [vmem:[%s8608_s6 + $0x140] sm:$0xff] }
  0x3e   :  { %5384 = vmatprep.subr.bf16.mxu0 %v5383_v24  ;;  %v865_v24 = vld [vmem:[%s8608_s6 + $0x50] sm:$0xff] }
  0x3f   :  { %v5423_v26 = vpack.c.bf16 %v866_v25, %v865_v24  ;;  %v4676_v24 = vld [vmem:[%s8605_s3 + $0xb8] sm:$0xff]  ;;  %v4678_v25 = vld [vmem:[%s8605_s3 + $0xc8] sm:$0xff] }
  0x40   :  { %4625 = vmatmul.mubr.msk.f32.gmra.mrb[2].mxu0 %vm84_vm1, %v415_v27  ;;  %v867_v27 = vld [vmem:[%s8608_s6 + $0x60] sm:$0xff] }
  0x41   :  { %502 = vmatprep.mubr.f32.mxu0 %v6219_v7  ;;  %5386 = vmatpush1.bf16.msra.mxu0 %v5385_v18 }
  0x44   :  { %4626 = vmatmul.mubr.msk.f32.gmra.mrb[4].mxu0 %vm84_vm1, %v417_v30  ;;  %v869_v30 = vld [vmem:[%s8608_s6 + $0x70] sm:$0xff] }
  0x45   :  { %508 = vmatprep.mubr.f32.mxu0 %v6219_v7  ;;  %v5429_v32 = vpack.c.bf16 %v870_v31, %v869_v30  ;;  %v4682_v30 = vld [vmem:[%s8605_s3 + $0xe8] sm:$0xff] }
  0x48   :  { %4627 = vmatmul.mubr.msk.f32.gmra.mrb[6].mxu0 %vm84_vm1, %v416_v29  ;;  %v868_v29 = vld [vmem:[%s8608_s6 + $0x68] sm:$0xff] }
  0x49   :  { %612 = vmatprep.mubr.f32.mxu0 %v6219_v7  ;;  %v5426_v18 = vpack.c.bf16 %v868_v29, %v867_v27  ;;  %v5467_v27 = vpack.c.bf16 %v4678_v25, %v4676_v24  ;;  %v4677_v29 = vld [vmem:[%s8605_s3 + $0xc0] sm:$0xff]  ;;  %v1063_v25 = vld [vmem:[%s8605_s3 + $0x30] sm:$0xff] }
  0x4a   :  { %v1061_v24 = vld [vmem:[%s8605_s3 + $0x20] sm:$0xff] }
  0x4b   :  { %5468 = vmatprep.subr.bf16.mxu0 %v5467_v27  ;;  %v1066_v27 = vld [vmem:[%s8605_s3 + $0x48] sm:$0xff] }
  0x4c   :  { %4636 = vmatmul.mubr.msk.f32.vlgmr.msra.gmra.mrb[0].mxu0 %vm84_vm1, %v6392_v40 }
  0x4d   :  { %618 = vmatprep.mubr.f32.mxu0 %v6219_v7 }
  0x50   :  { %4637 = vmatmul.mubr.msk.f32.gmra.mrb[2].mxu0 %vm84_vm1, %v6396_v43 }
  0x51   :  { %624 = vmatprep.mubr.f32.mxu0 %v6219_v7 }
  0x54   :  { %4638 = vmatmul.mubr.msk.f32.gmra.mrb[4].mxu0 %vm84_vm1, %v6401_v44 }
  0x55   :  { %630 = vmatprep.mubr.f32.mxu0 %v6219_v7 }
  0x58   :  { %4639 = vmatmul.mubr.msk.f32.gmra.mrb[6].mxu0 %vm84_vm1, %v538_v41 }
  0x59   :  { %1182 = vmatprep.mubr.f32.mxu0 %v6219_v7 }
 0x11f   :  { %v614_v38 = vpop.f32.mrb[0].mxu0 }
 0x120   :  { %v657_v28 = vadd.f32 %v650_v36, %v614_v38  ;;  %v616_v39 = vpop.f32.mrb[1].mxu0  ;;  %v873_v38 = vld [vmem:[%s8608_s6 + $0x90] sm:$0xff] }
 0x121   :  { %v658_v40 = vadd.f32 %v654_v37, %v616_v39 }
 0x122   :  { %6143 = vtanh.f32 %v657_v28  ;;  %v874_v28 = vld [vmem:[%s8608_s6 + $0x98] sm:$0xff] }
 0x123   :  { %v620_v41 = vpop.f32.mrb[2].mxu0  ;;  %6145 = vtanh.f32 %v658_v40  ;;  %v5435_v39 = vpack.c.bf16 %v874_v28, %v873_v38  ;;  %v875_v40 = vld [vmem:[%s8608_s6 + $0xa0] sm:$0xff]  ;;  %v4686_v38 = vld [vmem:[%s8605_s3 + $0x108] sm:$0xff] }
 0x124   :  { %v659_v42 = vadd.f32 %v650_v36, %v620_v41  ;;  %v622_v43 = vpop.f32.mrb[3].mxu0 }
 0x125   :  { %v660_v44 = vadd.f32 %v654_v37, %v622_v43 }
 0x126   :  { %6147 = vtanh.f32 %v659_v42 }
 0x127   :  { %6149 = vtanh.f32 %v660_v44  ;;  %v626_v45 = vpop.f32.mrb[4].mxu0 }
 0x128   :  { %v661_v46 = vadd.f32 %v650_v36, %v626_v45  ;;  %v628_v47 = vpop.f32.mrb[5].mxu0  ;;  %v4652_v45 = vld [vmem:[%s8608_s6 + $0xa8] sm:$0xff] }
 0x129   :  { %v662_v48 = vadd.f32 %v654_v37, %v628_v47 }
 0x12a   :  { %6151 = vtanh.f32 %v661_v46  ;;  %v4653_v46 = vld [vmem:[%s8608_s6 + $0xb0] sm:$0xff] }
 0x12b   :  { %v632_v49 = vpop.f32.mrb[6].mxu0  ;;  %6153 = vtanh.f32 %v662_v48 }
 0x12c   :  { %v663_v50 = vadd.f32 %v650_v36, %v632_v49  ;;  %v634_v51 = vpop.f32.mrb[7].mxu0  ;;  %v6144_v53 = vpop.eup %6143  ;;  %v872_v36 = vld [vmem:[%s8608_s6 + $0x88] sm:$0xff] }
 0x12d   :  { %v664_v52 = vadd.f32 %v654_v37, %v634_v51  ;;  %v6146_v54 = vpop.eup %6145  ;;  %v5432_v37 = vpack.c.bf16 %v872_v36, %v871_v34  ;;  %v5438_v51 = vpack.c.bf16 %v4653_v46, %v4652_v45  ;;  %v4679_v34 = vld [vmem:[%s8605_s3 + $0xd0] sm:$0xff]  ;;  %v4681_v36 = vld [vmem:[%s8605_s3 + $0xe0] sm:$0xff] }
 0x12e   :  { %6155 = vtanh.f32 %v663_v50  ;;  %v5473_v28 = vpack.c.bf16 %v4681_v36, %v4679_v34  ;;  %v4687_v46 = vld [vmem:[%s8605_s3 + $0x110] sm:$0xff]  ;;  %v1065_v36 = vld [vmem:[%s8605_s3 + $0x40] sm:$0xff] }
 0x12f   :  { %6157 = vtanh.f32 %v664_v52  ;;  %v4654_v52 = vld [vmem:[%s8608_s6 + $0xb8] sm:$0xff] }
 0x130   :  { %v6148_v55 = vpop.eup %6147 }
 0x131   :  { %v6150_v56 = vpop.eup %6149  ;;  %v5389_v57 = vpack.c.bf16 %v6148_v55, %v6144_v53  ;;  %v4655_v53 = vld [vmem:[%s8608_s6 + $0xc0] sm:$0xff] }
 0x132   :  { %v5387_v58 = vpack.c.bf16 %v6150_v56, %v6146_v54 }
 0x134   :  { %5388 = vmatprep.subr.bf16.mxu1 %v5387_v58  ;;  %v6152_v59 = vpop.eup %6151 }
 0x135   :  { %5390 = vmatpush1.bf16.msra.mxu1 %v5389_v57  ;;  %v6154_v60 = vpop.eup %6153 }
 0x138   :  { %v6156_v61 = vpop.eup %6155 }
 0x139   :  { %v6158_v62 = vpop.eup %6157  ;;  %v5394_v0 = vpack.c.bf16 %v6156_v61, %v6152_v59  ;;  %v4656_v59 = vld [vmem:[%s8608_s6 + $0xc8] sm:$0xff] }
 0x13a   :  { %v5391_v1 = vpack.c.bf16 %v6158_v62, %v6154_v60  ;;  %v4657_v60 = vld [vmem:[%s8608_s6 + $0xd0] sm:$0xff]  ;;  %v4658_v62 = vld [vmem:[%s8608_s6 + $0xd8] sm:$0xff] }
 0x13b   :  { %v5444_v61 = vpack.c.bf16 %v4657_v60, %v4656_v59 }
 0x13c   :  { %5393 = vmatprep.subr.msk.bf16.mxu1 %vm6542_vm6, %v5391_v1 }
 0x13d   :  { %5396 = vmatpush1.bf16.msk.msra.mxu1 %vm6542_vm6, %v5394_v0 }
 0x13e   :  { %5398 = vmatprep.subr.bf16.mxu1 %v5387_v58  ;;  %v5441_v58 = vpack.c.bf16 %v4655_v53, %v4654_v52  ;;  %v4691_v52 = vld [vmem:[%s8605_s3 + $0x130] sm:$0xff]  ;;  %v4693_v53 = vld [vmem:[%s8605_s3 + $0x140] sm:$0xff] }
 0x140   :  { %4642 = vmatmul.mubr.msk.f32.vlgmr.msra.gmra.mrb[0].mxu1 %vm675_vm7, %v673_v2  ;;  %v4660_v2 = vld [vmem:[%s8608_s6 + $0xe8] sm:$0xff] }
 0x141   :  { %5400 = vmatpush1.bf16.msra.mxu1 %v5389_v57  ;;  %758 = vmatprep.mubr.f32.mxu1 %v6219_v7 }
 0x142   :  { %5403 = vmatprep.subr.msk.bf16.mxu1 %vm6542_vm6, %v5391_v1 }
 0x144   :  { %4643 = vmatmul.mubr.msk.f32.gmra.mrb[2].mxu1 %vm675_vm7, %v674_v3  ;;  %v4661_v3 = vld [vmem:[%s8608_s6 + $0xf0] sm:$0xff] }
 0x145   :  { %5406 = vmatpush1.bf16.msk.msra.mxu1 %vm6542_vm6, %v5394_v0  ;;  %838 = vmatprep.mubr.f32.mxu1 %v6219_v7  ;;  %v4659_v0 = vld [vmem:[%s8608_s6 + $0xe0] sm:$0xff]  ;;  %v5450_v4 = vpack.c.bf16 %v4661_v3, %v4660_v2 }
 0x146   :  { %5407 = vmatprep.subr.bf16.mxu1 %v6221_v9  ;;  %v5447_v1 = vpack.c.bf16 %v4659_v0, %v4658_v62 }
 0x148   :  { %4648 = vmatmul.mubr.msk.f32.vlgmr.msra.gmra.mrb[4].mxu1 %vm675_vm7, %v4644_v6  ;;  %v4663_v6 = vld [vmem:[%s8608_s6 + $0x100] sm:$0xff] }
 0x149   :  { %844 = vmatprep.mubr.f32.mxu1 %v6219_v7  ;;  %5409 = vmatpush1.bf16.msra.mxu1 %v5408_v8  ;;  %v5453_v8 = vpack.c.bf16 %v4663_v6, %v4662_v5  ;;  %v1059_v5 = vld [vmem:[%s8605_s3 + $0x10] sm:$0xff] }
 0x14a   :  { %5410 = vmatprep.subr.bf16.mxu1 %v6221_v9 }
 0x14c   :  { %4649 = vmatmul.mubr.msk.f32.gmra.mrb[6].mxu1 %vm675_vm7, %v4645_v14  ;;  %v5456_v14 = vpack.c.bf16 %v4665_v11, %v4664_v10 }
 0x14d   :  { %5412 = vmatpush1.bf16.msra.mxu1 %v5411_v15  ;;  %v4666_v15 = vld [vmem:[%s8608_s6 + $0x118] sm:$0xff] }
 0x14e   :  { %5413 = vmatprep.subr.bf16.mxu1 %v6221_v9  ;;  %v5459_v17 = vpack.c.bf16 %v4667_v16, %v4666_v15  ;;  %v1064_v15 = vld [vmem:[%s8605_s3 + $0x38] sm:$0xff] }
 0x151   :  { %5415 = vmatpush1.bf16.msra.mxu1 %v5414_v19  ;;  %v4668_v19 = vld [vmem:[%s8608_s6 + $0x128] sm:$0xff] }
 0x152   :  { %5416 = vmatprep.subr.bf16.mxu1 %v6221_v9  ;;  %v5462_v21 = vpack.c.bf16 %v4669_v20, %v4668_v19 }
 0x155   :  { %5418 = vmatpush1.bf16.msra.mxu1 %v5417_v22  ;;  %v4670_v22 = vld [vmem:[%s8608_s6 + $0x138] sm:$0xff] }
 0x156   :  { %5419 = vmatprep.subr.bf16.mxu1 %v6221_v9  ;;  %v5465_v13 = vpack.c.bf16 %v4671_v12, %v4670_v22 }
 0x159   :  { %5421 = vmatpush1.bf16.msra.mxu1 %v5420_v23  ;;  %v4672_v23 = vld [vmem:[%s8608_s6 + $0x148] sm:$0xff] }
 0x15a   :  { %5422 = vmatprep.subr.bf16.mxu1 %v6221_v9 }
 0x15d   :  { %5424 = vmatpush1.bf16.msra.mxu1 %v5423_v26  ;;  %v4675_v26 = vld [vmem:[%s8605_s3 + $0xb0] sm:$0xff] }
 0x15e   :  { %5425 = vmatprep.subr.bf16.mxu1 %v6221_v9  ;;  %v5469_v31 = vpack.c.bf16 %v4677_v29, %v4675_v26  ;;  %v1068_v29 = vld [vmem:[%s8605_s3 + $0x58] sm:$0xff] }
 0x15f   :  { %v5495_v34 = vpack.c.bf16 %v1068_v29, %v1066_v27  ;;  %v4721_v29 = vld [vmem:[%s8605_s3 + $0x1e0] sm:$0xff] }
 0x160   :  { %5470 = vmatpush1.bf16.msra.mxu0 %v5469_v31 }
 0x161   :  { %5427 = vmatpush1.bf16.msra.mxu1 %v5426_v18  ;;  %v4680_v18 = vld [vmem:[%s8605_s3 + $0xd8] sm:$0xff] }
 0x162   :  { %5428 = vmatprep.subr.bf16.mxu1 %v6221_v9 }
 0x165   :  { %5430 = vmatpush1.bf16.msra.mxu1 %v5429_v32  ;;  %v5471_v32 = vpack.c.bf16 %v4682_v30, %v4680_v18 }
 0x166   :  { %5431 = vmatprep.subr.bf16.mxu1 %v6221_v9 }
 0x167   :  { %5472 = vmatprep.subr.bf16.mxu0 %v5471_v32  ;;  %v5493_v32 = vpack.c.bf16 %v1063_v25, %v1061_v24 }
 0x168   :  { %5474 = vmatpush1.bf16.msra.mxu0 %v5473_v28  ;;  %v1072_v28 = vld [vmem:[%s8605_s3 + $0x78] sm:$0xff] }
 0x169   :  { %5433 = vmatpush1.bf16.msra.mxu1 %v5432_v37  ;;  %v4684_v37 = vld [vmem:[%s8605_s3 + $0xf8] sm:$0xff] }
 0x16a   :  { %5434 = vmatprep.subr.bf16.mxu1 %v6221_v9 }
 0x16d   :  { %5436 = vmatpush1.bf16.msra.mxu1 %v5435_v39  ;;  %v5475_v39 = vpack.c.bf16 %v4686_v38, %v4684_v37  ;;  %v1067_v37 = vld [vmem:[%s8605_s3 + $0x50] sm:$0xff]  ;;  %v1070_v38 = vld [vmem:[%s8605_s3 + $0x68] sm:$0xff] }
 0x16e   :  { %923 = vmatprep.subr.mxu1 %v6219_v7 }
 0x16f   :  { %5476 = vmatprep.subr.bf16.mxu0 %v5475_v39  ;;  %v5497_v39 = vpack.c.bf16 %v1067_v37, %v1065_v36 }
 0x171   :  { %924 = vmatpush1.msra.mxu1 %v875_v40  ;;  %v4683_v40 = vld [vmem:[%s8605_s3 + $0xf0] sm:$0xff] }
 0x172   :  { %5437 = vmatprep.subr.bf16.mxu1 %v6221_v9 }
 0x213   :  { %v754_v41 = vpop.f32.mrb[0].mxu1 }
 0x214   :  { %v756_v42 = vpop.f32.mrb[1].mxu1 }
 0x217   :  { %v760_v43 = vpop.f32.mrb[2].mxu1 }
 0x218   :  { %v762_v44 = vpop.f32.mrb[3].mxu1 }
 0x21b   :  { %v840_v47 = vpop.f32.mrb[4].mxu1 }
 0x21c   :  { %v851_v48 = vmax.f32 %v754_v41, %v840_v47  ;;  %v842_v49 = vpop.f32.mrb[5].mxu1  ;;  %v4685_v41 = vld [vmem:[%s8605_s3 + $0x100] sm:$0xff] }
 0x21d   :  { %v852_v50 = vmax.f32 %v756_v42, %v842_v49  ;;  %v4688_v42 = vld [vmem:[%s8605_s3 + $0x118] sm:$0xff]  ;;  %v4689_v47 = vld [vmem:[%s8605_s3 + $0x120] sm:$0xff] }
 0x21e   :  { %v4692_v49 = vld [vmem:[%s8605_s3 + $0x138] sm:$0xff] }
 0x21f   :  { %v846_v54 = vpop.f32.mrb[6].mxu1  ;;  %4650 = vmatprep.mubr.msk.f32.mxu1 %vm876_vm8, %v852_v50 }
 0x220   :  { %v853_v55 = vmax.f32 %v760_v43, %v846_v54  ;;  %v848_v56 = vpop.f32.mrb[7].mxu1  ;;  %948 = vmatmul.mubr.f32.vlgmr.msra.gmra.mrb[8].mxu1 %v851_v48  ;;  %v4690_v43 = vld [vmem:[%s8605_s3 + $0x128] sm:$0xff]  ;;  %v5485_v54 = vpack.c.bf16 %v4693_v53, %v4691_v52  ;;  %v4708_v52 = vld [vmem:[%s8605_s3 + $0x178] sm:$0xff]  ;;  %v4705_v53 = vld [vmem:[%s8605_s3 + $0x160] sm:$0xff] }
 0x221   :  { %v854_v57 = vmax.f32 %v762_v44, %v848_v56  ;;  %5439 = vmatpush1.bf16.msra.mxu1 %v5438_v51  ;;  %v5477_v44 = vpack.c.bf16 %v4685_v41, %v4683_v40  ;;  %v5479_v45 = vpack.c.bf16 %v4690_v43, %v4688_v42  ;;  %v4695_v56 = vld [vmem:[%s8605_s3 + $0x150] sm:$0xf]  ;;  %v5499_v40 = vpack.c.bf16 %v1072_v28, %v1070_v38  ;;  %v1069_v41 = vld [vmem:[%s8605_s3 + $0x60] sm:$0xff]  ;;  %v1074_v43 = vld [vmem:[%s8605_s3 + $0x88] sm:$0xff] }
 0x222   :  { %5440 = vmatprep.subr.bf16.mxu1 %v6221_v9  ;;  %v1071_v42 = vld [vmem:[%s8605_s3 + $0x70] sm:$0xff]  ;;  %v6987_v28 = vld [vmem:[%s8602_s0 + $0x38] sm:$0xff] }
 0x223   :  { %4651 = vmatprep.mubr.msk.f32.mxu1 %vm876_vm8, %v854_v57  ;;  %5478 = vmatpush1.bf16.msra.mxu0 %v5477_v44  ;;  %v1076_v44 = vld [vmem:[%s8605_s3 + $0x98] sm:$0xff] }
 0x224   :  { %953 = vmatmul.mubr.f32.gmra.mrb[10].mxu1 %v853_v55  ;;  %5480 = vmatprep.subr.bf16.mxu0 %v5479_v45  ;;  %v5501_v45 = vpack.c.bf16 %v1071_v42, %v1069_v41  ;;  %v4734_v41 = vld [vmem:[%s8605_s3 + $0x228] sm:$0xff]  ;;  %v2492_v42 = vrot.slane %v6987_v28, 4 }
 0x225   :  { %5442 = vmatpush1.bf16.msra.mxu1 %v5441_v58  ;;  %4673 = vmatprep.mubr.msk.f32.mxu1 %vm876_vm8, %v852_v50  ;;  %v4694_v50 = vld [vmem:[%s8605_s3 + $0x148] sm:$0xff]  ;;  %v1060_v58 = vld [vmem:[%s8605_s3 + $0x18] sm:$0xff] }
 0x226   :  { %5443 = vmatprep.subr.bf16.mxu1 %v6221_v9  ;;  %v5483_v51 = vpack.c.bf16 %v4694_v50, %v4692_v49  ;;  %v1078_v50 = vld [vmem:[%s8605_s3 + $0xa8] sm:$0xf] }
 0x229   :  { %5445 = vmatpush1.bf16.msra.mxu1 %v5444_v61 }
 0x22a   :  { %5446 = vmatprep.subr.bf16.mxu1 %v6221_v9 }
 0x22d   :  { %5448 = vmatpush1.bf16.msra.mxu1 %v5447_v1 }
 0x22e   :  { %5449 = vmatprep.subr.bf16.mxu1 %v6221_v9 }
 0x231   :  { %5451 = vmatpush1.bf16.msra.mxu1 %v5450_v4  ;;  %v1057_v4 = vld [vmem:[%s8605_s3] sm:$0xff] }
 0x232   :  { %5452 = vmatprep.subr.bf16.mxu1 %v6221_v9  ;;  %v5489_v11 = vpack.c.bf16 %v1059_v5, %v1057_v4  ;;  %v4713_v5 = vld [vmem:[%s8605_s3 + $0x1a0] sm:$0xff] }
 0x235   :  { %5454 = vmatpush1.bf16.msra.mxu1 %v5453_v8 }
 0x236   :  { %5455 = vmatprep.subr.bf16.mxu1 %v6221_v9 }
 0x239   :  { %5457 = vmatpush1.bf16.msra.mxu1 %v5456_v14  ;;  %v1062_v14 = vld [vmem:[%s8605_s3 + $0x28] sm:$0xff] }
 0x23a   :  { %5458 = vmatprep.subr.bf16.mxu1 %v6221_v9 }
 0x23d   :  { %5460 = vmatpush1.bf16.msra.mxu1 %v5459_v17 }
 0x23e   :  { %5461 = vmatprep.subr.bf16.mxu1 %v6221_v9 }
 0x241   :  { %5463 = vmatpush1.bf16.msra.mxu1 %v5462_v21 }
 0x242   :  { %5464 = vmatprep.subr.bf16.mxu1 %v6221_v9 }
 0x245   :  { %5466 = vmatpush1.bf16.msra.mxu1 %v5465_v13 }
 0x246   :  { %1020 = vmatprep.subr.mxu1 %v6219_v7 }
 0x249   :  { %1021 = vmatpush1.msra.mxu1 %v4672_v23  ;;  %v5491_v23 = vpack.c.bf16 %v1064_v15, %v1062_v14  ;;  %v4717_v14 = vld [vmem:[%s8605_s3 + $0x1c0] sm:$0xff] }
 0x24a   :  { %1045 = vmatmul.mubr.f32.vlgmr.msra.gmra.mrb[12].mxu1 %v851_v48  ;;  %v5481_v48 = vpack.c.bf16 %v4689_v47, %v4687_v46  ;;  %v5503_v46 = vpack.c.bf16 %v1076_v44, %v1074_v43  ;;  %v1073_v47 = vld [vmem:[%s8605_s3 + $0x80] sm:$0xff]  ;;  %v4731_v43 = vld [vmem:[%s8605_s3 + $0x210] sm:$0xff] }
 0x24b   :  { %4674 = vmatprep.mubr.msk.f32.mxu1 %vm876_vm8, %v854_v57  ;;  %v1058_v57 = vld [vmem:[%s8605_s3 + $0x8] sm:$0xff]  ;;  %v4733_v44 = vld [vmem:[%s8605_s3 + $0x220] sm:$0xff] }
 0x24c   :  { %5482 = vmatpush1.bf16.msra.mxu0 %v5481_v48  ;;  %v5487_v59 = vpack.c.bf16 %v1060_v58, %v1058_v57  ;;  %v1075_v48 = vld [vmem:[%s8605_s3 + $0x90] sm:$0xff]  ;;  %v1077_v57 = vld [vmem:[%s8605_s3 + $0xa0] sm:$0xf] }
 0x24d   :  { %5484 = vmatprep.subr.bf16.mxu0 %v5483_v51  ;;  %v5505_v49 = vpack.c.bf16 %v1075_v48, %v1073_v47  ;;  %v4706_v51 = vld [vmem:[%s8605_s3 + $0x168] sm:$0xff]  ;;  %v4725_v48 = vld [vmem:[%s8605_s3 + $0x200] sm:$0xf] }
 0x24e   :  { %1050 = vmatmul.mubr.f32.gmra.mrb[14].mxu1 %v853_v55  ;;  %v4696_v55 = vld [vmem:[%s8605_s3 + $0x158] sm:$0xf]  ;;  %v5507_v58 = vpack.c.bf16 %v4708_v52, %v4706_v51  ;;  %v4735_v52 = vld [vmem:[%s8605_s3 + $0x230] sm:$0xff] }
 0x24f   :  { %1729 = vmatprep.mubr.f32.mxu1 %v6219_v7 }
 0x250   :  { %5486 = vmatpush1.bf16.msra.mxu0 %v5485_v54  ;;  %v4707_v54 = vld [vmem:[%s8605_s3 + $0x170] sm:$0xff] }
 0x251   :  { %4697 = vmatprep.subr.msk.mxu0 %vm532_vm2, %v4696_v55  ;;  %v4710_v55 = vld [vmem:[%s8605_s3 + $0x188] sm:$0xff] }
 0x254   :  { %4698 = vmatpush1.msk.msra.mxu0 %vm532_vm2, %v4695_v56  ;;  %v4712_v56 = vld [vmem:[%s8605_s3 + $0x198] sm:$0xff] }
 0x255   :  { %5488 = vmatprep.subr.bf16.mxu0 %v5487_v59  ;;  %v5509_v59 = vpack.c.bf16 %v4707_v54, %v4705_v53  ;;  %v4737_v53 = vld [vmem:[%s8605_s3 + $0x240] sm:$0xff]  ;;  %v4740_v54 = vld [vmem:[%s8605_s3 + $0x258] sm:$0xff] }
 0x2f3   :  { %v949_v60 = vpop.f32.mrb[8].mxu1 }
 0x2f4   :  { %v951_v61 = vpop.f32.mrb[9].mxu1 }
 0x2f5   :  { %v4709_v61 = vld [vmem:[%s8605_s3 + $0x180] sm:$0xff] }
 0x2f7   :  { %v954_v62 = vpop.f32.mrb[10].mxu1 }
 0x2f8   :  { %v956_v0 = vpop.f32.mrb[11].mxu1 }
 0x2f9   :  { %v4714_v0 = vld [vmem:[%s8605_s3 + $0x1a8] sm:$0xff] }
 0x31d   :  { %v1046_v1 = vpop.f32.mrb[12].mxu1 }
 0x31e   :  { %v6800_v2 = vmax.f32 %v949_v60, %v1046_v1  ;;  %v1048_v3 = vpop.f32.mrb[13].mxu1  ;;  %v5511_v60 = vpack.c.bf16 %v4712_v56, %v4710_v55  ;;  %v4716_v1 = vld [vmem:[%s8605_s3 + $0x1b8] sm:$0xff]  ;;  %v4742_v55 = vld [vmem:[%s8605_s3 + $0x268] sm:$0xff]  ;;  %v5533_v56 = vpack.c.bf16 %v4737_v53, %v4735_v52 }
 0x31f   :  { %v5515_v4 = vpack.c.bf16 %v4716_v1, %v4714_v0  ;;  %v4743_v0 = vld [vmem:[%s8605_s3 + $0x270] sm:$0xff]  ;;  %v4745_v1 = vld [vmem:[%s8605_s3 + $0x280] sm:$0xff] }
 0x320   :  { %v1104_v16 = vrot.slane %v6800_v2, 1  ;;  %v1305_v17 = vrot.slane %v6800_v2, 2  ;;  %v1422_v19 = vrot.slane %v6800_v2, 3  ;;  %v1539_v20 = vrot.slane %v6800_v2, 4 }
 0x321   :  { %v1051_v6 = vpop.f32.mrb[14].mxu1 }
 0x322   :  { %v6808_v8 = vmax.f32 %v954_v62, %v1051_v6  ;;  %v1053_v10 = vpop.f32.mrb[15].mxu1  ;;  %v4711_v62 = vld [vmem:[%s8605_s3 + $0x190] sm:$0xff] }
 0x323   :  { %v5513_v3 = vpack.c.bf16 %v4711_v62, %v4709_v61  ;;  %v4715_v6 = vld [vmem:[%s8605_s3 + $0x1b0] sm:$0xff]  ;;  %v4718_v10 = vld [vmem:[%s8605_s3 + $0x1c8] sm:$0xff] }
 0x324   :  { %v1105_v21 = vrot.slane %v6808_v8, 1  ;;  %v1306_v22 = vrot.slane %v6808_v8, 2  ;;  %v1423_v12 = vrot.slane %v6808_v8, 3  ;;  %v1540_v13 = vrot.slane %v6808_v8, 4 }
 0x326   :  { %v1106_v26 = vsel %vm76_vm0, %v1104_v16, %v1105_v21  ;;  %v6840_v18 = vsel %vm288_vm3, %v1305_v17, %v1306_v22  ;;  %v6845_v30 = vsel %vm410_vm4, %v1422_v19, %v1423_v12  ;;  %v6850_v31 = vsel %vm532_vm2, %v1539_v20, %v1540_v13  ;;  %v4719_v16 = vld [vmem:[%s8605_s3 + $0x1d0] sm:$0xff]  ;;  %v6951_v17 = vld [vmem:[%s8602_s0 + $0x20] sm:$0xff]  ;;  %v6956_v19 = vld [vmem:[%s8602_s0 + $0x28] sm:$0xff] }
 0x327   :  { %4699 = vmatmul.mubr.msk.f32.vlgmr.msra.gmra.mrb[8].mxu0 %vm1107_vm9, %v1106_v26  ;;  %v4722_v20 = vld [vmem:[%s8605_s3 + $0x1e8] sm:$0xff]  ;;  %v2488_v24 = vrot.slane %v6956_v19, 4  ;;  %v5521_v25 = vpack.c.bf16 %v4719_v16, %v4717_v14  ;;  %v4757_v16 = vld [vmem:[%s8605_s3 + $0x2c0] sm:$0xff] }
 0x328   :  { %5490 = vmatpush1.bf16.msra.mxu0 %v5489_v11  ;;  %1188 = vmatprep.mubr.f32.mxu0 %v6219_v7  ;;  %v5517_v11 = vpack.c.bf16 %v4715_v6, %v4713_v5  ;;  %v4747_v6 = vld [vmem:[%s8605_s3 + $0x290] sm:$0xff]  ;;  %v4758_v14 = vld [vmem:[%s8605_s3 + $0x2c8] sm:$0xff] }
 0x329   :  { %5492 = vmatprep.subr.bf16.mxu0 %v5491_v23  ;;  %v2487_v23 = vrot.slane %v6951_v17, 4 }
 0x32b   :  { %4700 = vmatmul.mubr.msk.f32.gmra.mrb[10].mxu0 %vm1107_vm9, %v1105_v21  ;;  %v4724_v21 = vld [vmem:[%s8605_s3 + $0x1f8] sm:$0xff]  ;;  %v6967_v26 = vsel %vm532_vm2, %v2487_v23, %v2488_v24 }
 0x32c   :  { %5494 = vmatpush1.bf16.msra.mxu0 %v5493_v32  ;;  %1269 = vmatprep.mubr.f32.mxu0 %v6219_v7  ;;  %v5523_v27 = vpack.c.bf16 %v4724_v21, %v4722_v20  ;;  %v4723_v32 = vld [vmem:[%s8605_s3 + $0x1f0] sm:$0xff]  ;;  %v4762_v21 = vld [vmem:[%s8605_s3 + $0x2e8] sm:$0xff]  ;;  %v4764_v23 = vld [vmem:[%s8605_s3 + $0x2f8] sm:$0xff] }
 0x32d   :  { %5496 = vmatprep.subr.bf16.mxu0 %v5495_v34  ;;  %v6978_v34 = vld [vmem:[%s8602_s0 + $0x30] sm:$0xff]  ;;  %v5525_v37 = vpack.c.bf16 %v4723_v32, %v4721_v29  ;;  %v5551_v29 = vpack.c.bf16 %v4764_v23, %v4762_v21  ;;  %v4761_v32 = vld [vmem:[%s8605_s3 + $0x2e0] sm:$0xff]  ;;  %v2025_v21 = vld [vmem:[%s8603_s1 + $0x38] sm:$0xff] }
 0x32e   :  { %v2490_v36 = vrot.slane %v6978_v34, 4  ;;  %v4759_v20 = vld [vmem:[%s8605_s3 + $0x2d0] sm:$0xff] }
 0x330   :  { %5498 = vmatpush1.bf16.msra.mxu0 %v5497_v39  ;;  %v6982_v38 = vsel %vm532_vm2, %v2488_v24, %v2490_v36  ;;  %v4726_v39 = vld [vmem:[%s8605_s3 + $0x208] sm:$0xf]  ;;  %v7014_v47 = vsel %vm532_vm2, %v2490_v36, %v2492_v42  ;;  %v4751_v24 = vld [vmem:[%s8605_s3 + $0x2b0] sm:$0xf] }
 0x331   :  { %5500 = vmatprep.subr.bf16.mxu0 %v5499_v40  ;;  %v4732_v40 = vld [vmem:[%s8605_s3 + $0x218] sm:$0xff]  ;;  %v4763_v36 = vld [vmem:[%s8605_s3 + $0x2f0] sm:$0xff] }
 0x334   :  { %5502 = vmatpush1.bf16.msra.mxu0 %v5501_v45  ;;  %v4736_v45 = vld [vmem:[%s8605_s3 + $0x238] sm:$0xff] }
 0x335   :  { %5504 = vmatprep.subr.bf16.mxu0 %v5503_v46  ;;  %v4738_v46 = vld [vmem:[%s8605_s3 + $0x248] sm:$0xff] }
 0x336   :  { %v5531_v51 = vpack.c.bf16 %v4738_v46, %v4736_v45  ;;  %v4770_v45 = vld [vmem:[%s8605_s3 + $0x328] sm:$0xff] }
 0x338   :  { %5506 = vmatpush1.bf16.msra.mxu0 %v5505_v49  ;;  %v5527_v49 = vpack.c.bf16 %v4734_v41, %v4732_v40  ;;  %v5553_v40 = vpack.c.bf16 %v4763_v36, %v4761_v32  ;;  %v4835_v32 = vld [vmem:[%s8603_s1 + $0x98] sm:$0xff] }
 0x339   :  { %4701 = vmatprep.subr.msk.mxu0 %vm532_vm2, %v1078_v50  ;;  %v5529_v50 = vpack.c.bf16 %v4733_v44, %v4731_v43  ;;  %v4765_v43 = vld [vmem:[%s8605_s3 + $0x300] sm:$0xff]  ;;  %v4767_v44 = vld [vmem:[%s8605_s3 + $0x310] sm:$0xff] }
 0x33a   :  { %v5557_v46 = vpack.c.bf16 %v4767_v44, %v4765_v43  ;;  %v4832_v43 = vld [vmem:[%s8603_s1 + $0x80] sm:$0xff]  ;;  %v4834_v44 = vld [vmem:[%s8603_s1 + $0x90] sm:$0xff] }
 0x33c   :  { %4702 = vmatpush1.msk.msra.mxu0 %vm532_vm2, %v1077_v57  ;;  %v5535_v57 = vpack.c.bf16 %v4742_v55, %v4740_v54  ;;  %v4773_v54 = vld [vmem:[%s8605_s3 + $0x340] sm:$0xff]  ;;  %v4775_v55 = vld [vmem:[%s8605_s3 + $0x350] sm:$0xff] }
 0x33d   :  { %4703 = vmatmul.mubr.msk.f32.vlgmr.msra.gmra.mrb[8].mxu0 %vm1107_vm9, %v6800_v2  ;;  %5508 = vmatprep.subr.bf16.mxu0 %v5507_v58  ;;  %v4720_v2 = vld [vmem:[%s8605_s3 + $0x1d8] sm:$0xff]  ;;  %v4739_v58 = vld [vmem:[%s8605_s3 + $0x250] sm:$0xff] }
 0x33e   :  { %5510 = vmatpush1.bf16.msra.mxu0 %v5509_v59  ;;  %1275 = vmatprep.mubr.f32.mxu0 %v6219_v7  ;;  %v5519_v15 = vpack.c.bf16 %v4720_v2, %v4718_v10  ;;  %v4741_v59 = vld [vmem:[%s8605_s3 + $0x260] sm:$0xff] }
 0x33f   :  { %5512 = vmatprep.subr.bf16.mxu0 %v5511_v60  ;;  %v4744_v60 = vld [vmem:[%s8605_s3 + $0x278] sm:$0xff]  ;;  %v5537_v61 = vpack.c.bf16 %v4741_v59, %v4739_v58  ;;  %v4749_v10 = vld [vmem:[%s8605_s3 + $0x2a0] sm:$0xff]  ;;  %v4817_v58 = vld [vmem:[%s8603_s1 + $0x48] sm:$0xff] }
 0x340   :  { %v5545_v2 = vpack.c.bf16 %v4749_v10, %v4747_v6  ;;  %v4819_v59 = vld [vmem:[%s8603_s1 + $0x58] sm:$0xff]  ;;  %v2019_v6 = vld [vmem:[%s8603_s1 + $0x8] sm:$0xff] }
 0x341   :  { %4704 = vmatmul.mubr.msk.f32.gmra.mrb[10].mxu0 %vm1107_vm9, %v6808_v8  ;;  %v2021_v10 = vld [vmem:[%s8603_s1 + $0x18] sm:$0xff]  ;;  %v2024_v8 = vld [vmem:[%s8603_s1 + $0x30] sm:$0xff] }
 0x342   :  { %5514 = vmatpush1.bf16.msra.mxu0 %v5513_v3  ;;  %1382 = vmatprep.mubr.f32.mxu0 %v6219_v7  ;;  %v4748_v3 = vld [vmem:[%s8605_s3 + $0x298] sm:$0xff] }
 0x343   :  { %5516 = vmatprep.subr.bf16.mxu0 %v5515_v4  ;;  %v5541_v4 = vpack.c.bf16 %v4745_v1, %v4743_v0  ;;  %v4777_v0 = vld [vmem:[%s8605_s3 + $0x360] sm:$0xf]  ;;  %v5639_v1 = vpack.c.bf16 %v4819_v59, %v4817_v58  ;;  %v4849_v58 = vld [vmem:[%s8603_s1 + $0xe8] sm:$0xff]  ;;  %v4851_v59 = vld [vmem:[%s8603_s1 + $0xf8] sm:$0xff] }
 0x346   :  { %5518 = vmatpush1.bf16.msra.mxu0 %v5517_v11  ;;  %v4752_v11 = vld [vmem:[%s8605_s3 + $0x2b8] sm:$0xf] }
 0x347   :  { %5520 = vmatprep.subr.bf16.mxu0 %v5519_v15  ;;  %v4760_v15 = vld [vmem:[%s8605_s3 + $0x2d8] sm:$0xff] }
 0x34a   :  { %5522 = vmatpush1.bf16.msra.mxu0 %v5521_v25  ;;  %v5547_v25 = vpack.c.bf16 %v4760_v15, %v4758_v14  ;;  %v2039_v14 = vrot.slane %v6956_v19, 1  ;;  %v5647_v15 = vpack.c.bf16 %v2021_v10, %v2019_v6 }
 0x34b   :  { %5524 = vmatprep.subr.bf16.mxu0 %v5523_v27  ;;  %v5549_v27 = vpack.c.bf16 %v4759_v20, %v4757_v16  ;;  %v2018_v16 = vld [vmem:[%s8603_s1] sm:$0xff]  ;;  %v2020_v20 = vld [vmem:[%s8603_s1 + $0x10] sm:$0xff] }
 0x34e   :  { %5526 = vmatpush1.bf16.msra.mxu0 %v5525_v37  ;;  %v4766_v37 = vld [vmem:[%s8605_s3 + $0x308] sm:$0xff] }
 0x34f   :  { %4727 = vmatprep.subr.msk.mxu0 %vm532_vm2, %v4726_v39  ;;  %v4768_v39 = vld [vmem:[%s8605_s3 + $0x318] sm:$0xff] }
 0x350   :  { %v5555_v41 = vpack.c.bf16 %v4768_v39, %v4766_v37  ;;  %v2043_v37 = vrot.slane %v6987_v28, 1 }
 0x352   :  { %4728 = vmatpush1.msk.msra.mxu0 %vm532_vm2, %v4725_v48 }
 0x353   :  { %4729 = vmatmul.mubr.msk.f32.vlgmr.msra.gmra.mrb[8].mxu0 %vm1107_vm9, %v6840_v18  ;;  %5528 = vmatprep.subr.bf16.mxu0 %v5527_v49  ;;  %v4746_v18 = vld [vmem:[%s8605_s3 + $0x288] sm:$0xff]  ;;  %v4769_v49 = vld [vmem:[%s8605_s3 + $0x320] sm:$0xff] }
 0x354   :  { %5530 = vmatpush1.bf16.msra.mxu0 %v5529_v50  ;;  %1388 = vmatprep.mubr.f32.mxu0 %v6219_v7  ;;  %v5539_v62 = vpack.c.bf16 %v4746_v18, %v4744_v60  ;;  %v4771_v50 = vld [vmem:[%s8605_s3 + $0x330] sm:$0xff]  ;;  %v4816_v60 = vld [vmem:[%s8603_s1 + $0x40] sm:$0xff] }
 0x355   :  { %5532 = vmatprep.subr.bf16.mxu0 %v5531_v51  ;;  %v4774_v51 = vld [vmem:[%s8605_s3 + $0x348] sm:$0xff]  ;;  %v5561_v52 = vpack.c.bf16 %v4771_v50, %v4769_v49  ;;  %v4818_v18 = vld [vmem:[%s8603_s1 + $0x50] sm:$0xff]  ;;  %v4836_v49 = vld [vmem:[%s8603_s1 + $0xa0] sm:$0xff] }
 0x356   :  { %v4838_v50 = vld [vmem:[%s8603_s1 + $0xb0] sm:$0xff] }
 0x357   :  { %4730 = vmatmul.mubr.msk.f32.gmra.mrb[10].mxu0 %vm1107_vm9, %v1306_v22  ;;  %v4750_v22 = vld [vmem:[%s8605_s3 + $0x2a8] sm:$0xff] }
 0x358   :  { %5534 = vmatpush1.bf16.msra.mxu0 %v5533_v56  ;;  %1499 = vmatprep.mubr.f32.mxu0 %v6219_v7  ;;  %v5543_v5 = vpack.c.bf16 %v4750_v22, %v4748_v3  ;;  %v5565_v56 = vpack.c.bf16 %v4775_v55, %v4773_v54  ;;  %v5641_v3 = vpack.c.bf16 %v4818_v18, %v4816_v60  ;;  %v2247_v54 = vrot.slane %v6951_v17, 2 }
 0x359   :  { %5536 = vmatprep.subr.bf16.mxu0 %v5535_v57  ;;  %v4778_v57 = vld [vmem:[%s8605_s3 + $0x368] sm:$0xf]  ;;  %v2248_v55 = vrot.slane %v6956_v19, 2  ;;  %v2250_v18 = vrot.slane %v6978_v34, 2 }
 0x35b   :  { %v2249_v60 = vsel %vm288_vm3, %v2247_v54, %v2248_v55  ;;  %v1817_v54 = vld [vmem:[%s8610_s8 + $0x18] sm:$0xff] }
 0x35c   :  { %5538 = vmatpush1.bf16.msra.mxu0 %v5537_v61  ;;  %v4821_v61 = vld [vmem:[%s8603_s1 + $0x68] sm:$0xff] }
 0x35d   :  { %5540 = vmatprep.subr.bf16.mxu0 %v5539_v62  ;;  %v4823_v62 = vld [vmem:[%s8603_s1 + $0x78] sm:$0xff] }
 0x35e   :  { %v5643_v22 = vpack.c.bf16 %v4823_v62, %v4821_v61  ;;  %v5667_v62 = vpack.c.bf16 %v4851_v59, %v4849_v58  ;;  %v1820_v59 = vld [vmem:[%s8610_s8 + $0x30] sm:$0xff] }
 0x360   :  { %5542 = vmatpush1.bf16.msra.mxu0 %v5541_v4  ;;  %v4820_v4 = vld [vmem:[%s8603_s1 + $0x60] sm:$0xff] }
 0x361   :  { %5544 = vmatprep.subr.bf16.mxu0 %v5543_v5  ;;  %v4822_v5 = vld [vmem:[%s8603_s1 + $0x70] sm:$0xff] }
 0x364   :  { %5546 = vmatpush1.bf16.msra.mxu0 %v5545_v2  ;;  %v5645_v2 = vpack.c.bf16 %v4822_v5, %v4820_v4  ;;  %v2251_v4 = vsel %vm288_vm3, %v2248_v55, %v2250_v18  ;;  %v2252_v5 = vrot.slane %v6987_v28, 2 }
 0x365   :  { %4753 = vmatprep.subr.msk.mxu0 %vm532_vm2, %v4752_v11  ;;  %v2038_v11 = vrot.slane %v6951_v17, 1 }
 0x367   :  { %v2040_v23 = vsel %vm76_vm0, %v2038_v11, %v2039_v14  ;;  %v2367_v11 = vrot.slane %v6951_v17, 3 }
 0x368   :  { %4754 = vmatpush1.msk.msra.mxu0 %vm532_vm2, %v4751_v24  ;;  %v2041_v24 = vrot.slane %v6978_v34, 1 }
 0x369   :  { %4755 = vmatmul.mubr.msk.f32.vlgmr.msra.gmra.mrb[8].mxu0 %vm1107_vm9, %v6845_v30  ;;  %5548 = vmatprep.subr.bf16.mxu0 %v5547_v25  ;;  %v4772_v30 = vld [vmem:[%s8605_s3 + $0x338] sm:$0xff]  ;;  %v5649_v25 = vpack.c.bf16 %v2020_v20, %v2018_v16  ;;  %v4858_v16 = vld [vmem:[%s8603_s1 + $0x110] sm:$0xff]  ;;  %v4861_v20 = vld [vmem:[%s8603_s1 + $0x128] sm:$0xff] }
 0x36a   :  { %5550 = vmatpush1.bf16.msra.mxu0 %v5549_v27  ;;  %1505 = vmatprep.mubr.f32.mxu0 %v6219_v7  ;;  %v5559_v48 = vpack.c.bf16 %v4772_v30, %v4770_v45  ;;  %v2042_v36 = vsel %vm76_vm0, %v2039_v14, %v2041_v24  ;;  %v4837_v45 = vld [vmem:[%s8603_s1 + $0xa8] sm:$0xff]  ;;  %v4839_v30 = vld [vmem:[%s8603_s1 + $0xb8] sm:$0xff]  ;;  %v2368_v14 = vrot.slane %v6956_v19, 3 }
 0x36b   :  { %5552 = vmatprep.subr.bf16.mxu0 %v5551_v29  ;;  %v2022_v29 = vld [vmem:[%s8603_s1 + $0x20] sm:$0xff] }
 0x36c   :  { %v5653_v39 = vpack.c.bf16 %v2024_v8, %v2022_v29  ;;  %v2372_v29 = vrot.slane %v6987_v28, 3 }
 0x36d   :  { %4756 = vmatmul.mubr.msk.f32.gmra.mrb[10].mxu0 %vm1107_vm9, %v1423_v12  ;;  %v4776_v12 = vld [vmem:[%s8605_s3 + $0x358] sm:$0xff] }
 0x36e   :  { %5554 = vmatpush1.bf16.msra.mxu0 %v5553_v40  ;;  %1616 = vmatprep.mubr.f32.mxu0 %v6219_v7  ;;  %v5563_v53 = vpack.c.bf16 %v4776_v12, %v4774_v51  ;;  %v4845_v51 = vld [vmem:[%s8603_s1 + $0xc8] sm:$0xff]  ;;  %v4847_v12 = vld [vmem:[%s8603_s1 + $0xd8] sm:$0xff] }
 0x36f   :  { %5556 = vmatprep.subr.bf16.mxu0 %v5555_v41  ;;  %v2044_v41 = vsel %vm76_vm0, %v2041_v24, %v2043_v37  ;;  %v4860_v24 = vld [vmem:[%s8603_s1 + $0x120] sm:$0xff] }
 0x372   :  { %5558 = vmatpush1.bf16.msra.mxu0 %v5557_v46  ;;  %v5657_v46 = vpack.c.bf16 %v4834_v44, %v4832_v43 }
 0x373   :  { %5560 = vmatprep.subr.bf16.mxu0 %v5559_v48  ;;  %v5659_v48 = vpack.c.bf16 %v4839_v30, %v4837_v45 }
 0x376   :  { %5562 = vmatpush1.bf16.msra.mxu0 %v5561_v52  ;;  %v5661_v52 = vpack.c.bf16 %v4838_v50, %v4836_v49  ;;  %v1653_v49 = vld [vmem:[%s8609_s7] sm:$0x1f] }
 0x377   :  { %5564 = vmatprep.subr.bf16.mxu0 %v5563_v53  ;;  %v5663_v53 = vpack.c.bf16 %v4847_v12, %v4845_v51  ;;  %v1814_v50 = vld [vmem:[%s8610_s8] sm:$0xff]  ;;  %v1815_v51 = vld [vmem:[%s8610_s8 + $0x8] sm:$0xff] }
 0x378   :  { %v4786_v12 = vld [vmem:[%s8609_s7 + $0x8] sm:$0x1f] }
 0x37a   :  { %5566 = vmatpush1.bf16.msra.mxu0 %v5565_v56  ;;  %v4844_v56 = vld [vmem:[%s8603_s1 + $0xc0] sm:$0xff] }
 0x37b   :  { %4779 = vmatprep.subr.msk.mxu0 %vm532_vm2, %v4778_v57  ;;  %v4846_v57 = vld [vmem:[%s8603_s1 + $0xd0] sm:$0xff] }
 0x37c   :  { %v5665_v61 = vpack.c.bf16 %v4846_v57, %v4844_v56  ;;  %v1818_v56 = vld [vmem:[%s8610_s8 + $0x20] sm:$0xff]  ;;  %v1819_v57 = vld [vmem:[%s8610_s8 + $0x28] sm:$0xff] }
 0x37d   :  { %v5586_v58 = vpack.c.bf16 %v1819_v57, %v1818_v56  ;;  %v4792_v56 = vld [vmem:[%s8610_s8 + $0xa8] sm:$0xff] }
 0x37e   :  { %4780 = vmatpush1.msk.msra.mxu0 %vm532_vm2, %v4777_v0  ;;  %v4848_v0 = vld [vmem:[%s8603_s1 + $0xe0] sm:$0xff] }
 0x37f   :  { %4781 = vmatmul.mubr.msk.f32.vlgmr.msra.gmra.mrb[8].mxu0 %vm1107_vm9, %v6850_v31  ;;  %5640 = vmatprep.subr.bf16.mxu0 %v5639_v1  ;;  %v2023_v31 = vld [vmem:[%s8603_s1 + $0x28] sm:$0xff]  ;;  %v4850_v1 = vld [vmem:[%s8603_s1 + $0xf0] sm:$0xff] }
 0x380   :  { %1622 = vmatprep.mubr.f32.mxu0 %v6219_v7  ;;  %5642 = vmatpush1.bf16.msra.mxu0 %v5641_v3  ;;  %v5651_v27 = vpack.c.bf16 %v2025_v21, %v2023_v31  ;;  %v4857_v3 = vld [vmem:[%s8603_s1 + $0x108] sm:$0xff]  ;;  %v5669_v6 = vpack.c.bf16 %v4850_v1, %v4848_v0  ;;  %v4863_v31 = vld [vmem:[%s8603_s1 + $0x138] sm:$0xff]  ;;  %v1824_v1 = vld [vmem:[%s8610_s8 + $0x50] sm:$0xff] }
 0x381   :  { %5644 = vmatprep.subr.bf16.mxu0 %v5643_v22  ;;  %v4859_v22 = vld [vmem:[%s8603_s1 + $0x118] sm:$0xff] }
 0x382   :  { %v5671_v10 = vpack.c.bf16 %v4859_v22, %v4857_v3  ;;  %v1825_v3 = vld [vmem:[%s8610_s8 + $0x58] sm:$0xff] }
 0x383   :  { %4782 = vmatmul.mubr.msk.f32.gmra.mrb[10].mxu0 %vm1107_vm9, %v1540_v13  ;;  %v4833_v13 = vld [vmem:[%s8603_s1 + $0x88] sm:$0xff]  ;;  %v5595_v22 = vpack.c.bf16 %v1825_v3, %v1824_v1  ;;  %v4795_v1 = vld [vmem:[%s8610_s8 + $0xc0] sm:$0xff] }
 0x384   :  { %5646 = vmatpush1.bf16.msra.mxu0 %v5645_v2  ;;  %2117 = vmatprep.mubr.f32.mxu0 %v6219_v7  ;;  %v5655_v40 = vpack.c.bf16 %v4835_v32, %v4833_v13  ;;  %v2253_v2 = vsel %vm288_vm3, %v2250_v18, %v2252_v5  ;;  %v4796_v3 = vld [vmem:[%s8610_s8 + $0xc8] sm:$0xff] }
 0x385   :  { %5648 = vmatprep.subr.bf16.mxu0 %v5647_v15  ;;  %v4856_v15 = vld [vmem:[%s8603_s1 + $0x100] sm:$0xff] }
 0x386   :  { %v5673_v21 = vpack.c.bf16 %v4858_v16, %v4856_v15 }
 0x387   :  { %4824 = vmatmul.mubr.msk.f32.vlgmr.msra.gmra.mrb[12].mxu0 %vm84_vm1, %v2040_v23  ;;  %v5675_v23 = vpack.c.bf16 %v4863_v31, %v4861_v20 }
 0x388   :  { %2123 = vmatprep.mubr.f32.mxu0 %v6219_v7  ;;  %5650 = vmatpush1.bf16.msra.mxu0 %v5649_v25  ;;  %v4862_v25 = vld [vmem:[%s8603_s1 + $0x130] sm:$0xff] }
 0x389   :  { %5652 = vmatprep.subr.bf16.mxu0 %v5651_v27 }
 0x38b   :  { %4825 = vmatmul.mubr.msk.f32.gmra.mrb[14].mxu0 %vm84_vm1, %v2042_v36 }
 0x38c   :  { %2129 = vmatprep.mubr.f32.mxu0 %v6219_v7  ;;  %5654 = vmatpush1.bf16.msra.mxu0 %v5653_v39 }
 0x38d   :  { %5656 = vmatprep.subr.bf16.mxu0 %v5655_v40 }
 0x38f   :  { %4826 = vmatmul.mubr.msk.f32.gmra.mrb[16].mxu0 %vm84_vm1, %v2044_v41 }
 0x390   :  { %2135 = vmatprep.mubr.f32.mxu0 %v6219_v7 }
 0x393   :  { %4827 = vmatmul.mubr.msk.f32.gmra.mrb[18].mxu0 %vm84_vm1, %v2043_v37 }
 0x394   :  { %2214 = vmatprep.mubr.f32.mxu0 %v6219_v7 }
 0x397   :  { %4828 = vmatmul.mubr.msk.f32.vlgmr.msra.gmra.mrb[12].mxu0 %vm84_vm1, %v6951_v17  ;;  %v2369_v17 = vsel %vm410_vm4, %v2367_v11, %v2368_v14 }
 0x398   :  { %2220 = vmatprep.mubr.f32.mxu0 %v6219_v7  ;;  %5658 = vmatpush1.bf16.msra.mxu0 %v5657_v46 }
 0x399   :  { %5660 = vmatprep.subr.bf16.mxu0 %v5659_v48 }
 0x39b   :  { %4829 = vmatmul.mubr.msk.f32.gmra.mrb[14].mxu0 %vm84_vm1, %v6956_v19  ;;  %v2370_v19 = vrot.slane %v6978_v34, 3 }
 0x39c   :  { %2226 = vmatprep.mubr.f32.mxu0 %v6219_v7  ;;  %5662 = vmatpush1.bf16.msra.mxu0 %v5661_v52  ;;  %v5580_v52 = vpack.c.bf16 %v1815_v51, %v1814_v50  ;;  %v1832_v51 = vld [vmem:[%s8610_s8 + $0x90] sm:$0xff] }
 0x39d   :  { %5664 = vmatprep.subr.bf16.mxu0 %v5663_v53  ;;  %v2371_v27 = vsel %vm410_vm4, %v2368_v14, %v2370_v19  ;;  %v2373_v8 = vsel %vm410_vm4, %v2370_v19, %v2372_v29  ;;  %v1816_v53 = vld [vmem:[%s8610_s8 + $0x10] sm:$0xff]  ;;  %v2599_v14 = vld [vmem:[%s8604_s2] sm:$0x3] }
 0x39e   :  { %v5583_v55 = vpack.c.bf16 %v1817_v54, %v1816_v53  ;;  %v2604_v15 = vrot.slane %v2599_v14, %v6531_v33  ;;  %v2608_v16 = vrot.slane %v2599_v14, %v6536_v35  ;;  %v4801_v14 = vld [vmem:[%s8610_s8 + $0xf0] sm:$0xff] }
 0x39f   :  { %4830 = vmatmul.mubr.msk.f32.gmra.mrb[16].mxu0 %vm84_vm1, %v6978_v34  ;;  %v5677_v34 = vpack.c.bf16 %v4862_v25, %v4860_v24 }
 0x3a0   :  { %2232 = vmatprep.mubr.f32.mxu0 %v6219_v7 }
 0x3a3   :  { %4831 = vmatmul.mubr.msk.f32.gmra.mrb[18].mxu0 %vm84_vm1, %v6987_v28 }
 0x3a4   :  { %2326 = vmatprep.mubr.f32.mxu0 %v6219_v7 }
 0x3a7   :  { %4840 = vmatmul.mubr.msk.f32.vlgmr.msra.gmra.mrb[12].mxu0 %vm84_vm1, %v2249_v60  ;;  %v1821_v60 = vld [vmem:[%s8610_s8 + $0x38] sm:$0xff] }
 0x3a8   :  { %2332 = vmatprep.mubr.f32.mxu0 %v6219_v7  ;;  %5666 = vmatpush1.bf16.msra.mxu0 %v5665_v61  ;;  %v5589_v18 = vpack.c.bf16 %v1821_v60, %v1820_v59  ;;  %v1822_v61 = vld [vmem:[%s8610_s8 + $0x40] sm:$0xff] }
 0x3a9   :  { %5668 = vmatprep.subr.bf16.mxu0 %v5667_v62  ;;  %v1823_v62 = vld [vmem:[%s8610_s8 + $0x48] sm:$0xff] }
 0x3aa   :  { %v5592_v0 = vpack.c.bf16 %v1823_v62, %v1822_v61  ;;  %v4793_v61 = vld [vmem:[%s8610_s8 + $0xb0] sm:$0xff]  ;;  %v4794_v62 = vld [vmem:[%s8610_s8 + $0xb8] sm:$0xff] }
 0x3ab   :  { %4841 = vmatmul.mubr.msk.f32.gmra.mrb[14].mxu0 %vm84_vm1, %v2251_v4  ;;  %v1826_v4 = vld [vmem:[%s8610_s8 + $0x60] sm:$0xff] }
 0x3ac   :  { %2338 = vmatprep.mubr.f32.mxu0 %v6219_v7  ;;  %5670 = vmatpush1.bf16.msra.mxu0 %v5669_v6 }
 0x3ad   :  { %5672 = vmatprep.subr.bf16.mxu0 %v5671_v10  ;;  %v1828_v10 = vld [vmem:[%s8610_s8 + $0x70] sm:$0xff] }
 0x3af   :  { %4842 = vmatmul.mubr.msk.f32.gmra.mrb[16].mxu0 %vm84_vm1, %v2253_v2  ;;  %v1829_v2 = vld [vmem:[%s8610_s8 + $0x78] sm:$0xff] }
 0x3b0   :  { %2344 = vmatprep.mubr.f32.mxu0 %v6219_v7  ;;  %v5601_v11 = vpack.c.bf16 %v1829_v2, %v1828_v10  ;;  %v4799_v10 = vld [vmem:[%s8610_s8 + $0xe0] sm:$0xff]  ;;  %v4800_v2 = vld [vmem:[%s8610_s8 + $0xe8] sm:$0xff] }
 0x3b3   :  { %4843 = vmatmul.mubr.msk.f32.gmra.mrb[18].mxu0 %vm84_vm1, %v2252_v5  ;;  %v1827_v5 = vld [vmem:[%s8610_s8 + $0x68] sm:$0xff] }
 0x3b4   :  { %2446 = vmatprep.mubr.f32.mxu0 %v6219_v7  ;;  %v5598_v6 = vpack.c.bf16 %v1827_v5, %v1826_v4  ;;  %v4797_v4 = vld [vmem:[%s8610_s8 + $0xd0] sm:$0xff]  ;;  %v4798_v5 = vld [vmem:[%s8610_s8 + $0xd8] sm:$0xff] }
 0x3b7   :  { %4852 = vmatmul.mubr.msk.f32.vlgmr.msra.gmra.mrb[12].mxu0 %vm84_vm1, %v2369_v17 }
 0x3b8   :  { %2452 = vmatprep.mubr.f32.mxu0 %v6219_v7  ;;  %5674 = vmatpush1.bf16.msra.mxu0 %v5673_v21 }
 0x3b9   :  { %5676 = vmatprep.subr.bf16.mxu0 %v5675_v23 }
 0x3bb   :  { %4853 = vmatmul.mubr.msk.f32.gmra.mrb[14].mxu0 %vm84_vm1, %v2371_v27 }
 0x3bc   :  { %2458 = vmatprep.mubr.f32.mxu0 %v6219_v7  ;;  %5678 = vmatpush1.bf16.msra.mxu0 %v5677_v34 }
 0x3bf   :  { %4854 = vmatmul.mubr.msk.f32.gmra.mrb[16].mxu0 %vm84_vm1, %v2373_v8 }
 0x3c0   :  { %2464 = vmatprep.mubr.f32.mxu0 %v6219_v7 }
 0x3c3   :  { %4855 = vmatmul.mubr.msk.f32.gmra.mrb[18].mxu0 %vm84_vm1, %v2372_v29 }
 0x3c4   :  { %2566 = vmatprep.mubr.f32.mxu0 %v6219_v7 }
 0x3c7   :  { %4864 = vmatmul.mubr.msk.f32.vlgmr.msra.gmra.mrb[12].mxu0 %vm84_vm1, %v6967_v26  ;;  %v1633_v26 = vld [vmem:[%s8606_s4] sm:$0x3] }
 0x3c8   :  { %2572 = vmatprep.mubr.f32.mxu0 %v6219_v7  ;;  %v1638_v13 = vrot.slane %v1633_v26, %v6531_v33 }
 0x3cb   :  { %4865 = vmatmul.mubr.msk.f32.gmra.mrb[14].mxu0 %vm84_vm1, %v6982_v38  ;;  %v1642_v38 = vrot.slane %v1633_v26, %v6536_v35 }
 0x3cc   :  { %2578 = vmatprep.mubr.f32.mxu0 %v6219_v7 }
 0x3cf   :  { %4866 = vmatmul.mubr.msk.f32.gmra.mrb[16].mxu0 %vm84_vm1, %v7014_v47 }
 0x3d0   :  { %2584 = vmatprep.mubr.f32.mxu0 %v6219_v7 }
 0x3d3   :  { %4867 = vmatmul.mubr.msk.f32.gmra.mrb[18].mxu0 %vm84_vm1, %v2492_v42 }
 0x3d4   :  { %3130 = vmatprep.mubr.f32.mxu0 %v6219_v7 }
 0x452   :  { %v1618_v32 = vpop.f32.mrb[8].mxu0 }
 0x453   :  { %v1645_v36 = vadd.f32 %v1638_v13, %v1618_v32  ;;  %v1620_v37 = vpop.f32.mrb[9].mxu0 }
 0x454   :  { %v1646_v47 = vadd.f32 %v1642_v38, %v1620_v37 }
 0x455   :  { %6159 = vtanh.f32 %v1645_v36 }
 0x456   :  { %v1624_v39 = vpop.f32.mrb[10].mxu0  ;;  %6161 = vtanh.f32 %v1646_v47 }
 0x457   :  { %v1647_v40 = vadd.f32 %v1638_v13, %v1624_v39  ;;  %v1626_v28 = vpop.f32.mrb[11].mxu0 }
 0x458   :  { %v1648_v42 = vadd.f32 %v1642_v38, %v1626_v28 }
 0x459   :  { %6163 = vtanh.f32 %v1647_v40 }
 0x45a   :  { %6165 = vtanh.f32 %v1648_v42 }
 0x45f   :  { %v6160_v41 = vpop.eup %6159 }
 0x460   :  { %v6162_v43 = vpop.eup %6161 }
 0x463   :  { %v6164_v44 = vpop.eup %6163 }
 0x464   :  { %v6166_v45 = vpop.eup %6165  ;;  %v5570_v46 = vpack.c.bf16 %v6164_v44, %v6160_v41 }
 0x465   :  { %v5567_v48 = vpack.c.bf16 %v6166_v45, %v6162_v43 }
 0x467   :  { %5569 = vmatprep.subr.msk.bf16.mxu1 %vm7356_vm11, %v5567_v48 }
 0x468   :  { %5572 = vmatpush1.bf16.msk.msra.mxu1 %vm7356_vm11, %v5570_v46 }
 0x469   :  { %5575 = vmatprep.subr.msk.bf16.mxu1 %vm7356_vm11, %v5567_v48  ;;  %v1830_v48 = vld [vmem:[%s8610_s8 + $0x80] sm:$0xff] }
 0x46b   :  { %4785 = vmatmul.mubr.msk.f32.vlgmr.msra.gmra.mrb[16].mxu1 %vm1654_vm12, %v1653_v49  ;;  %v1831_v49 = vld [vmem:[%s8610_s8 + $0x88] sm:$0xff] }
 0x46c   :  { %5578 = vmatpush1.bf16.msk.msra.mxu1 %vm7356_vm11, %v5570_v46  ;;  %1805 = vmatprep.mubr.f32.mxu1 %v6219_v7  ;;  %v5604_v50 = vpack.c.bf16 %v1831_v49, %v1830_v48  ;;  %v2816_v48 = vld [vmem:[%s8608_s6 + $0x48] sm:$0xff] }
 0x46d   :  { %5579 = vmatprep.subr.bf16.mxu1 %v6221_v9 }
 0x46f   :  { %4789 = vmatmul.mubr.msk.f32.vlgmr.msra.gmra.mrb[18].mxu1 %vm1654_vm12, %v4786_v12  ;;  %v1833_v12 = vld [vmem:[%s8610_s8 + $0x98] sm:$0xff] }
 0x470   :  { %5581 = vmatpush1.bf16.msra.mxu1 %v5580_v52  ;;  %v5607_v52 = vpack.c.bf16 %v1833_v12, %v1832_v51  ;;  %v2818_v51 = vld [vmem:[%s8608_s6 + $0x58] sm:$0xff] }
 0x471   :  { %5582 = vmatprep.subr.bf16.mxu1 %v6221_v9 }
 0x474   :  { %5584 = vmatpush1.bf16.msra.mxu1 %v5583_v55  ;;  %v4791_v55 = vld [vmem:[%s8610_s8 + $0xa0] sm:$0xff] }
 0x475   :  { %5585 = vmatprep.subr.bf16.mxu1 %v6221_v9 }
 0x478   :  { %5587 = vmatpush1.bf16.msra.mxu1 %v5586_v58 }
 0x479   :  { %5588 = vmatprep.subr.bf16.mxu1 %v6221_v9 }
 0x47c   :  { %5590 = vmatpush1.bf16.msra.mxu1 %v5589_v18  ;;  %v5610_v18 = vpack.c.bf16 %v4792_v56, %v4791_v55  ;;  %v2821_v55 = vld [vmem:[%s8608_s6 + $0x70] sm:$0xff]  ;;  %v2822_v56 = vld [vmem:[%s8608_s6 + $0x78] sm:$0xff] }
 0x47d   :  { %5591 = vmatprep.subr.bf16.mxu1 %v6221_v9 }
 0x480   :  { %5593 = vmatpush1.bf16.msra.mxu1 %v5592_v0  ;;  %v5613_v0 = vpack.c.bf16 %v4794_v62, %v4793_v61  ;;  %v2826_v61 = vld [vmem:[%s8608_s6 + $0x98] sm:$0xff] }
 0x481   :  { %5594 = vmatprep.subr.bf16.mxu1 %v6221_v9 }
 0x484   :  { %5596 = vmatpush1.bf16.msra.mxu1 %v5595_v22  ;;  %v5616_v22 = vpack.c.bf16 %v4796_v3, %v4795_v1 }
 0x485   :  { %5597 = vmatprep.subr.bf16.mxu1 %v6221_v9 }
 0x488   :  { %5599 = vmatpush1.bf16.msra.mxu1 %v5598_v6  ;;  %v5619_v6 = vpack.c.bf16 %v4798_v5, %v4797_v4 }
 0x489   :  { %5600 = vmatprep.subr.bf16.mxu1 %v6221_v9 }
 0x48c   :  { %5602 = vmatpush1.bf16.msra.mxu1 %v5601_v11  ;;  %v5622_v11 = vpack.c.bf16 %v4800_v2, %v4799_v10 }
 0x48d   :  { %5603 = vmatprep.subr.bf16.mxu1 %v6221_v9 }
 0x490   :  { %5605 = vmatpush1.bf16.msra.mxu1 %v5604_v50  ;;  %v2817_v50 = vld [vmem:[%s8608_s6 + $0x50] sm:$0xff] }
 0x491   :  { %5606 = vmatprep.subr.bf16.mxu1 %v6221_v9  ;;  %v5715_v12 = vpack.c.bf16 %v2818_v51, %v2817_v50  ;;  %v4898_v51 = vld [vmem:[%s8608_s6 + $0x138] sm:$0xff] }
 0x494   :  { %5608 = vmatpush1.bf16.msra.mxu1 %v5607_v52  ;;  %v2819_v52 = vld [vmem:[%s8608_s6 + $0x60] sm:$0xff] }
 0x495   :  { %5609 = vmatprep.subr.bf16.mxu1 %v6221_v9 }
 0x49a   :  { %v2568_v20 = vpop.f32.mrb[12].mxu0 }
 0x49b   :  { %v2611_v31 = vadd.f32 %v2604_v15, %v2568_v20  ;;  %v2570_v17 = vpop.f32.mrb[13].mxu0  ;;  %v4803_v20 = vld [vmem:[%s8610_s8 + $0x100] sm:$0xff] }
 0x49c   :  { %v2612_v19 = vadd.f32 %v2608_v16, %v2570_v17 }
 0x49d   :  { %6167 = vtanh.f32 %v2611_v31  ;;  %v4804_v31 = vld [vmem:[%s8610_s8 + $0x108] sm:$0xff] }
 0x49e   :  { %v2574_v21 = vpop.f32.mrb[14].mxu0  ;;  %6169 = vtanh.f32 %v2612_v19  ;;  %v5628_v17 = vpack.c.bf16 %v4804_v31, %v4803_v20  ;;  %v4805_v19 = vld [vmem:[%s8610_s8 + $0x110] sm:$0xff] }
 0x49f   :  { %v2613_v23 = vadd.f32 %v2604_v15, %v2574_v21  ;;  %v2576_v24 = vpop.f32.mrb[15].mxu0  ;;  %v4806_v21 = vld [vmem:[%s8610_s8 + $0x118] sm:$0xff] }
 0x4a0   :  { %v2614_v25 = vadd.f32 %v2608_v16, %v2576_v24  ;;  %v4807_v24 = vld [vmem:[%s8610_s8 + $0x120] sm:$0xff] }
 0x4a1   :  { %6171 = vtanh.f32 %v2613_v23  ;;  %v5631_v23 = vpack.c.bf16 %v4806_v21, %v4805_v19  ;;  %v4882_v21 = vld [vmem:[%s8608_s6 + $0xb8] sm:$0xff] }
 0x4a2   :  { %6173 = vtanh.f32 %v2614_v25  ;;  %v2580_v27 = vpop.f32.mrb[16].mxu0  ;;  %v4808_v25 = vld [vmem:[%s8610_s8 + $0x128] sm:$0xff] }
 0x4a3   :  { %v2615_v29 = vadd.f32 %v2604_v15, %v2580_v27  ;;  %v2582_v34 = vpop.f32.mrb[17].mxu0  ;;  %v5634_v27 = vpack.c.bf16 %v4808_v25, %v4807_v24 }
 0x4a4   :  { %v2616_v8 = vadd.f32 %v2608_v16, %v2582_v34  ;;  %v4810_v34 = vld [vmem:[%s8610_s8 + $0x138] sm:$0xff] }
 0x4a5   :  { %6175 = vtanh.f32 %v2615_v29  ;;  %v4809_v29 = vld [vmem:[%s8610_s8 + $0x130] sm:$0xff] }
 0x4a6   :  { %v2586_v26 = vpop.f32.mrb[18].mxu0  ;;  %6177 = vtanh.f32 %v2616_v8  ;;  %v5637_v8 = vpack.c.bf16 %v4810_v34, %v4809_v29 }
 0x4a7   :  { %v2617_v13 = vadd.f32 %v2604_v15, %v2586_v26  ;;  %v2588_v38 = vpop.f32.mrb[19].mxu0  ;;  %v6168_v36 = vpop.eup %6167  ;;  %v4802_v15 = vld [vmem:[%s8610_s8 + $0xf8] sm:$0xff]  ;;  %v2627_v26 = vld [vmem:[%s8607_s5] sm:$0xff] }
 0x4a8   :  { %v2618_v32 = vadd.f32 %v2608_v16, %v2588_v38  ;;  %v6170_v37 = vpop.eup %6169  ;;  %v5625_v16 = vpack.c.bf16 %v4802_v15, %v4801_v14  ;;  %v4872_v38 = vld [vmem:[%s8607_s5 + $0x10] sm:$0xff]  ;;  %v4880_v14 = vld [vmem:[%s8608_s6 + $0xa8] sm:$0xff] }
 0x4a9   :  { %6179 = vtanh.f32 %v2617_v13  ;;  %v2628_v13 = vld [vmem:[%s8607_s5 + $0x8] sm:$0x3f]  ;;  %v4881_v15 = vld [vmem:[%s8608_s6 + $0xb0] sm:$0xff] }
 0x4aa   :  { %6181 = vtanh.f32 %v2618_v32  ;;  %v4873_v32 = vld [vmem:[%s8607_s5 + $0x18] sm:$0x3f]  ;;  %v5730_v19 = vpack.c.bf16 %v4881_v15, %v4880_v14  ;;  %v4915_v15 = vld [vmem:[%s8605_s3 + $0x110] sm:$0xff] }
 0x4ab   :  { %v6172_v47 = vpop.eup %6171 }
 0x4ac   :  { %v6174_v39 = vpop.eup %6173  ;;  %v7439_v40 = vpack.c.bf16 %v6172_v47, %v6168_v36  ;;  %v2808_v36 = vld [vmem:[%s8608_s6 + $0x8] sm:$0xff] }
 0x4ad   :  { %v7441_v28 = vpack.c.bf16 %v6174_v39, %v6170_v37  ;;  %v2809_v37 = vld [vmem:[%s8608_s6 + $0x10] sm:$0xff]  ;;  %v5700_v47 = vpack.c.bf16 %v2808_v36, %v2807_v63  ;;  %v2810_v39 = vld [vmem:[%s8608_s6 + $0x18] sm:$0xff]  ;;  %v4888_v36 = vld [vmem:[%s8608_s6 + $0xe8] sm:$0xff] }
 0x4af   :  { %v6176_v42 = vpop.eup %6175 }
 0x4b0   :  { %v6178_v41 = vpop.eup %6177 }
 0x4b3   :  { %v6180_v43 = vpop.eup %6179 }
 0x4b4   :  { %v6182_v44 = vpop.eup %6181  ;;  %v7443_v45 = vpack.c.bf16 %v6180_v43, %v6176_v42  ;;  %v2812_v42 = vld [vmem:[%s8608_s6 + $0x28] sm:$0xff]  ;;  %v2813_v43 = vld [vmem:[%s8608_s6 + $0x30] sm:$0xff] }
 0x4b5   :  { %v7445_v46 = vpack.c.bf16 %v6182_v44, %v6178_v41  ;;  %v2814_v44 = vld [vmem:[%s8608_s6 + $0x38] sm:$0xff] }
 0x53e   :  { %v1731_v53 = vpop.f32.mrb[16].mxu1 }
 0x53f   :  { %v1733_v54 = vpop.f32.mrb[17].mxu1 }
 0x542   :  { %v1807_v57 = vpop.f32.mrb[18].mxu1 }
 0x543   :  { %v1812_v58 = vmax.f32 %v1731_v53, %v1807_v57  ;;  %v1809_v59 = vpop.f32.mrb[19].mxu1  ;;  %v2820_v53 = vld [vmem:[%s8608_s6 + $0x68] sm:$0xff]  ;;  %v5721_v57 = vpack.c.bf16 %v2822_v56, %v2821_v55  ;;  %v4903_v56 = vld [vmem:[%s8605_s3 + $0xb0] sm:$0xff] }
 0x544   :  { %v1813_v60 = vmax.f32 %v1733_v54, %v1809_v59  ;;  %v5718_v54 = vpack.c.bf16 %v2820_v53, %v2819_v52  ;;  %v2824_v59 = vld [vmem:[%s8608_s6 + $0x88] sm:$0xff] }
 0x545   :  { %v4900_v53 = vld [vmem:[%s8608_s6 + $0x148] sm:$0xff] }
 0x546   :  { %4790 = vmatprep.mubr.msk.f32.mxu1 %vm84_vm1, %v1813_v60  ;;  %v4906_v55 = vld [vmem:[%s8605_s3 + $0xc8] sm:$0xff] }
 0x547   :  { %1902 = vmatmul.mubr.f32.vlgmr.msra.gmra.mrb[20].mxu1 %v1812_v58 }
 0x548   :  { %5611 = vmatpush1.bf16.msra.mxu1 %v5610_v18  ;;  %4811 = vmatprep.mubr.msk.f32.mxu1 %vm84_vm1, %v1813_v60  ;;  %v2825_v18 = vld [vmem:[%s8608_s6 + $0x90] sm:$0xff] }
 0x549   :  { %5612 = vmatprep.subr.bf16.mxu1 %v6221_v9  ;;  %v5727_v62 = vpack.c.bf16 %v2826_v61, %v2825_v18 }
 0x54c   :  { %5614 = vmatpush1.bf16.msra.mxu1 %v5613_v0  ;;  %v2827_v0 = vld [vmem:[%s8608_s6 + $0xa0] sm:$0xff] }
 0x54d   :  { %5615 = vmatprep.subr.bf16.mxu1 %v6221_v9 }
 0x550   :  { %5617 = vmatpush1.bf16.msra.mxu1 %v5616_v22 }
 0x551   :  { %5618 = vmatprep.subr.bf16.mxu1 %v6221_v9 }
 0x554   :  { %5620 = vmatpush1.bf16.msra.mxu1 %v5619_v6 }
 0x555   :  { %5621 = vmatprep.subr.bf16.mxu1 %v6221_v9 }
 0x558   :  { %5623 = vmatpush1.bf16.msra.mxu1 %v5622_v11 }
 0x559   :  { %5624 = vmatprep.subr.bf16.mxu1 %v6221_v9 }
 0x55c   :  { %5626 = vmatpush1.bf16.msra.mxu1 %v5625_v16 }
 0x55d   :  { %5627 = vmatprep.subr.bf16.mxu1 %v6221_v9 }
 0x560   :  { %5629 = vmatpush1.bf16.msra.mxu1 %v5628_v17 }
 0x561   :  { %5630 = vmatprep.subr.bf16.mxu1 %v6221_v9 }
 0x564   :  { %5632 = vmatpush1.bf16.msra.mxu1 %v5631_v23  ;;  %v4883_v23 = vld [vmem:[%s8608_s6 + $0xc0] sm:$0xff] }
 0x565   :  { %5633 = vmatprep.subr.bf16.mxu1 %v6221_v9  ;;  %v5733_v34 = vpack.c.bf16 %v4883_v23, %v4882_v21  ;;  %v4919_v21 = vld [vmem:[%s8605_s3 + $0x130] sm:$0xff]  ;;  %v4921_v23 = vld [vmem:[%s8605_s3 + $0x140] sm:$0xff] }
 0x568   :  { %5635 = vmatpush1.bf16.msra.mxu1 %v5634_v27 }
 0x569   :  { %5636 = vmatprep.subr.bf16.mxu1 %v6221_v9 }
 0x56c   :  { %5638 = vmatpush1.bf16.msra.mxu1 %v5637_v8  ;;  %v4884_v8 = vld [vmem:[%s8608_s6 + $0xc8] sm:$0xff] }
 0x56d   :  { %5680 = vmatprep.subr.bf16.mxu1 %v7441_v28 }
 0x56f   :  { %1993 = vmatmul.mubr.f32.vlgmr.msra.gmra.mrb[22].mxu1 %v1812_v58  ;;  %v2823_v58 = vld [vmem:[%s8608_s6 + $0x80] sm:$0xff] }
 0x570   :  { %5682 = vmatpush1.bf16.msra.mxu1 %v7439_v40  ;;  %2705 = vmatprep.mubr.f32.mxu1 %v6219_v7  ;;  %v5724_v60 = vpack.c.bf16 %v2824_v59, %v2823_v58  ;;  %v4905_v58 = vld [vmem:[%s8605_s3 + $0xc0] sm:$0xff]  ;;  %v4908_v59 = vld [vmem:[%s8605_s3 + $0xd8] sm:$0xff] }
 0x571   :  { %5685 = vmatprep.subr.msk.bf16.mxu1 %vm6542_vm6, %v7445_v46  ;;  %v5761_v18 = vpack.c.bf16 %v4905_v58, %v4903_v56  ;;  %v3018_v58 = vld [vmem:[%s8605_s3 + $0x58] sm:$0xff] }
 0x574   :  { %5688 = vmatpush1.bf16.msk.msra.mxu1 %vm6542_vm6, %v7443_v45 }
 0x575   :  { %5690 = vmatprep.subr.bf16.mxu1 %v7441_v28  ;;  %v2811_v28 = vld [vmem:[%s8608_s6 + $0x20] sm:$0xff] }
 0x576   :  { %v5706_v41 = vpack.c.bf16 %v2812_v42, %v2811_v28  ;;  %v4892_v42 = vld [vmem:[%s8608_s6 + $0x108] sm:$0xff] }
 0x577   :  { %4870 = vmatmul.mubr.msk.f32.vlgmr.msra.gmra.mrb[24].mxu1 %vm675_vm7, %v2627_v26  ;;  %v4885_v26 = vld [vmem:[%s8608_s6 + $0xd0] sm:$0xff] }
 0x578   :  { %5692 = vmatpush1.bf16.msra.mxu1 %v7439_v40  ;;  %2711 = vmatprep.mubr.f32.mxu1 %v6219_v7  ;;  %v5703_v40 = vpack.c.bf16 %v2810_v39, %v2809_v37  ;;  %v4889_v37 = vld [vmem:[%s8608_s6 + $0xf0] sm:$0xff]  ;;  %v4890_v39 = vld [vmem:[%s8608_s6 + $0xf8] sm:$0xff] }
 0x579   :  { %5695 = vmatprep.subr.msk.bf16.mxu1 %vm6542_vm6, %v7445_v46  ;;  %v2815_v46 = vld [vmem:[%s8608_s6 + $0x40] sm:$0xff] }
 0x57a   :  { %v5712_v49 = vpack.c.bf16 %v2816_v48, %v2815_v46  ;;  %v4896_v48 = vld [vmem:[%s8608_s6 + $0x128] sm:$0xff] }
 0x57b   :  { %4871 = vmatmul.mubr.msk.f32.gmra.mrb[26].mxu1 %vm675_vm7, %v2628_v13  ;;  %v5736_v13 = vpack.c.bf16 %v4885_v26, %v4884_v8 }
 0x57c   :  { %5698 = vmatpush1.bf16.msk.msra.mxu1 %vm6542_vm6, %v7443_v45  ;;  %2790 = vmatprep.mubr.f32.mxu1 %v6219_v7  ;;  %v5709_v45 = vpack.c.bf16 %v2814_v44, %v2813_v43  ;;  %vm2011_vm6 = vcmask 651268   ;;  %v4894_v44 = vld [vmem:[%s8608_s6 + $0x118] sm:$0xff] }
 0x57d   :  { %5699 = vmatprep.subr.bf16.mxu1 %v6221_v9 }
 0x57f   :  { %4876 = vmatmul.mubr.msk.f32.vlgmr.msra.gmra.mrb[28].mxu1 %vm675_vm7, %v4872_v38  ;;  %v4886_v38 = vld [vmem:[%s8608_s6 + $0xd8] sm:$0xff] }
 0x580   :  { %2796 = vmatprep.mubr.f32.mxu1 %v6219_v7  ;;  %5701 = vmatpush1.bf16.msra.mxu1 %v5700_v47  ;;  %v5742_v47 = vpack.c.bf16 %v4889_v37, %v4888_v36 }
 0x581   :  { %5702 = vmatprep.subr.bf16.mxu1 %v6221_v9 }
 0x583   :  { %4877 = vmatmul.mubr.msk.f32.gmra.mrb[30].mxu1 %vm675_vm7, %v4873_v32  ;;  %v4887_v32 = vld [vmem:[%s8608_s6 + $0xe0] sm:$0xff] }
 0x584   :  { %5704 = vmatpush1.bf16.msra.mxu1 %v5703_v40  ;;  %v5739_v63 = vpack.c.bf16 %v4887_v32, %v4886_v38  ;;  %v4891_v40 = vld [vmem:[%s8608_s6 + $0x100] sm:$0xff] }
 0x585   :  { %5705 = vmatprep.subr.bf16.mxu1 %v6221_v9  ;;  %v5745_v28 = vpack.c.bf16 %v4891_v40, %v4890_v39  ;;  %v3009_v39 = vld [vmem:[%s8605_s3 + $0x10] sm:$0xff] }
 0x588   :  { %5707 = vmatpush1.bf16.msra.mxu1 %v5706_v41  ;;  %v4893_v41 = vld [vmem:[%s8608_s6 + $0x110] sm:$0xff] }
 0x589   :  { %5708 = vmatprep.subr.bf16.mxu1 %v6221_v9  ;;  %v5748_v43 = vpack.c.bf16 %v4893_v41, %v4892_v42 }
 0x58c   :  { %5710 = vmatpush1.bf16.msra.mxu1 %v5709_v45  ;;  %v4895_v45 = vld [vmem:[%s8608_s6 + $0x120] sm:$0xff] }
 0x58d   :  { %5711 = vmatprep.subr.bf16.mxu1 %v6221_v9  ;;  %v5751_v46 = vpack.c.bf16 %v4895_v45, %v4894_v44  ;;  %v3014_v44 = vld [vmem:[%s8605_s3 + $0x38] sm:$0xff] }
 0x590   :  { %5713 = vmatpush1.bf16.msra.mxu1 %v5712_v49  ;;  %v4897_v49 = vld [vmem:[%s8608_s6 + $0x130] sm:$0xff] }
 0x591   :  { %5714 = vmatprep.subr.bf16.mxu1 %v6221_v9  ;;  %v5754_v50 = vpack.c.bf16 %v4897_v49, %v4896_v48 }
 0x594   :  { %5716 = vmatpush1.bf16.msra.mxu1 %v5715_v12  ;;  %v4899_v12 = vld [vmem:[%s8608_s6 + $0x140] sm:$0xff] }
 0x595   :  { %5717 = vmatprep.subr.bf16.mxu1 %v6221_v9  ;;  %v5757_v52 = vpack.c.bf16 %v4899_v12, %v4898_v51 }
 0x598   :  { %5719 = vmatpush1.bf16.msra.mxu1 %v5718_v54  ;;  %v4904_v54 = vld [vmem:[%s8605_s3 + $0xb8] sm:$0xff] }
 0x599   :  { %5720 = vmatprep.subr.bf16.mxu1 %v6221_v9 }
 0x59c   :  { %5722 = vmatpush1.bf16.msra.mxu1 %v5721_v57  ;;  %v5759_v57 = vpack.c.bf16 %v4906_v55, %v4904_v54  ;;  %v3011_v54 = vld [vmem:[%s8605_s3 + $0x20] sm:$0xff]  ;;  %v3013_v55 = vld [vmem:[%s8605_s3 + $0x30] sm:$0xff] }
 0x59d   :  { %5723 = vmatprep.subr.bf16.mxu1 %v6221_v9 }
 0x59e   :  { %5760 = vmatprep.subr.bf16.mxu0 %v5759_v57  ;;  %v3016_v57 = vld [vmem:[%s8605_s3 + $0x48] sm:$0xff] }
 0x59f   :  { %5762 = vmatpush1.bf16.msra.mxu0 %v5761_v18 }
 0x5a0   :  { %5725 = vmatpush1.bf16.msra.mxu1 %v5724_v60  ;;  %v4910_v60 = vld [vmem:[%s8605_s3 + $0xe8] sm:$0xff] }
 0x5a1   :  { %5726 = vmatprep.subr.bf16.mxu1 %v6221_v9  ;;  %v5763_v61 = vpack.c.bf16 %v4910_v60, %v4908_v59 }
 0x5a3   :  { %5764 = vmatprep.subr.bf16.mxu0 %v5763_v61  ;;  %v5785_v61 = vpack.c.bf16 %v3013_v55, %v3011_v54  ;;  %v4951_v54 = vld [vmem:[%s8605_s3 + $0x1f0] sm:$0xff] }
 0x5a4   :  { %5728 = vmatpush1.bf16.msra.mxu1 %v5727_v62  ;;  %v4907_v62 = vld [vmem:[%s8605_s3 + $0xd0] sm:$0xff] }
 0x5a5   :  { %2874 = vmatprep.subr.mxu1 %v6219_v7 }
 0x5a8   :  { %2875 = vmatpush1.msra.mxu1 %v2827_v0  ;;  %v4909_v0 = vld [vmem:[%s8605_s3 + $0xe0] sm:$0xff] }
 0x5a9   :  { %5729 = vmatprep.subr.bf16.mxu1 %v6221_v9 }
 0x61a   :  { %v1903_v1 = vpop.f32.mrb[20].mxu1 }
 0x61b   :  { %v1905_v3 = vpop.f32.mrb[21].mxu1 }
 0x61c   :  { %v4914_v3 = vld [vmem:[%s8605_s3 + $0x108] sm:$0xff] }
 0x642   :  { %v1994_v22 = vpop.f32.mrb[22].mxu1 }
 0x643   :  { %v1998_v4 = vmax.f32 %v1903_v1, %v1994_v22  ;;  %v1996_v5 = vpop.f32.mrb[23].mxu1  ;;  %v4912_v1 = vld [vmem:[%s8605_s3 + $0xf8] sm:$0xff]  ;;  %v5765_v22 = vpack.c.bf16 %v4909_v0, %v4907_v62  ;;  %v5787_v62 = vpack.c.bf16 %v3018_v58, %v3016_v57  ;;  %v3015_v0 = vld [vmem:[%s8605_s3 + $0x40] sm:$0xff]  ;;  %v4962_v58 = vld [vmem:[%s8605_s3 + $0x228] sm:$0xff] }
 0x644   :  { %v4911_v5 = vld [vmem:[%s8605_s3 + $0xf0] sm:$0xff]  ;;  %v4960_v57 = vld [vmem:[%s8605_s3 + $0x218] sm:$0xff] }
 0x645   :  { %2000 = vst.msk [vmem:[#allocation2] sm:$0x1] %vm1999_vm13, %v1998_v4  ;;  %5766 = vmatpush1.bf16.msra.mxu0 %v5765_v22  ;;  %v3022_v22 = vld [vmem:[%s8605_s3 + $0x78] sm:$0xff] }
 0x646   :  { %2003 = vst.msk [vmem:[#allocation2 + $0x1] sm:$0x2] %vm2002_vm14, %v1998_v4 }
 0x647   :  { %2006 = vst.msk [vmem:[#allocation2 + $0x2] sm:$0x4] %vm2005_vm15, %v1998_v4 }
 0x648   :  { %2009 = vst.msk [vmem:[#allocation2 + $0x3] sm:$0x8] %vm2008_vm5, %v1998_v4 }
 0x649   :  { %2012 = vst.msk [vmem:[#allocation2 + $0x4] sm:$0x10] %vm2011_vm6, %v1998_v4  ;;  %v5767_v4 = vpack.c.bf16 %v4914_v3, %v4912_v1  ;;  %v3017_v1 = vld [vmem:[%s8605_s3 + $0x50] sm:$0xff]  ;;  %v3020_v3 = vld [vmem:[%s8605_s3 + $0x68] sm:$0xff] }
 0x64a   :  { %v2707_v6 = vpop.f32.mrb[24].mxu1 }
 0x64b   :  { %v2709_v10 = vpop.f32.mrb[25].mxu1  ;;  %5768 = vmatprep.subr.bf16.mxu0 %v5767_v4  ;;  %v5789_v4 = vpack.c.bf16 %v3017_v1, %v3015_v0  ;;  %v4964_v0 = vld [vmem:[%s8605_s3 + $0x238] sm:$0xff]  ;;  %v4966_v1 = vld [vmem:[%s8605_s3 + $0x248] sm:$0xff] }
 0x64e   :  { %v2713_v2 = vpop.f32.mrb[26].mxu1 }
 0x64f   :  { %v2715_v11 = vpop.f32.mrb[27].mxu1 }
 0x652   :  { %v2792_v16 = vpop.f32.mrb[28].mxu1 }
 0x653   :  { %v2803_v20 = vmax.f32 %v2707_v6, %v2792_v16  ;;  %v2794_v31 = vpop.f32.mrb[29].mxu1  ;;  %v4913_v6 = vld [vmem:[%s8605_s3 + $0x100] sm:$0xff] }
 0x654   :  { %v2804_v17 = vmax.f32 %v2709_v10, %v2794_v31  ;;  %v4916_v10 = vld [vmem:[%s8605_s3 + $0x118] sm:$0xff]  ;;  %v4917_v16 = vld [vmem:[%s8605_s3 + $0x120] sm:$0xff] }
 0x655   :  { %v4920_v31 = vld [vmem:[%s8605_s3 + $0x138] sm:$0xff] }
 0x656   :  { %v2798_v24 = vpop.f32.mrb[30].mxu1  ;;  %4878 = vmatprep.mubr.msk.f32.mxu1 %vm876_vm8, %v2804_v17 }
 0x657   :  { %v2805_v25 = vmax.f32 %v2713_v2, %v2798_v24  ;;  %v2800_v27 = vpop.f32.mrb[31].mxu1  ;;  %2899 = vmatmul.mubr.f32.vlgmr.msra.gmra.mrb[32].mxu1 %v2803_v20  ;;  %v4918_v2 = vld [vmem:[%s8605_s3 + $0x128] sm:$0xff]  ;;  %v5777_v24 = vpack.c.bf16 %v4921_v23, %v4919_v21  ;;  %v4936_v21 = vld [vmem:[%s8605_s3 + $0x178] sm:$0xff]  ;;  %v4933_v23 = vld [vmem:[%s8605_s3 + $0x160] sm:$0xff] }
 0x658   :  { %v2806_v29 = vmax.f32 %v2715_v11, %v2800_v27  ;;  %5731 = vmatpush1.bf16.msra.mxu1 %v5730_v19  ;;  %v5769_v11 = vpack.c.bf16 %v4913_v6, %v4911_v5  ;;  %v5771_v14 = vpack.c.bf16 %v4918_v2, %v4916_v10  ;;  %v4923_v27 = vld [vmem:[%s8605_s3 + $0x150] sm:$0xf]  ;;  %v5791_v5 = vpack.c.bf16 %v3022_v22, %v3020_v3  ;;  %v3019_v6 = vld [vmem:[%s8605_s3 + $0x60] sm:$0xff]  ;;  %v3024_v2 = vld [vmem:[%s8605_s3 + $0x88] sm:$0xff] }
 0x659   :  { %5732 = vmatprep.subr.bf16.mxu1 %v6221_v9  ;;  %v3021_v10 = vld [vmem:[%s8605_s3 + $0x70] sm:$0xff]  ;;  %v4953_v3 = vld [vmem:[%s8605_s3 + $0x200] sm:$0xf]  ;;  %v5819_v22 = vpack.c.bf16 %v4962_v58, %v4960_v57  ;;  %v5002_v58 = vld [vmem:[%s8605_s3 + $0x348] sm:$0xff] }
 0x65a   :  { %4879 = vmatprep.mubr.msk.f32.mxu1 %vm876_vm8, %v2806_v29  ;;  %5770 = vmatpush1.bf16.msra.mxu0 %v5769_v11  ;;  %v3026_v11 = vld [vmem:[%s8605_s3 + $0x98] sm:$0xff]  ;;  %v4999_v57 = vld [vmem:[%s8605_s3 + $0x330] sm:$0xff] }
 0x65b   :  { %2904 = vmatmul.mubr.f32.gmra.mrb[34].mxu1 %v2805_v25  ;;  %5772 = vmatprep.subr.bf16.mxu0 %v5771_v14  ;;  %v5793_v14 = vpack.c.bf16 %v3021_v10, %v3019_v6  ;;  %v4963_v6 = vld [vmem:[%s8605_s3 + $0x230] sm:$0xff]  ;;  %v4965_v10 = vld [vmem:[%s8605_s3 + $0x240] sm:$0xff] }
 0x65c   :  { %5734 = vmatpush1.bf16.msra.mxu1 %v5733_v34  ;;  %4901 = vmatprep.mubr.msk.f32.mxu1 %vm876_vm8, %v2804_v17  ;;  %v4922_v17 = vld [vmem:[%s8605_s3 + $0x148] sm:$0xff]  ;;  %v3010_v34 = vld [vmem:[%s8605_s3 + $0x18] sm:$0xff] }
 0x65d   :  { %5735 = vmatprep.subr.bf16.mxu1 %v6221_v9  ;;  %v5775_v19 = vpack.c.bf16 %v4922_v17, %v4920_v31  ;;  %v3028_v17 = vld [vmem:[%s8605_s3 + $0xa8] sm:$0xf] }
 0x660   :  { %5737 = vmatpush1.bf16.msra.mxu1 %v5736_v13 }
 0x661   :  { %5738 = vmatprep.subr.bf16.mxu1 %v6221_v9 }
 0x664   :  { %5740 = vmatpush1.bf16.msra.mxu1 %v5739_v63 }
 0x665   :  { %5741 = vmatprep.subr.bf16.mxu1 %v6221_v9 }
 0x668   :  { %5743 = vmatpush1.bf16.msra.mxu1 %v5742_v47  ;;  %v3007_v47 = vld [vmem:[%s8605_s3] sm:$0xff] }
 0x669   :  { %5744 = vmatprep.subr.bf16.mxu1 %v6221_v9  ;;  %v5781_v41 = vpack.c.bf16 %v3009_v39, %v3007_v47  ;;  %v4941_v39 = vld [vmem:[%s8605_s3 + $0x1a0] sm:$0xff] }
 0x66c   :  { %5746 = vmatpush1.bf16.msra.mxu1 %v5745_v28 }
 0x66d   :  { %5747 = vmatprep.subr.bf16.mxu1 %v6221_v9 }
 0x670   :  { %5749 = vmatpush1.bf16.msra.mxu1 %v5748_v43  ;;  %v3012_v43 = vld [vmem:[%s8605_s3 + $0x28] sm:$0xff] }
 0x671   :  { %5750 = vmatprep.subr.bf16.mxu1 %v6221_v9 }
 0x674   :  { %5752 = vmatpush1.bf16.msra.mxu1 %v5751_v46 }
 0x675   :  { %5753 = vmatprep.subr.bf16.mxu1 %v6221_v9 }
 0x678   :  { %5755 = vmatpush1.bf16.msra.mxu1 %v5754_v50 }
 0x679   :  { %5756 = vmatprep.subr.bf16.mxu1 %v6221_v9 }
 0x67c   :  { %5758 = vmatpush1.bf16.msra.mxu1 %v5757_v52 }
 0x67d   :  { %2970 = vmatprep.subr.mxu1 %v6219_v7 }
 0x680   :  { %2971 = vmatpush1.msra.mxu1 %v4900_v53  ;;  %v5783_v53 = vpack.c.bf16 %v3014_v44, %v3012_v43  ;;  %v4945_v44 = vld [vmem:[%s8605_s3 + $0x1c0] sm:$0xff] }
 0x681   :  { %2995 = vmatmul.mubr.f32.vlgmr.msra.gmra.mrb[36].mxu1 %v2803_v20  ;;  %v5773_v20 = vpack.c.bf16 %v4917_v16, %v4915_v15  ;;  %v5795_v15 = vpack.c.bf16 %v3026_v11, %v3024_v2  ;;  %v3023_v16 = vld [vmem:[%s8605_s3 + $0x80] sm:$0xff]  ;;  %v4968_v2 = vld [vmem:[%s8605_s3 + $0x258] sm:$0xff]  ;;  %v4970_v11 = vld [vmem:[%s8605_s3 + $0x268] sm:$0xff] }
 0x682   :  { %4902 = vmatprep.mubr.msk.f32.mxu1 %vm876_vm8, %v2806_v29  ;;  %v3008_v29 = vld [vmem:[%s8605_s3 + $0x8] sm:$0xff] }
 0x683   :  { %5774 = vmatpush1.bf16.msra.mxu0 %v5773_v20  ;;  %v5779_v8 = vpack.c.bf16 %v3010_v34, %v3008_v29  ;;  %v3025_v20 = vld [vmem:[%s8605_s3 + $0x90] sm:$0xff]  ;;  %v3027_v29 = vld [vmem:[%s8605_s3 + $0xa0] sm:$0xf] }
 0x684   :  { %5776 = vmatprep.subr.bf16.mxu0 %v5775_v19  ;;  %v5797_v31 = vpack.c.bf16 %v3025_v20, %v3023_v16  ;;  %v4934_v19 = vld [vmem:[%s8605_s3 + $0x168] sm:$0xff]  ;;  %v4967_v16 = vld [vmem:[%s8605_s3 + $0x250] sm:$0xff]  ;;  %v4969_v20 = vld [vmem:[%s8605_s3 + $0x260] sm:$0xff] }
 0x685   :  { %3000 = vmatmul.mubr.f32.gmra.mrb[38].mxu1 %v2805_v25  ;;  %v4924_v25 = vld [vmem:[%s8605_s3 + $0x158] sm:$0xf]  ;;  %v5799_v34 = vpack.c.bf16 %v4936_v21, %v4934_v19  ;;  %v4971_v21 = vld [vmem:[%s8605_s3 + $0x270] sm:$0xff] }
 0x686   :  { %3672 = vmatprep.mubr.f32.mxu1 %v6219_v7 }
 0x687   :  { %5778 = vmatpush1.bf16.msra.mxu0 %v5777_v24  ;;  %v4935_v24 = vld [vmem:[%s8605_s3 + $0x170] sm:$0xff] }
 0x688   :  { %4925 = vmatprep.subr.msk.mxu0 %vm532_vm2, %v4924_v25  ;;  %v4938_v25 = vld [vmem:[%s8605_s3 + $0x188] sm:$0xff] }
 0x68b   :  { %4926 = vmatpush1.msk.msra.mxu0 %vm532_vm2, %v4923_v27  ;;  %v4940_v27 = vld [vmem:[%s8605_s3 + $0x198] sm:$0xff] }
 0x68c   :  { %5780 = vmatprep.subr.bf16.mxu0 %v5779_v8  ;;  %v5801_v8 = vpack.c.bf16 %v4935_v24, %v4933_v23  ;;  %v4973_v23 = vld [vmem:[%s8605_s3 + $0x280] sm:$0xff]  ;;  %v4976_v24 = vld [vmem:[%s8605_s3 + $0x298] sm:$0xff] }
 0x72a   :  { %v2900_v26 = vpop.f32.mrb[32].mxu1 }
 0x72b   :  { %v2902_v13 = vpop.f32.mrb[33].mxu1 }
 0x72c   :  { %v4937_v13 = vld [vmem:[%s8605_s3 + $0x180] sm:$0xff] }
 0x72e   :  { %v2905_v38 = vpop.f32.mrb[34].mxu1 }
 0x72f   :  { %v2907_v32 = vpop.f32.mrb[35].mxu1 }
 0x730   :  { %v4942_v32 = vld [vmem:[%s8605_s3 + $0x1a8] sm:$0xff] }
 0x754   :  { %v2996_v63 = vpop.f32.mrb[36].mxu1 }
 0x755   :  { %v7800_v36 = vmax.f32 %v2900_v26, %v2996_v63  ;;  %v2998_v37 = vpop.f32.mrb[37].mxu1  ;;  %v5803_v26 = vpack.c.bf16 %v4940_v27, %v4938_v25  ;;  %v4944_v63 = vld [vmem:[%s8605_s3 + $0x1b8] sm:$0xff]  ;;  %v5833_v25 = vpack.c.bf16 %v4973_v23, %v4971_v21  ;;  %v3756_v21 = vld [vmem:[%s8610_s8] sm:$0xff]  ;;  %v3757_v23 = vld [vmem:[%s8610_s8 + $0x8] sm:$0xff] }
 0x756   :  { %v5807_v47 = vpack.c.bf16 %v4944_v63, %v4942_v32  ;;  %v4985_v32 = vld [vmem:[%s8605_s3 + $0x2c0] sm:$0xff]  ;;  %v4987_v63 = vld [vmem:[%s8605_s3 + $0x2d0] sm:$0xff] }
 0x757   :  { %v3053_v45 = vrot.slane %v7800_v36, 1  ;;  %v3252_v46 = vrot.slane %v7800_v36, 2  ;;  %v3368_v48 = vrot.slane %v7800_v36, 3  ;;  %v3484_v49 = vrot.slane %v7800_v36, 4 }
 0x758   :  { %v3001_v40 = vpop.f32.mrb[38].mxu1 }
 0x759   :  { %v7808_v28 = vmax.f32 %v2905_v38, %v3001_v40  ;;  %v3003_v42 = vpop.f32.mrb[39].mxu1  ;;  %v4939_v38 = vld [vmem:[%s8605_s3 + $0x190] sm:$0xff] }
 0x75a   :  { %v5805_v37 = vpack.c.bf16 %v4939_v38, %v4937_v13  ;;  %v4943_v40 = vld [vmem:[%s8605_s3 + $0x1b0] sm:$0xff]  ;;  %v4946_v42 = vld [vmem:[%s8605_s3 + $0x1c8] sm:$0xff]  ;;  %v4988_v38 = vld [vmem:[%s8605_s3 + $0x2d8] sm:$0xff] }
 0x75b   :  { %v3054_v50 = vrot.slane %v7808_v28, 1  ;;  %v3253_v51 = vrot.slane %v7808_v28, 2  ;;  %v3369_v12 = vrot.slane %v7808_v28, 3  ;;  %v3485_v52 = vrot.slane %v7808_v28, 4  ;;  %v4986_v13 = vld [vmem:[%s8605_s3 + $0x2c8] sm:$0xff] }
 0x75d   :  { %v3055_v56 = vsel %vm76_vm0, %v3053_v45, %v3054_v50  ;;  %v7840_v59 = vsel %vm288_vm3, %v3252_v46, %v3253_v51  ;;  %v7845_v60 = vsel %vm410_vm4, %v3368_v48, %v3369_v12  ;;  %v7850_v18 = vsel %vm532_vm2, %v3484_v49, %v3485_v52  ;;  %v4947_v45 = vld [vmem:[%s8605_s3 + $0x1d0] sm:$0xff]  ;;  %v4950_v46 = vld [vmem:[%s8605_s3 + $0x1e8] sm:$0xff]  ;;  %v4952_v48 = vld [vmem:[%s8605_s3 + $0x1f8] sm:$0xff] }
 0x75e   :  { %4927 = vmatmul.mubr.msk.f32.vlgmr.msra.gmra.mrb[20].mxu0 %vm1107_vm9, %v3055_v56  ;;  %v5813_v49 = vpack.c.bf16 %v4947_v45, %v4945_v44  ;;  %v4954_v56 = vld [vmem:[%s8605_s3 + $0x208] sm:$0xf]  ;;  %v4996_v45 = vld [vmem:[%s8605_s3 + $0x318] sm:$0xff]  ;;  %vm6222_vm0 = vmmov 0   ;;  %vm4404_vm3 = vcmask 982016  }
 0x75f   :  { %5782 = vmatpush1.bf16.msra.mxu0 %v5781_v41  ;;  %3136 = vmatprep.mubr.f32.mxu0 %v6219_v7  ;;  %v5809_v41 = vpack.c.bf16 %v4943_v40, %v4941_v39  ;;  %v4979_v39 = vld [vmem:[%s8605_s3 + $0x2b0] sm:$0xf]  ;;  %v5839_v40 = vpack.c.bf16 %v4988_v38, %v4986_v13  ;;  %v4994_v44 = vld [vmem:[%s8605_s3 + $0x308] sm:$0xff]  ;;  %v3763_v13 = vld [vmem:[%s8610_s8 + $0x38] sm:$0xff] }
 0x760   :  { %5784 = vmatprep.subr.bf16.mxu0 %v5783_v53  ;;  %v4949_v53 = vld [vmem:[%s8605_s3 + $0x1e0] sm:$0xff] }
 0x761   :  { %v5817_v55 = vpack.c.bf16 %v4951_v54, %v4949_v53  ;;  %v4998_v53 = vld [vmem:[%s8605_s3 + $0x328] sm:$0xff] }
 0x762   :  { %4928 = vmatmul.mubr.msk.f32.gmra.mrb[22].mxu0 %vm1107_vm9, %v3054_v50  ;;  %v5815_v50 = vpack.c.bf16 %v4952_v48, %v4950_v46  ;;  %v5847_v48 = vpack.c.bf16 %v4996_v45, %v4994_v44  ;;  %v3771_v44 = vld [vmem:[%s8610_s8 + $0x78] sm:$0xff] }
 0x763   :  { %5786 = vmatpush1.bf16.msra.mxu0 %v5785_v61  ;;  %3217 = vmatprep.mubr.f32.mxu0 %v6219_v7  ;;  %v4959_v61 = vld [vmem:[%s8605_s3 + $0x210] sm:$0xff] }
 0x764   :  { %5788 = vmatprep.subr.bf16.mxu0 %v5787_v62  ;;  %v4961_v62 = vld [vmem:[%s8605_s3 + $0x220] sm:$0xff] }
 0x767   :  { %5790 = vmatpush1.bf16.msra.mxu0 %v5789_v4  ;;  %v5821_v4 = vpack.c.bf16 %v4961_v62, %v4959_v61 }
 0x768   :  { %5792 = vmatprep.subr.bf16.mxu0 %v5791_v5  ;;  %v5823_v5 = vpack.c.bf16 %v4966_v1, %v4964_v0  ;;  %v5001_v0 = vld [vmem:[%s8605_s3 + $0x340] sm:$0xff]  ;;  %v5003_v1 = vld [vmem:[%s8605_s3 + $0x350] sm:$0xff] }
 0x76b   :  { %5794 = vmatpush1.bf16.msra.mxu0 %v5793_v14  ;;  %v5825_v14 = vpack.c.bf16 %v4965_v10, %v4963_v6 }
 0x76c   :  { %5796 = vmatprep.subr.bf16.mxu0 %v5795_v15  ;;  %v5827_v15 = vpack.c.bf16 %v4970_v11, %v4968_v2 }
 0x76f   :  { %5798 = vmatpush1.bf16.msra.mxu0 %v5797_v31  ;;  %v4972_v31 = vld [vmem:[%s8605_s3 + $0x278] sm:$0xff] }
 0x770   :  { %4929 = vmatprep.subr.msk.mxu0 %vm532_vm2, %v3028_v17  ;;  %v5829_v17 = vpack.c.bf16 %v4969_v20, %v4967_v16 }
 0x773   :  { %4930 = vmatpush1.msk.msra.mxu0 %vm532_vm2, %v3027_v29  ;;  %v4975_v29 = vld [vmem:[%s8605_s3 + $0x290] sm:$0xff] }
 0x774   :  { %4931 = vmatmul.mubr.msk.f32.vlgmr.msra.gmra.mrb[20].mxu0 %vm1107_vm9, %v7800_v36  ;;  %5800 = vmatprep.subr.bf16.mxu0 %v5799_v34  ;;  %v4948_v36 = vld [vmem:[%s8605_s3 + $0x1d8] sm:$0xff]  ;;  %v4977_v34 = vld [vmem:[%s8605_s3 + $0x2a0] sm:$0xff] }
 0x775   :  { %5802 = vmatpush1.bf16.msra.mxu0 %v5801_v8  ;;  %3223 = vmatprep.mubr.f32.mxu0 %v6219_v7  ;;  %v5811_v43 = vpack.c.bf16 %v4948_v36, %v4946_v42  ;;  %v5837_v8 = vpack.c.bf16 %v4977_v34, %v4975_v29  ;;  %v5841_v42 = vpack.c.bf16 %v4987_v63, %v4985_v32  ;;  %v3760_v29 = vld [vmem:[%s8610_s8 + $0x20] sm:$0xff]  ;;  %v3761_v34 = vld [vmem:[%s8610_s8 + $0x28] sm:$0xff] }
 0x776   :  { %5804 = vmatprep.subr.bf16.mxu0 %v5803_v26  ;;  %v4980_v26 = vld [vmem:[%s8605_s3 + $0x2b8] sm:$0xf]  ;;  %v3764_v32 = vld [vmem:[%s8610_s8 + $0x40] sm:$0xff]  ;;  %v3765_v63 = vld [vmem:[%s8610_s8 + $0x48] sm:$0xff] }
 0x778   :  { %4932 = vmatmul.mubr.msk.f32.gmra.mrb[22].mxu0 %vm1107_vm9, %v7808_v28 }
 0x779   :  { %5806 = vmatpush1.bf16.msra.mxu0 %v5805_v37  ;;  %3329 = vmatprep.mubr.f32.mxu0 %v6219_v7  ;;  %v4990_v37 = vld [vmem:[%s8605_s3 + $0x2e8] sm:$0xff] }
 0x77a   :  { %5808 = vmatprep.subr.bf16.mxu0 %v5807_v47  ;;  %v4992_v47 = vld [vmem:[%s8605_s3 + $0x2f8] sm:$0xff] }
 0x77b   :  { %v5843_v36 = vpack.c.bf16 %v4992_v47, %v4990_v37  ;;  %v5884_v37 = vpack.c.bf16 %v3765_v63, %v3764_v32  ;;  %v3766_v47 = vld [vmem:[%s8610_s8 + $0x50] sm:$0xff]  ;;  %v5055_v63 = vld [vmem:[%s8611_s9 + $0xb8] sm:$0xff] }
 0x77c   :  { %v5054_v32 = vld [vmem:[%s8611_s9 + $0xb0] sm:$0xff] }
 0x77d   :  { %5810 = vmatpush1.bf16.msra.mxu0 %v5809_v41  ;;  %v4989_v41 = vld [vmem:[%s8605_s3 + $0x2e0] sm:$0xff] }
 0x77e   :  { %5812 = vmatprep.subr.bf16.mxu0 %v5811_v43  ;;  %v4991_v43 = vld [vmem:[%s8605_s3 + $0x2f0] sm:$0xff] }
 0x77f   :  { %v5845_v46 = vpack.c.bf16 %v4991_v43, %v4989_v41  ;;  %v3770_v43 = vld [vmem:[%s8610_s8 + $0x70] sm:$0xff] }
 0x780   :  { %v5893_v45 = vpack.c.bf16 %v3771_v44, %v3770_v43  ;;  %v5046_v44 = vld [vmem:[%s8611_s9 + $0x80] sm:$0xff] }
 0x781   :  { %5814 = vmatpush1.bf16.msra.mxu0 %v5813_v49  ;;  %v4993_v49 = vld [vmem:[%s8605_s3 + $0x300] sm:$0xff] }
 0x782   :  { %5816 = vmatprep.subr.bf16.mxu0 %v5815_v50  ;;  %v4995_v50 = vld [vmem:[%s8605_s3 + $0x310] sm:$0xff] }
 0x783   :  { %v5849_v54 = vpack.c.bf16 %v4995_v50, %v4993_v49  ;;  %v3774_v50 = vld [vmem:[%s8610_s8 + $0x90] sm:$0xff] }
 0x785   :  { %5818 = vmatpush1.bf16.msra.mxu0 %v5817_v55 }
 0x786   :  { %4955 = vmatprep.subr.msk.mxu0 %vm532_vm2, %v4954_v56  ;;  %v4997_v56 = vld [vmem:[%s8605_s3 + $0x320] sm:$0xff] }
 0x787   :  { %v5853_v61 = vpack.c.bf16 %v4999_v57, %v4997_v56  ;;  %v5019_v56 = vld [vmem:[%s8610_s8 + $0xa0] sm:$0xff]  ;;  %v5020_v57 = vld [vmem:[%s8610_s8 + $0xa8] sm:$0xff] }
 0x789   :  { %4956 = vmatpush1.msk.msra.mxu0 %vm532_vm2, %v4953_v3  ;;  %v5857_v3 = vpack.c.bf16 %v5003_v1, %v5001_v0  ;;  %v5902_v0 = vpack.c.bf16 %v5020_v57, %v5019_v56  ;;  %v5021_v1 = vld [vmem:[%s8610_s8 + $0xb0] sm:$0xff]  ;;  %v5061_v56 = vld [vmem:[%s8611_s9 + $0xe8] sm:$0xff] }
 0x78a   :  { %4957 = vmatmul.mubr.msk.f32.vlgmr.msra.gmra.mrb[20].mxu0 %vm1107_vm9, %v7840_v59  ;;  %5820 = vmatprep.subr.bf16.mxu0 %v5819_v22  ;;  %v4974_v59 = vld [vmem:[%s8605_s3 + $0x288] sm:$0xff] }
 0x78b   :  { %5822 = vmatpush1.bf16.msra.mxu0 %v5821_v4  ;;  %3335 = vmatprep.mubr.f32.mxu0 %v6219_v7  ;;  %v5831_v19 = vpack.c.bf16 %v4974_v59, %v4972_v31  ;;  %v5006_v22 = vld [vmem:[%s8605_s3 + $0x368] sm:$0xf]  ;;  %v5005_v4 = vld [vmem:[%s8605_s3 + $0x360] sm:$0xf] }
 0x78c   :  { %5824 = vmatprep.subr.bf16.mxu0 %v5823_v5  ;;  %v3578_v5 = vld [vmem:[%s8606_s4] sm:$0x3] }
 0x78d   :  { %v3583_v6 = vrot.slane %v3578_v5, %v6531_v33  ;;  %v3587_v10 = vrot.slane %v3578_v5, %v6536_v35  ;;  %v3598_v35 = vld [vmem:[%s8609_s7] sm:$0x1f]  ;;  %v5024_v5 = vld [vmem:[%s8610_s8 + $0xc8] sm:$0xff] }
 0x78e   :  { %4958 = vmatmul.mubr.msk.f32.gmra.mrb[22].mxu0 %vm1107_vm9, %v3253_v51  ;;  %v4978_v51 = vld [vmem:[%s8605_s3 + $0x2a8] sm:$0xff] }
 0x78f   :  { %5826 = vmatpush1.bf16.msra.mxu0 %v5825_v14  ;;  %3445 = vmatprep.mubr.f32.mxu0 %v6219_v7  ;;  %v5835_v27 = vpack.c.bf16 %v4978_v51, %v4976_v24  ;;  %v5014_v24 = vld [vmem:[%s8609_s7 + $0x8] sm:$0x1f]  ;;  %v5872_v51 = vpack.c.bf16 %v3757_v23, %v3756_v21 }
 0x790   :  { %5828 = vmatprep.subr.bf16.mxu0 %v5827_v15  ;;  %v5036_v21 = vld [vmem:[%s8610_s8 + $0x128] sm:$0xff] }
 0x793   :  { %5830 = vmatpush1.bf16.msra.mxu0 %v5829_v17 }
 0x794   :  { %5832 = vmatprep.subr.bf16.mxu0 %v5831_v19 }
 0x797   :  { %5834 = vmatpush1.bf16.msra.mxu0 %v5833_v25  ;;  %v3758_v25 = vld [vmem:[%s8610_s8 + $0x10] sm:$0xff] }
 0x798   :  { %5836 = vmatprep.subr.bf16.mxu0 %v5835_v27  ;;  %v3759_v27 = vld [vmem:[%s8610_s8 + $0x18] sm:$0xff] }
 0x799   :  { %v5875_v30 = vpack.c.bf16 %v3759_v27, %v3758_v25  ;;  %v5040_v27 = vld [vmem:[%s8611_s9 + $0x50] sm:$0xff] }
 0x79b   :  { %5838 = vmatpush1.bf16.msra.mxu0 %v5837_v8  ;;  %v5878_v8 = vpack.c.bf16 %v3761_v34, %v3760_v29  ;;  %v5052_v29 = vld [vmem:[%s8611_s9 + $0xa0] sm:$0xff] }
 0x79c   :  { %4981 = vmatprep.subr.msk.mxu0 %vm532_vm2, %v4980_v26  ;;  %v3762_v26 = vld [vmem:[%s8610_s8 + $0x30] sm:$0xff] }
 0x79d   :  { %v5881_v38 = vpack.c.bf16 %v3763_v13, %v3762_v26  ;;  %v5042_v26 = vld [vmem:[%s8611_s9 + $0x60] sm:$0xff]  ;;  %v5043_v13 = vld [vmem:[%s8611_s9 + $0x68] sm:$0xff] }
 0x79f   :  { %4982 = vmatpush1.msk.msra.mxu0 %vm532_vm2, %v4979_v39  ;;  %v3767_v39 = vld [vmem:[%s8610_s8 + $0x58] sm:$0xff] }
 0x7a0   :  { %4983 = vmatmul.mubr.msk.f32.vlgmr.msra.gmra.mrb[20].mxu0 %vm1107_vm9, %v7845_v60  ;;  %5840 = vmatprep.subr.bf16.mxu0 %v5839_v40  ;;  %v5000_v60 = vld [vmem:[%s8605_s3 + $0x338] sm:$0xff]  ;;  %v5887_v40 = vpack.c.bf16 %v3767_v39, %v3766_v47  ;;  %v5965_v47 = vpack.c.bf16 %v5055_v63, %v5054_v32  ;;  %v5044_v39 = vld [vmem:[%s8611_s9 + $0x70] sm:$0xff]  ;;  %v5065_v32 = vld [vmem:[%s8611_s9 + $0x100] sm:$0xff] }
 0x7a1   :  { %5842 = vmatpush1.bf16.msra.mxu0 %v5841_v42  ;;  %3451 = vmatprep.mubr.f32.mxu0 %v6219_v7  ;;  %v5851_v55 = vpack.c.bf16 %v5000_v60, %v4998_v53  ;;  %v3768_v42 = vld [vmem:[%s8610_s8 + $0x60] sm:$0xff]  ;;  %v3775_v53 = vld [vmem:[%s8610_s8 + $0x98] sm:$0xff]  ;;  %v5066_v63 = vld [vmem:[%s8611_s9 + $0x108] sm:$0xff] }
 0x7a2   :  { %5844 = vmatprep.subr.bf16.mxu0 %v5843_v36  ;;  %v3769_v36 = vld [vmem:[%s8610_s8 + $0x68] sm:$0xff]  ;;  %v5899_v60 = vpack.c.bf16 %v3775_v53, %v3774_v50  ;;  %v5048_v53 = vld [vmem:[%s8611_s9 + $0x90] sm:$0xff] }
 0x7a3   :  { %v5890_v41 = vpack.c.bf16 %v3769_v36, %v3768_v42  ;;  %v5056_v42 = vld [vmem:[%s8611_s9 + $0xc0] sm:$0xff]  ;;  %v5057_v36 = vld [vmem:[%s8611_s9 + $0xc8] sm:$0xff] }
 0x7a4   :  { %4984 = vmatmul.mubr.msk.f32.gmra.mrb[22].mxu0 %vm1107_vm9, %v3369_v12  ;;  %v5004_v12 = vld [vmem:[%s8605_s3 + $0x358] sm:$0xff]  ;;  %v5968_v43 = vpack.c.bf16 %v5057_v36, %v5056_v42  ;;  %s6223_s3 = smov [#allocation3]  }
 0x7a5   :  { %5846 = vmatpush1.bf16.msra.mxu0 %v5845_v46  ;;  %3561 = vmatprep.mubr.f32.mxu0 %v6219_v7  ;;  %v5855_v62 = vpack.c.bf16 %v5004_v12, %v5002_v58  ;;  %v3772_v46 = vld [vmem:[%s8610_s8 + $0x80] sm:$0xff]  ;;  %v5068_v42 = vld [vmem:[%s8611_s9 + $0x118] sm:$0xff]  ;;  %s4580_s4 = sshll.u32 %s6223_s3, 4  ;;  %s4581_s4 = int_to_ptr.vmem [resolvable:$true] %s4580_s4 }
 0x7a6   :  { %5848 = vmatprep.subr.bf16.mxu0 %v5847_v48  ;;  %v3773_v48 = vld [vmem:[%s8610_s8 + $0x88] sm:$0xff]  ;;  %p6200_p1 = scmp.lt.s32.totalorder %s4581_s4, %s4581_s4 }
 0x7a7   :  { %v5896_v49 = vpack.c.bf16 %v3773_v48, %v3772_v46  ;;  %v5058_v46 = vld [vmem:[%s8611_s9 + $0xd0] sm:$0xff] }
 0x7a9   :  { %5850 = vmatpush1.bf16.msra.mxu0 %v5849_v54 }
 0x7aa   :  { %5852 = vmatprep.subr.bf16.mxu0 %v5851_v55 }
 0x7ad   :  { %5854 = vmatpush1.bf16.msra.mxu0 %v5853_v61 }
 0x7ae   :  { %5856 = vmatprep.subr.bf16.mxu0 %v5855_v62 }
 0x7b1   :  { %5858 = vmatpush1.bf16.msra.mxu0 %v5857_v3  ;;  %v5022_v3 = vld [vmem:[%s8610_s8 + $0xb8] sm:$0xff] }
 0x7b2   :  { %5007 = vmatprep.subr.msk.mxu0 %vm532_vm2, %v5006_v22  ;;  %v5905_v22 = vpack.c.bf16 %v5022_v3, %v5021_v1  ;;  %v3946_v1 = vld [vmem:[%s8611_s9] sm:$0xff]  ;;  %v3947_v3 = vld [vmem:[%s8611_s9 + $0x8] sm:$0xff] }
 0x7b5   :  { %5008 = vmatpush1.msk.msra.mxu0 %vm532_vm2, %v5005_v4  ;;  %v5023_v4 = vld [vmem:[%s8610_s8 + $0xc0] sm:$0xff] }
 0x7b6   :  { %5009 = vmatmul.mubr.msk.f32.vlgmr.msra.gmra.mrb[20].mxu0 %vm1107_vm9, %v7850_v18  ;;  %5931 = vmatprep.subr.bf16.mxu0 %v6221_v9 }
 0x7b7   :  { %3567 = vmatprep.mubr.f32.mxu0 %v6219_v7 }
 0x7ba   :  { %5010 = vmatmul.mubr.msk.f32.gmra.mrb[22].mxu0 %vm1107_vm9, %v3485_v52 }
 0x7bb   :  { %5194 = vmatprep.mubr.msk.f32.mxu0 %vm6222_vm0, %v6219_v7 }
 0x889   :  { %v3563_v2 = vpop.f32.mrb[20].mxu0 }
 0x88a   :  { %v3590_v11 = vadd.f32 %v3583_v6, %v3563_v2  ;;  %v3565_v14 = vpop.f32.mrb[21].mxu0  ;;  %v5026_v2 = vld [vmem:[%s8610_s8 + $0xd8] sm:$0xff] }
 0x88b   :  { %v3591_v18 = vadd.f32 %v3587_v10, %v3565_v14  ;;  %v5027_v14 = vld [vmem:[%s8610_s8 + $0xe0] sm:$0xff] }
 0x88c   :  { %6183 = vtanh.f32 %v3590_v11 }
 0x88d   :  { %v3569_v15 = vpop.f32.mrb[22].mxu0  ;;  %6185 = vtanh.f32 %v3591_v18  ;;  %v5028_v18 = vld [vmem:[%s8610_s8 + $0xe8] sm:$0xff] }
 0x88e   :  { %v3592_v16 = vadd.f32 %v3583_v6, %v3569_v15  ;;  %v3571_v20 = vpop.f32.mrb[23].mxu0  ;;  %v5908_v6 = vpack.c.bf16 %v5024_v5, %v5023_v4  ;;  %v5914_v15 = vpack.c.bf16 %v5028_v18, %v5027_v14  ;;  %v5075_v4 = vld [vmem:[%s8611_s9 + $0x148] sm:$0xff]  ;;  %v5947_v5 = vpack.c.bf16 %v3947_v3, %v3946_v1  ;;  %v5077_v14 = vld [vmem:[%s8611_s9 + $0x158] sm:$0xff]  ;;  %v4390_v1 = vld [vmem:[%s8613_s11 + $0x40] sm:$0xff] }
 0x88f   :  { %v3593_v28 = vadd.f32 %v3587_v10, %v3571_v20  ;;  %v5025_v10 = vld [vmem:[%s8610_s8 + $0xd0] sm:$0xff]  ;;  %v5030_v20 = vld [vmem:[%s8610_s8 + $0xf8] sm:$0xff]  ;;  %v4391_v3 = vld [vmem:[%s8613_s11 + $0x48] sm:$0xff] }
 0x890   :  { %6187 = vtanh.f32 %v3592_v16  ;;  %v5911_v11 = vpack.c.bf16 %v5026_v2, %v5025_v10  ;;  %v5029_v16 = vld [vmem:[%s8610_s8 + $0xf0] sm:$0xff]  ;;  %v3949_v2 = vld [vmem:[%s8611_s9 + $0x18] sm:$0xff] }
 0x891   :  { %6189 = vtanh.f32 %v3593_v28  ;;  %v5917_v28 = vpack.c.bf16 %v5030_v20, %v5029_v16  ;;  %v3948_v10 = vld [vmem:[%s8611_s9 + $0x10] sm:$0xff] }
 0x892   :  { %v5950_v16 = vpack.c.bf16 %v3949_v2, %v3948_v10  ;;  %v4394_v10 = vld [vmem:[%s8613_s11 + $0x60] sm:$0xff]  ;;  %v4395_v2 = vld [vmem:[%s8613_s11 + $0x68] sm:$0xff] }
 0x896   :  { %v6184_v52 = vpop.eup %6183 }
 0x897   :  { %v6186_v31 = vpop.eup %6185 }
 0x89a   :  { %v6188_v59 = vpop.eup %6187 }
 0x89b   :  { %v6190_v17 = vpop.eup %6189  ;;  %v5862_v19 = vpack.c.bf16 %v6188_v59, %v6184_v52  ;;  %v5031_v52 = vld [vmem:[%s8610_s8 + $0x100] sm:$0xff] }
 0x89c   :  { %v5859_v33 = vpack.c.bf16 %v6190_v17, %v6186_v31  ;;  %v5032_v31 = vld [vmem:[%s8610_s8 + $0x108] sm:$0xff]  ;;  %v5033_v17 = vld [vmem:[%s8610_s8 + $0x110] sm:$0xff] }
 0x89d   :  { %v5920_v59 = vpack.c.bf16 %v5032_v31, %v5031_v52  ;;  %v3951_v52 = vld [vmem:[%s8611_s9 + $0x28] sm:$0xff]  ;;  %v5078_v31 = vld [vmem:[%s8611_s9 + $0x160] sm:$0xff] }
 0x89e   :  { %5861 = vmatprep.subr.msk.bf16.mxu1 %vm7356_vm11, %v5859_v33 }
 0x89f   :  { %5864 = vmatpush1.bf16.msk.msra.mxu1 %vm7356_vm11, %v5862_v19 }
 0x8a0   :  { %5867 = vmatprep.subr.msk.bf16.mxu1 %vm7356_vm11, %v5859_v33 }
 0x8a2   :  { %5013 = vmatmul.mubr.msk.f32.vlgmr.msra.gmra.mrb[40].mxu1 %vm1654_vm12, %v3598_v35  ;;  %v5035_v35 = vld [vmem:[%s8610_s8 + $0x120] sm:$0xff] }
 0x8a3   :  { %5870 = vmatpush1.bf16.msk.msra.mxu1 %vm7356_vm11, %v5862_v19  ;;  %3747 = vmatprep.mubr.f32.mxu1 %v6219_v7  ;;  %v5034_v19 = vld [vmem:[%s8610_s8 + $0x118] sm:$0xff]  ;;  %v5926_v23 = vpack.c.bf16 %v5036_v21, %v5035_v35  ;;  %v5080_v21 = vld [vmem:[%s8611_s9 + $0x170] sm:$0xff] }
 0x8a4   :  { %5871 = vmatprep.subr.bf16.mxu1 %v6221_v9  ;;  %v5923_v33 = vpack.c.bf16 %v5034_v19, %v5033_v17  ;;  %v3953_v35 = vld [vmem:[%s8611_s9 + $0x38] sm:$0xff] }
 0x8a6   :  { %5017 = vmatmul.mubr.msk.f32.vlgmr.msra.gmra.mrb[42].mxu1 %vm1654_vm12, %v5014_v24  ;;  %v5037_v24 = vld [vmem:[%s8610_s8 + $0x130] sm:$0xff] }
 0x8a7   :  { %5873 = vmatpush1.bf16.msra.mxu1 %v5872_v51  ;;  %v5038_v51 = vld [vmem:[%s8610_s8 + $0x138] sm:$0xff] }
 0x8a8   :  { %5874 = vmatprep.subr.bf16.mxu1 %v6221_v9  ;;  %v5929_v25 = vpack.c.bf16 %v5038_v51, %v5037_v24 }
 0x8ab   :  { %5876 = vmatpush1.bf16.msra.mxu1 %v5875_v30  ;;  %v5041_v30 = vld [vmem:[%s8611_s9 + $0x58] sm:$0xff] }
 0x8ac   :  { %5877 = vmatprep.subr.bf16.mxu1 %v6221_v9  ;;  %v5932_v34 = vpack.c.bf16 %v5041_v30, %v5040_v27  ;;  %v3955_v27 = vld [vmem:[%s8611_s9 + $0x48] sm:$0xff]  ;;  %v5082_v30 = vld [vmem:[%s8611_s9 + $0x180] sm:$0xff] }
 0x8ae   :  { %5933 = vmatpush3.bf16.msra.mxu0 %v5932_v34 }
 0x8af   :  { %5879 = vmatpush1.bf16.msra.mxu1 %v5878_v8  ;;  %v5053_v8 = vld [vmem:[%s8611_s9 + $0xa8] sm:$0xff]  ;;  %5934 = vmatprep.subr.bf16.mxu0 %v6221_v9 }
 0x8b0   :  { %5880 = vmatprep.subr.bf16.mxu1 %v6221_v9 }
 0x8b3   :  { %5882 = vmatpush1.bf16.msra.mxu1 %v5881_v38  ;;  %v5962_v38 = vpack.c.bf16 %v5053_v8, %v5052_v29  ;;  %v5083_v29 = vld [vmem:[%s8611_s9 + $0x188] sm:$0xff] }
 0x8b4   :  { %5883 = vmatprep.subr.bf16.mxu1 %v6221_v9  ;;  %v6004_v8 = vpack.c.bf16 %v5083_v29, %v5082_v30  ;;  %v5085_v29 = vld [vmem:[%s8612_s10] ss:$0 sm:$0xff] }
 0x8b7   :  { %5885 = vmatpush1.bf16.msra.mxu1 %v5884_v37  ;;  %v5935_v37 = vpack.c.bf16 %v5043_v13, %v5042_v26  ;;  %v5063_v26 = vld [vmem:[%s8611_s9 + $0xf0] sm:$0xff]  ;;  %v5064_v13 = vld [vmem:[%s8611_s9 + $0xf8] sm:$0xff] }
 0x8b8   :  { %5886 = vmatprep.subr.bf16.mxu1 %v6221_v9 }
 0x8b9   :  { %5936 = vmatpush3.bf16.msra.mxu0 %v5935_v37 }
 0x8ba   :  { %5937 = vmatprep.subr.bf16.mxu0 %v6221_v9 }
 0x8bb   :  { %5888 = vmatpush1.bf16.msra.mxu1 %v5887_v40  ;;  %v5045_v40 = vld [vmem:[%s8611_s9 + $0x78] sm:$0xff] }
 0x8bc   :  { %5889 = vmatprep.subr.bf16.mxu1 %v6221_v9 }
 0x8bf   :  { %5891 = vmatpush1.bf16.msra.mxu1 %v5890_v41  ;;  %v5938_v41 = vpack.c.bf16 %v5045_v40, %v5044_v39  ;;  %v5980_v39 = vpack.c.bf16 %v5066_v63, %v5065_v32  ;;  %v5067_v40 = vld [vmem:[%s8611_s9 + $0x110] sm:$0xff] }
 0x8c0   :  { %5892 = vmatprep.subr.bf16.mxu1 %v6221_v9  ;;  %v5983_v36 = vpack.c.bf16 %v5068_v42, %v5067_v40  ;;  %v4485_v63 = vld [vmem:[%s8615_s13 + $0x30] sm:$0xff]  ;;  %v4488_v40 = vld [vmem:[%s8615_s13 + $0x48] sm:$0xff] }
 0x8c1   :  { %5939 = vmatpush3.bf16.msra.mxu0 %v5938_v41  ;;  %v5069_v41 = vld [vmem:[%s8611_s9 + $0x120] sm:$0xff] }
 0x8c2   :  { %5940 = vmatprep.subr.bf16.mxu0 %v6221_v9 }
 0x8c3   :  { %5894 = vmatpush1.bf16.msra.mxu1 %v5893_v45  ;;  %v5047_v45 = vld [vmem:[%s8611_s9 + $0x88] sm:$0xff] }
 0x8c4   :  { %5895 = vmatprep.subr.bf16.mxu1 %v6221_v9  ;;  %v5941_v48 = vpack.c.bf16 %v5047_v45, %v5046_v44  ;;  %v5071_v45 = vld [vmem:[%s8611_s9 + $0x130] sm:$0xff] }
 0x8c6   :  { %5942 = vmatpush3.bf16.msra.mxu0 %v5941_v48 }
 0x8c7   :  { %5897 = vmatpush1.bf16.msra.mxu1 %v5896_v49  ;;  %v5059_v49 = vld [vmem:[%s8611_s9 + $0xd8] sm:$0xff]  ;;  %5943 = vmatprep.subr.bf16.mxu0 %v6221_v9 }
 0x8c8   :  { %5898 = vmatprep.subr.bf16.mxu1 %v6221_v9  ;;  %v5971_v50 = vpack.c.bf16 %v5059_v49, %v5058_v46  ;;  %v5072_v46 = vld [vmem:[%s8611_s9 + $0x138] sm:$0xff] }
 0x8c9   :  { %v5989_v48 = vpack.c.bf16 %v5072_v46, %v5071_v45 }
 0x8cb   :  { %5900 = vmatpush1.bf16.msra.mxu1 %v5899_v60  ;;  %v5049_v60 = vld [vmem:[%s8611_s9 + $0x98] sm:$0xff] }
 0x8cc   :  { %5901 = vmatprep.subr.bf16.mxu1 %v6221_v9 }
 0x975   :  { %v3674_v54 = vpop.f32.mrb[40].mxu1 }
 0x976   :  { %v3676_v55 = vpop.f32.mrb[41].mxu1 }
 0x979   :  { %v3749_v58 = vpop.f32.mrb[42].mxu1 }
 0x97a   :  { %v3754_v12 = vmax.f32 %v3674_v54, %v3749_v58  ;;  %v3751_v61 = vpop.f32.mrb[43].mxu1  ;;  %v5060_v54 = vld [vmem:[%s8611_s9 + $0xe0] sm:$0xff] }
 0x97b   :  { %v3755_v62 = vmax.f32 %v3676_v55, %v3751_v61  ;;  %v5944_v55 = vpack.c.bf16 %v5049_v60, %v5048_v53  ;;  %v5974_v57 = vpack.c.bf16 %v5061_v56, %v5060_v54  ;;  %v4383_v53 = vld [vmem:[%s8613_s11 + $0x8] sm:$0xff]  ;;  %v4384_v60 = vld [vmem:[%s8613_s11 + $0x10] sm:$0xff] }
 0x97d   :  { %5018 = vmatprep.mubr.msk.f32.mxu1 %vm84_vm1, %v3755_v62  ;;  %5945 = vmatpush3.bf16.msra.mxu0 %v5944_v55  ;;  %v4385_v55 = vld [vmem:[%s8613_s11 + $0x18] sm:$0xff] }
 0x97e   :  { %3844 = vmatmul.mubr.f32.vlgmr.msra.gmra.mrb[44].mxu1 %v3754_v12  ;;  %5946 = vmatprep.subr.bf16.mxu0 %v6221_v9  ;;  %v6010_v56 = vpack.c.bf16 %v4385_v55, %v4384_v60 }
 0x97f   :  { %5903 = vmatpush1.bf16.msra.mxu1 %v5902_v0  ;;  %5039 = vmatprep.mubr.msk.f32.mxu1 %vm84_vm1, %v3755_v62  ;;  %vm3968_vm1 = vcmask 654336  }
 0x980   :  { %5904 = vmatprep.subr.bf16.mxu1 %v6221_v9 }
 0x983   :  { %5906 = vmatpush1.bf16.msra.mxu1 %v5905_v22  ;;  %v5074_v22 = vld [vmem:[%s8611_s9 + $0x140] sm:$0xff] }
 0x984   :  { %5907 = vmatprep.subr.bf16.mxu1 %v6221_v9 }
 0x987   :  { %5909 = vmatpush1.bf16.msra.mxu1 %v5908_v6  ;;  %v5992_v6 = vpack.c.bf16 %v5075_v4, %v5074_v22  ;;  %v6019_v22 = vpack.c.bf16 %v4391_v3, %v4390_v1  ;;  %v4392_v4 = vld [vmem:[%s8613_s11 + $0x50] sm:$0xff] }
 0x988   :  { %5910 = vmatprep.subr.bf16.mxu1 %v6221_v9 }
 0x98b   :  { %5912 = vmatpush1.bf16.msra.mxu1 %v5911_v11  ;;  %v5076_v11 = vld [vmem:[%s8611_s9 + $0x150] sm:$0xff] }
 0x98c   :  { %5913 = vmatprep.subr.bf16.mxu1 %v6221_v9  ;;  %v5995_v20 = vpack.c.bf16 %v5077_v14, %v5076_v11  ;;  %v6025_v11 = vpack.c.bf16 %v4395_v2, %v4394_v10  ;;  %v4396_v14 = vld [vmem:[%s8613_s11 + $0x70] sm:$0xff] }
 0x98f   :  { %5915 = vmatpush1.bf16.msra.mxu1 %v5914_v15 }
 0x990   :  { %5916 = vmatprep.subr.bf16.mxu1 %v6221_v9 }
 0x993   :  { %5918 = vmatpush1.bf16.msra.mxu1 %v5917_v28  ;;  %v3950_v28 = vld [vmem:[%s8611_s9 + $0x20] sm:$0xff] }
 0x994   :  { %5919 = vmatprep.subr.bf16.mxu1 %v6221_v9  ;;  %v5953_v17 = vpack.c.bf16 %v3951_v52, %v3950_v28  ;;  %v4482_v28 = vld [vmem:[%s8615_s13 + $0x18] sm:$0xff] }
 0x997   :  { %5921 = vmatpush1.bf16.msra.mxu1 %v5920_v59  ;;  %v5079_v59 = vld [vmem:[%s8611_s9 + $0x168] sm:$0xff] }
 0x998   :  { %5922 = vmatprep.subr.bf16.mxu1 %v6221_v9  ;;  %v5998_v19 = vpack.c.bf16 %v5079_v59, %v5078_v31 }
 0x99b   :  { %5924 = vmatpush1.bf16.msra.mxu1 %v5923_v33  ;;  %v3952_v33 = vld [vmem:[%s8611_s9 + $0x30] sm:$0xff] }
 0x99c   :  { %5925 = vmatprep.subr.bf16.mxu1 %v6221_v9  ;;  %v5956_v24 = vpack.c.bf16 %v3953_v35, %v3952_v33 }
 0x99f   :  { %5927 = vmatpush1.bf16.msra.mxu1 %v5926_v23  ;;  %v5081_v23 = vld [vmem:[%s8611_s9 + $0x178] sm:$0xff] }
 0x9a0   :  { %5928 = vmatprep.subr.bf16.mxu1 %v6221_v9  ;;  %v6001_v51 = vpack.c.bf16 %v5081_v23, %v5080_v21 }
 0x9a3   :  { %5930 = vmatpush1.bf16.msra.mxu1 %v5929_v25  ;;  %v3954_v25 = vld [vmem:[%s8611_s9 + $0x40] sm:$0xff] }
 0x9a4   :  { %5961 = vmatprep.subr.bf16.mxu1 %v6221_v9  ;;  %v5959_v34 = vpack.c.bf16 %v3955_v27, %v3954_v25 }
 0x9a6   :  { %3934 = vmatmul.mubr.f32.vlgmr.msra.gmra.mrb[46].mxu1 %v3754_v12 }
 0x9a7   :  { %5963 = vmatpush3.bf16.msra.mxu1 %v5962_v38  ;;  %5240 = vmatprep.mubr.msk.f32.mxu1 %vm6222_vm0, %v6219_v7  ;;  %v5977_v38 = vpack.c.bf16 %v5064_v13, %v5063_v26  ;;  %v4483_v13 = vld [vmem:[%s8615_s13 + $0x20] sm:$0xff] }
 0x9a8   :  { %5964 = vmatprep.subr.bf16.mxu1 %v6221_v9 }
 0x9ab   :  { %5966 = vmatpush3.bf16.msra.mxu1 %v5965_v47 }
 0x9ac   :  { %5967 = vmatprep.subr.bf16.mxu1 %v6221_v9 }
 0x9af   :  { %5969 = vmatpush3.bf16.msra.mxu1 %v5968_v43  ;;  %v5070_v43 = vld [vmem:[%s8611_s9 + $0x128] sm:$0xff] }
 0x9b0   :  { %5970 = vmatprep.subr.bf16.mxu1 %v6221_v9  ;;  %v5986_v44 = vpack.c.bf16 %v5070_v43, %v5069_v41  ;;  %v5086_v41 = vld [vmem:[%s8614_s12] ss:$0 sm:$0xff] }
 0x9b3   :  { %5972 = vmatpush3.bf16.msra.mxu1 %v5971_v50  ;;  %v4382_v50 = vld [vmem:[%s8613_s11] sm:$0xff] }
 0x9b4   :  { %5973 = vmatprep.subr.bf16.mxu1 %v6221_v9  ;;  %v6007_v54 = vpack.c.bf16 %v4383_v53, %v4382_v50 }
 0x9b7   :  { %5975 = vmatpush3.bf16.msra.mxu1 %v5974_v57  ;;  %v4386_v57 = vld [vmem:[%s8613_s11 + $0x20] sm:$0xff] }
 0x9b8   :  { %5991 = vmatprep.subr.bf16.mxu1 %v6221_v9 }
 0xa51   :  { %v3845_v58 = vpop.f32.mrb[44].mxu1 }
 0xa52   :  { %v3847_v12 = vpop.f32.mrb[45].mxu1 }
 0xa79   :  { %v3935_v61 = vpop.f32.mrb[46].mxu1 }
 0xa7a   :  { %v3939_v62 = vmax.f32 %v3845_v58, %v3935_v61  ;;  %v3937_v0 = vpop.f32.mrb[47].mxu1  ;;  %v4387_v58 = vld [vmem:[%s8613_s11 + $0x28] sm:$0xff]  ;;  %v4388_v61 = vld [vmem:[%s8613_s11 + $0x30] sm:$0xff] }
 0xa7b   :  { %v6013_v12 = vpack.c.bf16 %v4387_v58, %v4386_v57 }
 0xa7c   :  { %3940 = vst.msk [vmem:[#allocation2 + $0x1] sm:$0x1] %vm1999_vm13, %v3939_v62 }
 0xa7d   :  { %3941 = vst.msk [vmem:[#allocation2 + $0x2] sm:$0x2] %vm2002_vm14, %v3939_v62 }
 0xa7e   :  { %3942 = vst.msk [vmem:[#allocation2 + $0x3] sm:$0x4] %vm2005_vm15, %v3939_v62 }
 0xa7f   :  { %3943 = vst.msk [vmem:[#allocation2 + $0x4] sm:$0x8] %vm2008_vm5, %v3939_v62 }
 0xa80   :  { %3944 = vst.msk [vmem:[#allocation2 + $0x5] sm:$0x10] %vm2011_vm6, %v3939_v62  ;;  %v4389_v62 = vld [vmem:[%s8613_s11 + $0x38] sm:$0xff] }
 0xa81   :  { %v6016_v0 = vpack.c.bf16 %v4389_v62, %v4388_v61 }
 0xa83   :  { %v3945_v37 = vld [vmem:[#allocation2] sm:$0x3] }
 0xa84   :  { %v3956_v18 = vld [vmem:[#allocation2 + $0x2] sm:$0x3] }
 0xa85   :  { %v4115_v15 = vld [vmem:[#allocation2 + $0x4] sm:$0x3]  ;;  %5195 = vmatmul.mubr.msk.f32.vlgmr.msra.gmra.mrb[24].mxu0 %vm3968_vm1, %v3956_v18 }
 0xa86   :  { %5241 = vmatmul.mubr.msk.f32.vlgmr.msra.gmra.mrb[48].mxu1 %vm3968_vm1, %v4115_v15  ;;  %5948 = vmatpush3.bf16.msra.mxu0 %v5947_v5  ;;  %v4201_v49 = vld [vmem:[#allocation2 + $0x6] sm:$0x3]  ;;  %v4393_v5 = vld [vmem:[%s8613_s11 + $0x58] sm:$0xff]  ;;  %v4480_v15 = vld [vmem:[%s8615_s13 + $0x8] sm:$0xff] }
 0xa87   :  { %5993 = vmatpush3.bf16.msra.mxu1 %v5992_v6  ;;  %5949 = vmatprep.subr.bf16.mxu0 %v6221_v9  ;;  %v4287_v47 = vld [vmem:[#allocation2 + $0x8] sm:$0x3]  ;;  %v6022_v6 = vpack.c.bf16 %v4393_v5, %v4392_v4  ;;  %v4479_v18 = vld [vmem:[%s8615_s13] sm:$0xff] }
 0xa88   :  { %5994 = vmatprep.subr.bf16.mxu1 %v6221_v9  ;;  %5217 = vmatprep.mubr.msk.f32.mxu0 %vm6222_vm0, %v6219_v7 }
 0xa89   :  { %5286 = vmatprep.mubr.msk.f32.mxu1 %vm6222_vm0, %v6219_v7 }
 0xa8a   :  { %5951 = vmatpush3.bf16.msra.mxu0 %v5950_v16  ;;  %v4481_v16 = vld [vmem:[%s8615_s13 + $0x10] sm:$0xff] }
 0xa8b   :  { %5996 = vmatpush3.bf16.msra.mxu1 %v5995_v20  ;;  %5952 = vmatprep.subr.bf16.mxu0 %v6221_v9  ;;  %v6028_v20 = vpack.c.bf16 %v4480_v15, %v4479_v18  ;;  %v6031_v52 = vpack.c.bf16 %v4482_v28, %v4481_v16 }
 0xa8c   :  { %5997 = vmatprep.subr.bf16.mxu1 %v6221_v9 }
 0xa8e   :  { %5954 = vmatpush3.bf16.msra.mxu0 %v5953_v17 }
 0xa8f   :  { %5999 = vmatpush3.bf16.msra.mxu1 %v5998_v19  ;;  %5955 = vmatprep.subr.bf16.mxu0 %v6221_v9 }
 0xa90   :  { %6000 = vmatprep.subr.bf16.mxu1 %v6221_v9 }
 0xa92   :  { %5957 = vmatpush3.bf16.msra.mxu0 %v5956_v24 }
 0xa93   :  { %6002 = vmatpush3.bf16.msra.mxu1 %v6001_v51  ;;  %5958 = vmatprep.subr.bf16.mxu0 %v6221_v9 }
 0xa94   :  { %6003 = vmatprep.subr.bf16.mxu1 %v6221_v9 }
 0xa96   :  { %5960 = vmatpush3.bf16.msra.mxu0 %v5959_v34 }
 0xa97   :  { %6005 = vmatpush3.bf16.msra.mxu1 %v6004_v8  ;;  %5976 = vmatprep.subr.bf16.mxu0 %v6221_v9 }
 0xa98   :  { %6027 = vmatprep.subr.bf16.mxu1 %v6221_v9 }
 0xa99   :  { %5218 = vmatmul.mubr.msk.f32.vlgmr.msra.gmra.mrb[26].mxu0 %vm3968_vm1, %v3945_v37  ;;  %v4486_v37 = vld [vmem:[%s8615_s13 + $0x38] sm:$0xff] }
 0xa9a   :  { %5287 = vmatmul.mubr.msk.f32.vlgmr.msra.gmra.mrb[50].mxu1 %vm3968_vm1, %v4287_v47  ;;  %5978 = vmatpush3.bf16.msra.mxu0 %v5977_v38  ;;  %v4484_v38 = vld [vmem:[%s8615_s13 + $0x28] sm:$0xff]  ;;  %v6037_v47 = vpack.c.bf16 %v4486_v37, %v4485_v63 }
 0xa9b   :  { %5263 = vmatprep.mubr.msk.f32.mxu0 %vm6222_vm0, %v6219_v7  ;;  %5979 = vmatprep.subr.bf16.mxu0 %v6221_v9  ;;  %v6034_v32 = vpack.c.bf16 %v4484_v38, %v4483_v13 }
 0xa9c   :  { %5344 = vmatprep.mubr.msk.f32.mxu1 %vm6222_vm0, %v6219_v7  ;;  %6029 = vmatpush3.bf16.msra.mxu1 %v6028_v20 }
 0xa9d   :  { %6030 = vmatprep.subr.bf16.mxu1 %v6221_v9 }
 0xa9e   :  { %5981 = vmatpush3.bf16.msra.mxu0 %v5980_v39  ;;  %v4487_v39 = vld [vmem:[%s8615_s13 + $0x40] sm:$0xff] }
 0xa9f   :  { %5982 = vmatprep.subr.bf16.mxu0 %v6221_v9  ;;  %v6040_v42 = vpack.c.bf16 %v4488_v40, %v4487_v39 }
 0xaa0   :  { %6032 = vmatpush3.bf16.msra.mxu1 %v6031_v52 }
 0xaa1   :  { %6033 = vmatprep.subr.bf16.mxu1 %v6221_v9 }
 0xaa2   :  { %5984 = vmatpush3.bf16.msra.mxu0 %v5983_v36  ;;  %v4489_v36 = vld [vmem:[%s8615_s13 + $0x50] sm:$0xf]  ;;  %s6195_s13 = scalar_lea.vmem %s4581_s4, 32 }
 0xaa3   :  { %5985 = vmatprep.subr.bf16.mxu0 %v6221_v9  ;;  %p6196_p0 = scmp.ne.s32.totalorder %s4581_s4, %s6195_s13  ;;  %p6201_p2 = scmp.lt.s32.totalorder %s6195_s13, %s6195_s13 }
 0xaa4   :  { %6035 = vmatpush3.bf16.msra.mxu1 %v6034_v32 }
 0xaa5   :  { %6036 = vmatprep.subr.bf16.mxu1 %v6221_v9  ;;  %p6202_p3 = por %p6201_p2, %p6200_p1 }
 0xaa6   :  { %5987 = vmatpush3.bf16.msra.mxu0 %v5986_v44 }
 0xaa7   :  { %5988 = vmatprep.subr.bf16.mxu0 %v6221_v9  ;;  %p6203_p4 = pnand %p6202_p3, %p6196_p0 }
 0xaa8   :  { %6038 = vmatpush3.bf16.msra.mxu1 %v6037_v47 }
 0xaa9   :  { %6039 = vmatprep.subr.bf16.mxu1 %v6221_v9 }
 0xaaa   :  { %5990 = vmatpush3.bf16.msra.mxu0 %v5989_v48 }
 0xaab   :  { %6006 = vmatprep.subr.bf16.mxu0 %v6221_v9 }
 0xaac   :  { %6041 = vmatpush3.bf16.msra.mxu1 %v6040_v42 }
 0xaad   :  { %5264 = vmatmul.mubr.msk.f32.vlgmr.msra.gmra.mrb[28].mxu0 %vm3968_vm1, %v4201_v49  ;;  %5342 = vmatprep.subr.mxu1 %v6219_v7 }
 0xaae   :  { %5319 = vmatprep.mubr.msk.f32.mxu0 %vm6222_vm0, %v6219_v7  ;;  %6008 = vmatpush3.bf16.msra.mxu0 %v6007_v54 }
 0xaaf   :  { %6009 = vmatprep.subr.bf16.mxu0 %v6221_v9 }
 0xab0   :  { %5343 = vmatpush3.msk.msra.mxu1 %vm532_vm2, %v4489_v36 }
 0xab2   :  { %6011 = vmatpush3.bf16.msra.mxu0 %v6010_v56 }
 0xab3   :  { %6012 = vmatprep.subr.bf16.mxu0 %v6221_v9 }
 0xab6   :  { %6014 = vmatpush3.bf16.msra.mxu0 %v6013_v12 }
 0xab7   :  { %6015 = vmatprep.subr.bf16.mxu0 %v6221_v9 }
 0xaba   :  { %6017 = vmatpush3.bf16.msra.mxu0 %v6016_v0 }
 0xabb   :  { %6018 = vmatprep.subr.bf16.mxu0 %v6221_v9 }
 0xabe   :  { %6020 = vmatpush3.bf16.msra.mxu0 %v6019_v22 }
 0xabf   :  { %6021 = vmatprep.subr.bf16.mxu0 %v6221_v9 }
 0xac2   :  { %6023 = vmatpush3.bf16.msra.mxu0 %v6022_v6 }
 0xac3   :  { %6024 = vmatprep.subr.bf16.mxu0 %v6221_v9 }
 0xac6   :  { %6026 = vmatpush3.bf16.msra.mxu0 %v6025_v11 }
 0xac7   :  { %5317 = vmatprep.subr.mxu0 %v6219_v7  ;;  %v5088_v7 = vld [vmem:[%s8616_s14] ss:$0 sm:$0xff] }
 0xaca   :  { %5318 = vmatpush3.msra.mxu0 %v4396_v14 }
 0xb58   :  { %v4038_v31 = vpop.f32.mrb[24].mxu0 }
 0xb59   :  { %v4196_v59 = vpop.f32.mrb[48].mxu1  ;;  %v5196_v17 = vpop.f32.mrb[25].mxu0 }
 0xb5a   :  { %v5242_v19 = vpop.f32.mrb[49].mxu1 }
 0xb6c   :  { %v4111_v33 = vpop.f32.mrb[26].mxu0 }
 0xb6d   :  { %v4368_v35 = vpop.f32.mrb[50].mxu1  ;;  %v4112_v21 = vadd.f32 %v4111_v33, %v4038_v31  ;;  %v5219_v23 = vpop.f32.mrb[27].mxu0 }
 0xb6e   :  { %v5288_v24 = vpop.f32.mrb[51].mxu1 }
 0xb6f   :  { %v4200_v51 = vadd.f32 %v4196_v59, %v4112_v21 }
 0xb80   :  { %v4282_v25 = vpop.f32.mrb[28].mxu0 }
 0xb81   :  { %v4286_v27 = vadd.f32 %v4282_v25, %v4200_v51  ;;  %v5265_v30 = vpop.f32.mrb[29].mxu0 }
 0xb83   :  { %v4372_v34 = vadd.f32 %v4368_v35, %v4286_v27 }
 0xb85   :  { %v4380_v8 = vadd.f32 %v5085_v29, %v4372_v34 }
 0xb87   :  { %6191 = vtanh.f32 %v4380_v8 }
 0xb91   :  { %v6192_v26 = vpop.eup %6191 }
 0xb92   :  { %5320 = vmatmul.mubr.msk.f32.vlgmr.msra.gmra.mrb[30].mxu0 %vm4404_vm3, %v6192_v26 }
 0xc65   :  { %v4474_v43 = vpop.f32.mrb[30].mxu0 }
 0xc66   :  { %v4475_v44 = vadd.f32 %v5086_v41, %v4474_v43  ;;  %v5321_v45 = vpop.f32.mrb[31].mxu0 }
 0xc68   :  { %6193 = vtanh.f32 %v4475_v44 }
 0xc72   :  { %v6194_v46 = vpop.eup %6193 }
 0xc73   :  { %5345 = vmatmul.mubr.msk.f32.vlgmr.msra.gmra.mrb[52].mxu1 %vm1107_vm9, %v6194_v46 }
 0xd46   :  { %v4569_v9 = vpop.f32.mrb[52].mxu1 }
 0xd47   :  { %v4570_v48 = vadd.f32 %v5088_v7, %v4569_v9  ;;  %v5346_v49 = vpop.f32.mrb[53].mxu1 }
 0xd49   :  { %4573 = vst [vmem:[#allocation3] sm:$0x3] %v4570_v48 }
 0xd4a   :  { %6206 = shalt.err (!%p6203_p4)
}
 0xd4b   :  { %s6207_s1 = scalar_lea.hbm %s8617_s15, 32 }
 0xd4c   :  { %p6208_p5 = scmp.ne.s32.totalorder %s8617_s15, %s6207_s1  ;;  %p6211_p6 = scmp.lt.u32.totalorder %s6207_s1, %s8617_s15 }
 0xd4e   :  { %p6213_p7 = pnand %p6211_p6, %p6208_p5 }
 0xd50   :  { %6216 = shalt.err (!%p6213_p7)
}
 0xd51   :  { %4583 = dma.vmem_to_hbm [thread:$0]  %s4581_s4, 32, %s8617_s15, [#allocation4]  }
 0xd52   :  { %6217 = dma.done.wait [#allocation4], 32  }
 0xd53   :  { %6218 = vsyncadd [#allocation4], 4294967264 }
 0xd54   :  { %4587 = vsyncpa [#allocation4], 1 }

</bundles_post_ra>
